<compile_context>
chip_gen: v7x
topology: tpu7x:2x2x1
jax: 0.10.0
libtpu: 0.0.40
codegen_flags: <defaults>
</compile_context>

<pallas_src>
import functools

import numpy as np
import jax
import jax.numpy as jnp
from jax.experimental import pallas as pl
from jax.experimental.pallas import tpu as pltpu

KERNEL = 4  # tile size used by the 'tiled' detector


def _pick_tile_rows(nth, w, target_bytes, min_steps=2):
    """Tile-rows of 4x4 tiles per grid step for kernel 1.

    Must divide nth and keep the output block sublane friendly (multiple of 8)
    unless it is the full extent.  Sized to ~target_bytes of score data per
    step (input DMA pipelines with compute) while keeping >= min_steps grid
    steps on non-trivial maps so the "parallel" axis can shard across the two
    v7x TensorCores; tiny maps run in a single step.
    """
    limit = max(1, target_bytes // (KERNEL * w * 4))
    if nth < 16 and nth <= limit:
        return nth                                  # tiny map: one step
    cap = min(limit, max(1, nth // min_steps))
    divs8 = [d for d in range(8, nth + 1, 8) if nth % d == 0]
    fits = [d for d in divs8 if d <= cap]
    if fits:
        return max(fits)
    if divs8:
        return min(divs8)       # smallest sublane-friendly divisor (over budget but valid)
    return nth                  # no multiple-of-8 divisor: single full-extent block


def _pick_lane_block(hw, max_blk=2048):
    """Lane block of the flattened (C, H*W) descriptor map for kernel 2."""
    for b in (2048, 1024, 512, 256, 128):
        if b <= max_blk and hw % b == 0:
            return b
    return hw                   # odd sizes: single full-extent block


def _tile_rowmax_kernel(s_ref, val_ref, dr_ref, *, h, w, r, t_rows):
    """Fused border-zero + max / first-argmax over the 4 rows of each 4x4 tile row.

    s_ref:   (t_rows*KERNEL, w) block of the (H, W) score map (natural layout).
    val_ref: (t_rows, w) f32 -- per image column, max over the 4 in-tile rows.
    dr_ref:  (t_rows, w) i32 -- first in-tile row (0..3) achieving that max.
    """
    pid = pl.program_id(0)
    row_blk = t_rows * KERNEL

    # Column (lane) validity is identical for every phase and every step.
    col = jax.lax.broadcasted_iota(jnp.int32, (t_rows, w), 1)
    col_ok = (col >= r) & (col < w - r)

    def fold(mask_rows):
        if mask_rows:
            base = pid * row_blk
            trow4 = jax.lax.broadcasted_iota(jnp.int32, (t_rows, w), 0) * KERNEL
        best_v = jnp.zeros((t_rows, w), jnp.float32)
        best_dr = jnp.zeros((t_rows, w), jnp.int32)
        for dr in range(KERNEL):                    # static, unrolled (4 phases)
            # Strided sublane read: rows dr, dr+4, ... of the natural-layout block.
            s = s_ref[pl.ds(dr, t_rows, stride=KERNEL), :].astype(jnp.float32)
            ok = col_ok
            if mask_rows:
                grow = base + trow4 + dr            # global image row of this element
                ok = ok & (grow >= r) & (grow < h - r)
            s = jnp.where(ok, s, 0.0)
            if dr == 0:
                best_v = s
            else:
                upd = s > best_v                    # strict '>' == first-occurrence argmax
                best_v = jnp.where(upd, s, best_v)
                best_dr = jnp.where(upd, jnp.int32(dr), best_dr)
        val_ref[...] = best_v
        dr_ref[...] = best_dr

    if row_blk >= r:
        # Interior blocks never touch the row border: skip the dead mask work.
        interior = (pid > 0) & (pid < pl.num_programs(0) - 1)

        @pl.when(interior)
        def _():
            fold(False)

        @pl.when(jnp.logical_not(interior))
        def _():
            fold(True)
    else:
        fold(True)      # pathological radius: every block may straddle the border


def _desc_gather_kernel(idx_ref, d_ref, o_ref, *, hw_blk):
    """One-hot MXU gather of descriptor columns + L2 normalization.

    idx_ref: (1, tile_n) i32 -- flat y*W + x indices of this keypoint block.
    d_ref:   (C, hw_blk) lane block of the descriptor map in native (C, H*W) layout.
    o_ref:   (C, tile_n) f32 output block (accumulator across the hw grid axis).
    """
    j = pl.program_id(1)

    @pl.when(j == 0)
    def _():
        o_ref[...] = jnp.zeros_like(o_ref)

    tile_n = o_ref.shape[1]
    # Global flat spatial index of each sublane of this block.
    col = j * hw_blk + jax.lax.broadcasted_iota(jnp.int32, (hw_blk, tile_n), 0)
    onehot = (col == idx_ref[...]).astype(jnp.float32)            # (hw_blk, tile_n)
    o_ref[...] += jnp.dot(d_ref[...].astype(jnp.float32), onehot,
                          preferred_element_type=jnp.float32)     # (C, tile_n) on the MXU

    @pl.when(j == pl.num_programs(1) - 1)
    def _():
        d = o_ref[...]
        ssq = jnp.sum(d * d, axis=0, keepdims=True)               # (1, tile_n)
        o_ref[...] = d * jax.lax.rsqrt(ssq + 1e-12)               # EUP rsqrt; eps guards norm==0


class DKD:
    def __init__(self, radius=2, top_k=500, scores_th=0.5, n_limit=5000,
                 detector='tiled'):
        self.radius = radius
        self.top_k = top_k
        self.scores_th = scores_th
        self.n_limit = n_limit
        self.detector_type = detector
        # TODO(synk): 'maxpool' detector path (simple_nms + bilinear grid_sample)
        # and the top_k<=0 threshold mode are not implemented; only 'tiled' is.

        # Generation-aware blocking: v7x has 64 MiB VMEM but 2 TensorCores
        # (smaller blocks, keep 2-way parallel occupancy); v5e/v6e have 128 MiB
        # and a single TC (bigger blocks, fewer grid steps).
        kind = ""
        try:
            kind = jax.devices()[0].device_kind.lower()
        except Exception:
            pass
        is_v7 = "v7" in kind
        self._score_target_bytes = (2 << 20) if is_v7 else (4 << 20)
        self._desc_tile_n = 128 if is_v7 else 256
        self._vmem_limit = (32 << 20) if is_v7 else (64 << 20)

        self._forward = jax.jit(self._forward_impl)

    # ---- keypoint detection ('tiled') ------------------------------------
    def tiled_detect_keypoints(self, scores_map):
        _, _, h, w = scores_map.shape
        nth, ntw = h // KERNEL, w // KERNEL
        assert self.top_k <= nth * ntw
        r = self.radius + 1

        # Drop the unit batch/channel dims only: trailing (H, W) unchanged -> free view.
        scores2d = scores_map.reshape(h, w).astype(jnp.float32)
        t_rows = _pick_tile_rows(nth, w, self._score_target_bytes)
        row_blk = t_rows * KERNEL

        colmax, coldr = pl.pallas_call(
            functools.partial(_tile_rowmax_kernel, h=h, w=w, r=r, t_rows=t_rows),
            grid=(nth // t_rows,),
            in_specs=[pl.BlockSpec((row_blk, w), lambda i: (i, 0))],
            out_specs=(pl.BlockSpec((t_rows, w), lambda i: (i, 0)),
                       pl.BlockSpec((t_rows, w), lambda i: (i, 0))),
            out_shape=(jax.ShapeDtypeStruct((nth, w), jnp.float32),
                       jax.ShapeDtypeStruct((nth, w), jnp.int32)),
            compiler_params=pltpu.CompilerParams(
                dimension_semantics=("parallel",),
                vmem_limit_bytes=self._vmem_limit),
        )(scores2d)

        # Small XLA glue on the 4x-reduced kernel output: fold the 4 in-tile
        # columns keeping np.argmax's first-occurrence tie-break (smallest
        # k = dr*4 + dc), then pick top_k.
        # TODO(synk): the 4-lane-group fold could move in-kernel with pltpu.roll,
        # but the compacted (every-4th-lane) write has no robust Pallas lowering.
        v4 = colmax.reshape(nth, ntw, KERNEL)
        k4 = coldr.reshape(nth, ntw, KERNEL) * KERNEL + jnp.arange(KERNEL, dtype=jnp.int32)
        tile_val = jnp.max(v4, axis=-1)
        tile_k = jnp.min(jnp.where(v4 == tile_val[..., None], k4, KERNEL * KERNEL), axis=-1)

        # TODO(synk): np.argpartition (unordered top-k) has no clean Pallas
        # equivalent; lax.top_k selects the same set (up to ties in scores).
        top_vals, top_idx = jax.lax.top_k(tile_val.reshape(-1), self.top_k)
        k_sel = tile_k.reshape(-1)[top_idx]
        rows = (top_idx // ntw) * KERNEL + k_sel // KERNEL
        cols = (top_idx % ntw) * KERNEL + k_sel % KERNEL
        keypoints_xy = jnp.stack([cols, rows], axis=1).astype(jnp.int32)  # (top_k, 2) (x, y)
        return keypoints_xy, top_vals

    # ---- descriptor sampling ----------------------------------------------
    def sample_descriptor(self, descriptor_map, kpts):
        _, c, h, w = descriptor_map.shape
        n = kpts.shape[0]
        hw = h * w

        d_flat = descriptor_map.reshape(c, hw)              # native (C, H*W) view
        flat_idx = (kpts[:, 1] * w + kpts[:, 0]).astype(jnp.int32)

        # Lane-dense keypoint blocks (multiple of 128 -> unmasked stores).
        tile_n = max(128, min(self._desc_tile_n, ((n + 127) // 128) * 128))
        n_blocks = (n + tile_n - 1) // tile_n
        n_pad = n_blocks * tile_n
        idx2d = jnp.pad(flat_idx, (0, n_pad - n)).reshape(1, n_pad)  # pad w/ index 0 (sliced off)

        hw_blk = _pick_lane_block(hw)
        n_hw = hw // hw_blk

        desc_cn = pl.pallas_call(
            functools.partial(_desc_gather_kernel, hw_blk=hw_blk),
            grid=(n_blocks, n_hw),
            in_specs=[pl.BlockSpec((1, tile_n), lambda i, j: (0, i)),
                      pl.BlockSpec((c, hw_blk), lambda i, j: (0, j))],
            out_specs=pl.BlockSpec((c, tile_n), lambda i, j: (0, i)),
            out_shape=jax.ShapeDtypeStruct((c, n_pad), jnp.float32),
            compiler_params=pltpu.CompilerParams(
                dimension_semantics=("parallel", "arbitrary"),
                vmem_limit_bytes=self._vmem_limit),
        )(idx2d, d_flat)

        # Only the N gathered descriptors get transposed (tiny), never the map.
        return desc_cn[:, :n].T                             # (N, C), L2-normalized

    # ---- forward ------------------------------------------------------------
    def _forward_impl(self, scores_map, descriptor_map):
        h, w = descriptor_map.shape[2:]
        keypoints, kptscores = self.tiled_detect_keypoints(scores_map)
        descriptors = self.sample_descriptor(descriptor_map, keypoints)
        keypoints = (keypoints.astype(jnp.float32)
                     / jnp.array([w - 1, h - 1], jnp.float32) * 2.0 - 1.0)
        return keypoints, descriptors, kptscores

    def __call__(self, scores_map, descriptor_map):
        return self._forward(scores_map, descriptor_map)


if __name__ == "__main__":
    H, W, C = 128, 128, 32
    TOP_K = 200
    key = jax.random.PRNGKey(0)
    k1, k2 = jax.random.split(key)
    scores_map = jax.random.uniform(k1, (1, 1, H, W), dtype=jnp.float32)
    descriptor_map = jax.random.normal(k2, (1, C, H, W), dtype=jnp.float32)

    dkd = DKD(radius=2, top_k=TOP_K, detector='tiled')
    kpts, descs, kptscores = dkd(scores_map, descriptor_map)
    kpts, descs, kptscores = jax.block_until_ready((kpts, descs, kptscores))

    # ---- pure numpy/JAX reference (mirrors the PyTorch module semantics) ----
    s = np.asarray(scores_map)[0, 0].copy()
    r = dkd.radius + 1
    s[:r, :] = 0; s[-r:, :] = 0; s[:, :r] = 0; s[:, -r:] = 0
    nth, ntw = H // KERNEL, W // KERNEL
    resh = s.reshape(nth, KERNEL, ntw, KERNEL).swapaxes(1, 2).reshape(nth, ntw, -1)
    arg = resh.argmax(axis=2)
    vals = np.take_along_axis(resh, arg[..., None], axis=2)[..., 0]
    rowi = (np.arange(nth) * KERNEL)[:, None] + arg // KERNEL
    coli = np.arange(ntw) * KERNEL + arg % KERNEL
    # same top-k selection as the wrapper (sorted; argpartition gives same set)
    tv, ti = jax.lax.top_k(jnp.asarray(vals.reshape(-1)), TOP_K)
    tv, ti = np.asarray(tv), np.asarray(ti)
    tr = rowi.reshape(-1)[ti]
    tc = coli.reshape(-1)[ti]
    d = np.asarray(descriptor_map)[0][:, tr, tc]             # (C, N)
    d_ref = (d / np.linalg.norm(d, axis=0)).T                 # (N, C)
    kp_ref = (np.stack([tc, tr], axis=1)
              / np.array([W - 1, H - 1], np.float32) * 2.0 - 1.0)

    assert np.allclose(np.asarray(kptscores), tv, atol=1e-6), "scores mismatch"
    assert np.allclose(np.asarray(kpts), kp_ref, atol=1e-6), "keypoints mismatch"
    assert np.allclose(np.asarray(descs), d_ref, atol=1e-5), "descriptors mismatch"

    print("KERNEL_OK")
</pallas_src>

<mosaic_0001>
module attributes {stable_mosaic.version = 11 : i64} {
  func.func @_tile_rowmax_kernel(%arg0: i32, %arg1: memref<64x128xf32, #tpu.memory_space<vmem>>, %arg2: memref<16x128xf32, #tpu.memory_space<vmem>>, %arg3: memref<16x128xi32, #tpu.memory_space<vmem>>) attributes {dimension_semantics = [#tpu.dimension_semantics<parallel>], iteration_bounds = array<i64: 2>, scalar_prefetch = 0 : i64, scratch_operands = 0 : i64, tpu.core_type = #tpu.core_type<tc>, window_params = [{transform_indices = @transform_0, window_bounds = array<i64: 64, 128>}, {transform_indices = @transform_1, window_bounds = array<i64: 16, 128>}, {transform_indices = @transform_2, window_bounds = array<i64: 16, 128>}]} {
    %0 = tpu.iota {dimensions = array<i32: 1>} : vector<16x128xi32>
    %c3_i32 = arith.constant 3 : i32
    %1 = vector.broadcast %c3_i32 : i32 to vector<16x128xi32>
    %2 = arith.cmpi sge, %0, %1 : vector<16x128xi32>
    %c125_i32 = arith.constant 125 : i32
    %3 = vector.broadcast %c125_i32 : i32 to vector<16x128xi32>
    %4 = arith.cmpi slt, %0, %3 : vector<16x128xi32>
    %5 = arith.andi %2, %4 : vector<16x128xi1>
    %c0_i32 = arith.constant 0 : i32
    %6 = arith.cmpi sgt, %arg0, %c0_i32 : i32
    %c1_i32 = arith.constant 1 : i32
    %7 = arith.cmpi slt, %arg0, %c1_i32 : i32
    %8 = arith.andi %6, %7 : i1
    %9 = arith.extui %8 : i1 to i32
    %c0_i32_0 = arith.constant 0 : i32
    %10 = arith.cmpi ne, %9, %c0_i32_0 : i32
    scf.if %10 {
      %c0_i32_2 = arith.constant 0 : i32
      %14 = vector.broadcast %c0_i32_2 : i32 to vector<16x128xi32>
      %c0 = arith.constant 0 : index
      %c0_3 = arith.constant 0 : index
      %15 = tpu.strided_load %arg1[%c0, %c0_3] {strides = array<i32: 4, 1>} : memref<64x128xf32, #tpu.memory_space<vmem>>, vector<16x128xf32>
      %cst = arith.constant 0.000000e+00 : f32
      %16 = vector.broadcast %cst : f32 to vector<16x128xf32>
      %17 = arith.select %5, %15, %16 : vector<16x128xi1>, vector<16x128xf32>
      %c1 = arith.constant 1 : index
      %c0_4 = arith.constant 0 : index
      %18 = tpu.strided_load %arg1[%c1, %c0_4] {strides = array<i32: 4, 1>} : memref<64x128xf32, #tpu.memory_space<vmem>>, vector<16x128xf32>
      %cst_5 = arith.constant 0.000000e+00 : f32
      %19 = vector.broadcast %cst_5 : f32 to vector<16x128xf32>
      %20 = arith.select %5, %18, %19 : vector<16x128xi1>, vector<16x128xf32>
      %21 = arith.cmpf ogt, %20, %17 : vector<16x128xf32>
      %22 = arith.select %21, %20, %17 : vector<16x128xi1>, vector<16x128xf32>
      %c1_i32_6 = arith.constant 1 : i32
      %23 = vector.broadcast %c1_i32_6 : i32 to vector<16x128xi32>
      %24 = arith.select %21, %23, %14 : vector<16x128xi1>, vector<16x128xi32>
      %c2 = arith.constant 2 : index
      %c0_7 = arith.constant 0 : index
      %25 = tpu.strided_load %arg1[%c2, %c0_7] {strides = array<i32: 4, 1>} : memref<64x128xf32, #tpu.memory_space<vmem>>, vector<16x128xf32>
      %cst_8 = arith.constant 0.000000e+00 : f32
      %26 = vector.broadcast %cst_8 : f32 to vector<16x128xf32>
      %27 = arith.select %5, %25, %26 : vector<16x128xi1>, vector<16x128xf32>
      %28 = arith.cmpf ogt, %27, %22 : vector<16x128xf32>
      %29 = arith.select %28, %27, %22 : vector<16x128xi1>, vector<16x128xf32>
      %c2_i32 = arith.constant 2 : i32
      %30 = vector.broadcast %c2_i32 : i32 to vector<16x128xi32>
      %31 = arith.select %28, %30, %24 : vector<16x128xi1>, vector<16x128xi32>
      %c3 = arith.constant 3 : index
      %c0_9 = arith.constant 0 : index
      %32 = tpu.strided_load %arg1[%c3, %c0_9] {strides = array<i32: 4, 1>} : memref<64x128xf32, #tpu.memory_space<vmem>>, vector<16x128xf32>
      %cst_10 = arith.constant 0.000000e+00 : f32
      %33 = vector.broadcast %cst_10 : f32 to vector<16x128xf32>
      %34 = arith.select %5, %32, %33 : vector<16x128xi1>, vector<16x128xf32>
      %35 = arith.cmpf ogt, %34, %29 : vector<16x128xf32>
      %36 = arith.select %35, %34, %29 : vector<16x128xi1>, vector<16x128xf32>
      %c3_i32_11 = arith.constant 3 : i32
      %37 = vector.broadcast %c3_i32_11 : i32 to vector<16x128xi32>
      %38 = arith.select %35, %37, %31 : vector<16x128xi1>, vector<16x128xi32>
      %c0_12 = arith.constant 0 : index
      %c0_13 = arith.constant 0 : index
      %39 = vector.load %arg2[%c0_12, %c0_13] : memref<16x128xf32, #tpu.memory_space<vmem>>, vector<16x128xf32>
      tpu.vector_store %arg2[%c0_12, %c0_13], %36 {strides = array<i32>} : memref<16x128xf32, #tpu.memory_space<vmem>>, vector<16x128xf32>,
      %c0_14 = arith.constant 0 : index
      %c0_15 = arith.constant 0 : index
      %40 = vector.load %arg3[%c0_14, %c0_15] : memref<16x128xi32, #tpu.memory_space<vmem>>, vector<16x128xi32>
      tpu.vector_store %arg3[%c0_14, %c0_15], %38 {strides = array<i32>} : memref<16x128xi32, #tpu.memory_space<vmem>>, vector<16x128xi32>,
    } else {
    }
    %true = arith.constant true
    %11 = arith.xori %8, %true : i1
    %12 = arith.extui %11 : i1 to i32
    %c0_i32_1 = arith.constant 0 : i32
    %13 = arith.cmpi ne, %12, %c0_i32_1 : i32
    scf.if %13 {
      %c64_i32 = arith.constant 64 : i32
      %14 = arith.muli %arg0, %c64_i32 : i32
      %15 = tpu.iota {dimensions = array<i32: 0>} : vector<16x128xi32>
      %c4_i32 = arith.constant 4 : i32
      %16 = vector.broadcast %c4_i32 : i32 to vector<16x128xi32>
      %17 = arith.muli %15, %16 : vector<16x128xi32>
      %c0_i32_2 = arith.constant 0 : i32
      %18 = vector.broadcast %c0_i32_2 : i32 to vector<16x128xi32>
      %c0 = arith.constant 0 : index
      %c0_3 = arith.constant 0 : index
      %19 = tpu.strided_load %arg1[%c0, %c0_3] {strides = array<i32: 4, 1>} : memref<64x128xf32, #tpu.memory_space<vmem>>, vector<16x128xf32>
      %20 = vector.broadcast %14 : i32 to vector<16x128xi32>
      %21 = arith.addi %20, %17 : vector<16x128xi32>
      %c0_i32_4 = arith.constant 0 : i32
      %22 = vector.broadcast %c0_i32_4 : i32 to vector<16x128xi32>
      %23 = arith.addi %21, %22 : vector<16x128xi32>
      %c3_i32_5 = arith.constant 3 : i32
      %24 = vector.broadcast %c3_i32_5 : i32 to vector<16x128xi32>
      %25 = arith.cmpi sge, %23, %24 : vector<16x128xi32>
      %26 = arith.andi %5, %25 : vector<16x128xi1>
      %c125_i32_6 = arith.constant 125 : i32
      %27 = vector.broadcast %c125_i32_6 : i32 to vector<16x128xi32>
      %28 = arith.cmpi slt, %23, %27 : vector<16x128xi32>
      %29 = arith.andi %26, %28 : vector<16x128xi1>
      %cst = arith.constant 0.000000e+00 : f32
      %30 = vector.broadcast %cst : f32 to vector<16x128xf32>
      %31 = arith.select %29, %19, %30 : vector<16x128xi1>, vector<16x128xf32>
      %c1 = arith.constant 1 : index
      %c0_7 = arith.constant 0 : index
      %32 = tpu.strided_load %arg1[%c1, %c0_7] {strides = array<i32: 4, 1>} : memref<64x128xf32, #tpu.memory_space<vmem>>, vector<16x128xf32>
      %33 = vector.broadcast %14 : i32 to vector<16x128xi32>
      %34 = arith.addi %33, %17 : vector<16x128xi32>
      %c1_i32_8 = arith.constant 1 : i32
      %35 = vector.broadcast %c1_i32_8 : i32 to vector<16x128xi32>
      %36 = arith.addi %34, %35 : vector<16x128xi32>
      %c3_i32_9 = arith.constant 3 : i32
      %37 = vector.broadcast %c3_i32_9 : i32 to vector<16x128xi32>
      %38 = arith.cmpi sge, %36, %37 : vector<16x128xi32>
      %39 = arith.andi %5, %38 : vector<16x128xi1>
      %c125_i32_10 = arith.constant 125 : i32
      %40 = vector.broadcast %c125_i32_10 : i32 to vector<16x128xi32>
      %41 = arith.cmpi slt, %36, %40 : vector<16x128xi32>
      %42 = arith.andi %39, %41 : vector<16x128xi1>
      %cst_11 = arith.constant 0.000000e+00 : f32
      %43 = vector.broadcast %cst_11 : f32 to vector<16x128xf32>
      %44 = arith.select %42, %32, %43 : vector<16x128xi1>, vector<16x128xf32>
      %45 = arith.cmpf ogt, %44, %31 : vector<16x128xf32>
      %46 = arith.select %45, %44, %31 : vector<16x128xi1>, vector<16x128xf32>
      %c1_i32_12 = arith.constant 1 : i32
      %47 = vector.broadcast %c1_i32_12 : i32 to vector<16x128xi32>
      %48 = arith.select %45, %47, %18 : vector<16x128xi1>, vector<16x128xi32>
      %c2 = arith.constant 2 : index
      %c0_13 = arith.constant 0 : index
      %49 = tpu.strided_load %arg1[%c2, %c0_13] {strides = array<i32: 4, 1>} : memref<64x128xf32, #tpu.memory_space<vmem>>, vector<16x128xf32>
      %50 = vector.broadcast %14 : i32 to vector<16x128xi32>
      %51 = arith.addi %50, %17 : vector<16x128xi32>
      %c2_i32 = arith.constant 2 : i32
      %52 = vector.broadcast %c2_i32 : i32 to vector<16x128xi32>
      %53 = arith.addi %51, %52 : vector<16x128xi32>
      %c3_i32_14 = arith.constant 3 : i32
      %54 = vector.broadcast %c3_i32_14 : i32 to vector<16x128xi32>
      %55 = arith.cmpi sge, %53, %54 : vector<16x128xi32>
      %56 = arith.andi %5, %55 : vector<16x128xi1>
      %c125_i32_15 = arith.constant 125 : i32
      %57 = vector.broadcast %c125_i32_15 : i32 to vector<16x128xi32>
      %58 = arith.cmpi slt, %53, %57 : vector<16x128xi32>
      %59 = arith.andi %56, %58 : vector<16x128xi1>
      %cst_16 = arith.constant 0.000000e+00 : f32
      %60 = vector.broadcast %cst_16 : f32 to vector<16x128xf32>
      %61 = arith.select %59, %49, %60 : vector<16x128xi1>, vector<16x128xf32>
      %62 = arith.cmpf ogt, %61, %46 : vector<16x128xf32>
      %63 = arith.select %62, %61, %46 : vector<16x128xi1>, vector<16x128xf32>
      %c2_i32_17 = arith.constant 2 : i32
      %64 = vector.broadcast %c2_i32_17 : i32 to vector<16x128xi32>
      %65 = arith.select %62, %64, %48 : vector<16x128xi1>, vector<16x128xi32>
      %c3 = arith.constant 3 : index
      %c0_18 = arith.constant 0 : index
      %66 = tpu.strided_load %arg1[%c3, %c0_18] {strides = array<i32: 4, 1>} : memref<64x128xf32, #tpu.memory_space<vmem>>, vector<16x128xf32>
      %67 = vector.broadcast %14 : i32 to vector<16x128xi32>
      %68 = arith.addi %67, %17 : vector<16x128xi32>
      %c3_i32_19 = arith.constant 3 : i32
      %69 = vector.broadcast %c3_i32_19 : i32 to vector<16x128xi32>
      %70 = arith.addi %68, %69 : vector<16x128xi32>
      %c3_i32_20 = arith.constant 3 : i32
      %71 = vector.broadcast %c3_i32_20 : i32 to vector<16x128xi32>
      %72 = arith.cmpi sge, %70, %71 : vector<16x128xi32>
      %73 = arith.andi %5, %72 : vector<16x128xi1>
      %c125_i32_21 = arith.constant 125 : i32
      %74 = vector.broadcast %c125_i32_21 : i32 to vector<16x128xi32>
      %75 = arith.cmpi slt, %70, %74 : vector<16x128xi32>
      %76 = arith.andi %73, %75 : vector<16x128xi1>
      %cst_22 = arith.constant 0.000000e+00 : f32
      %77 = vector.broadcast %cst_22 : f32 to vector<16x128xf32>
      %78 = arith.select %76, %66, %77 : vector<16x128xi1>, vector<16x128xf32>
      %79 = arith.cmpf ogt, %78, %63 : vector<16x128xf32>
      %80 = arith.select %79, %78, %63 : vector<16x128xi1>, vector<16x128xf32>
      %c3_i32_23 = arith.constant 3 : i32
      %81 = vector.broadcast %c3_i32_23 : i32 to vector<16x128xi32>
      %82 = arith.select %79, %81, %65 : vector<16x128xi1>, vector<16x128xi32>
      %c0_24 = arith.constant 0 : index
      %c0_25 = arith.constant 0 : index
      %83 = vector.load %arg2[%c0_24, %c0_25] : memref<16x128xf32, #tpu.memory_space<vmem>>, vector<16x128xf32>
      tpu.vector_store %arg2[%c0_24, %c0_25], %80 {strides = array<i32>} : memref<16x128xf32, #tpu.memory_space<vmem>>, vector<16x128xf32>,
      %c0_26 = arith.constant 0 : index
      %c0_27 = arith.constant 0 : index
      %84 = vector.load %arg3[%c0_26, %c0_27] : memref<16x128xi32, #tpu.memory_space<vmem>>, vector<16x128xi32>
      tpu.vector_store %arg3[%c0_26, %c0_27], %82 {strides = array<i32>} : memref<16x128xi32, #tpu.memory_space<vmem>>, vector<16x128xi32>,
    } else {
    }
    return
  }
  func.func @transform_0(%arg0: i32) -> (i32, i32) {
    %c0_i32 = arith.constant 0 : i32
    %c0_i32_0 = arith.constant 0 : i32
    return %arg0, %c0_i32 : i32, i32
  }
  func.func @transform_1(%arg0: i32) -> (i32, i32) {
    %c0_i32 = arith.constant 0 : i32
    %c0_i32_0 = arith.constant 0 : i32
    return %arg0, %c0_i32 : i32, i32
  }
  func.func @transform_2(%arg0: i32) -> (i32, i32) {
    %c0_i32 = arith.constant 0 : i32
    %c0_i32_0 = arith.constant 0 : i32
    return %arg0, %c0_i32 : i32, i32
  }
}

module attributes {stable_mosaic.version = 11 : i64} {
  func.func @_desc_gather_kernel(%arg0: i32, %arg1: i32, %arg2: memref<1x256xi32, #tpu.memory_space<vmem>>, %arg3: memref<32x2048xf32, #tpu.memory_space<vmem>>, %arg4: memref<32x256xf32, #tpu.memory_space<vmem>>) attributes {dimension_semantics = [#tpu.dimension_semantics<parallel>, #tpu.dimension_semantics<arbitrary>], iteration_bounds = array<i64: 1, 8>, scalar_prefetch = 0 : i64, scratch_operands = 0 : i64, tpu.core_type = #tpu.core_type<tc>, window_params = [{transform_indices = @transform_0, window_bounds = array<i64: 1, 256>}, {transform_indices = @transform_1, window_bounds = array<i64: 32, 2048>}, {transform_indices = @transform_2, window_bounds = array<i64: 32, 256>}]} {
    %c0_i32 = arith.constant 0 : i32
    %0 = arith.cmpi eq, %arg1, %c0_i32 : i32
    %1 = arith.extui %0 : i1 to i32
    %c0_i32_0 = arith.constant 0 : i32
    %2 = arith.cmpi ne, %1, %c0_i32_0 : i32
    scf.if %2 {
      %cst_9 = arith.constant 0.000000e+00 : f32
      %20 = vector.broadcast %cst_9 : f32 to vector<32x256xf32>
      %c0_10 = arith.constant 0 : index
      %c0_11 = arith.constant 0 : index
      %21 = vector.load %arg4[%c0_10, %c0_11] : memref<32x256xf32, #tpu.memory_space<vmem>>, vector<32x256xf32>
      tpu.vector_store %arg4[%c0_10, %c0_11], %20 {strides = array<i32>} : memref<32x256xf32, #tpu.memory_space<vmem>>, vector<32x256xf32>,
    } else {
    }
    %c2048_i32 = arith.constant 2048 : i32
    %3 = arith.muli %arg1, %c2048_i32 : i32
    %4 = tpu.iota {dimensions = array<i32: 0>} : vector<2048x256xi32>
    %5 = vector.broadcast %3 : i32 to vector<2048x256xi32>
    %6 = arith.addi %5, %4 : vector<2048x256xi32>
    %c0 = arith.constant 0 : index
    %c0_1 = arith.constant 0 : index
    %7 = vector.load %arg2[%c0, %c0_1] : memref<1x256xi32, #tpu.memory_space<vmem>>, vector<1x256xi32>
    %8 = vector.broadcast %7 : vector<1x256xi32> to vector<2048x256xi32>
    %9 = arith.cmpi eq, %6, %8 : vector<2048x256xi32>
    %10 = arith.extui %9 : vector<2048x256xi1> to vector<2048x256xi32>
    %11 = arith.sitofp %10 : vector<2048x256xi32> to vector<2048x256xf32>
    %c0_2 = arith.constant 0 : index
    %c0_3 = arith.constant 0 : index
    %12 = vector.load %arg4[%c0_2, %c0_3] : memref<32x256xf32, #tpu.memory_space<vmem>>, vector<32x256xf32>
    %c0_4 = arith.constant 0 : index
    %c0_5 = arith.constant 0 : index
    %13 = vector.load %arg3[%c0_4, %c0_5] : memref<32x2048xf32, #tpu.memory_space<vmem>>, vector<32x2048xf32>
    %cst = arith.constant dense<0.000000e+00> : vector<32x256xf32>
    %14 = tpu.matmul %13, %11, %cst {dimension_numbers = #tpu.dot_dimension_numbers<[1], [0], [0], [1], [0, 0, 1, 1], [], []>} : vector<32x2048xf32>, vector<2048x256xf32>, vector<32x256xf32> -> vector<32x256xf32>
    %15 = arith.addf %12, %14 : vector<32x256xf32>
    %c0_6 = arith.constant 0 : index
    %c0_7 = arith.constant 0 : index
    %16 = vector.load %arg4[%c0_6, %c0_7] : memref<32x256xf32, #tpu.memory_space<vmem>>, vector<32x256xf32>
    tpu.vector_store %arg4[%c0_6, %c0_7], %15 {strides = array<i32>} : memref<32x256xf32, #tpu.memory_space<vmem>>, vector<32x256xf32>,
    %c7_i32 = arith.constant 7 : i32
    %17 = arith.cmpi eq, %arg1, %c7_i32 : i32
    %18 = arith.extui %17 : i1 to i32
    %c0_i32_8 = arith.constant 0 : i32
    %19 = arith.cmpi ne, %18, %c0_i32_8 : i32
    scf.if %19 {
      %c0_9 = arith.constant 0 : index
      %c0_10 = arith.constant 0 : index
      %20 = vector.load %arg4[%c0_9, %c0_10] : memref<32x256xf32, #tpu.memory_space<vmem>>, vector<32x256xf32>
      %21 = arith.mulf %20, %20 : vector<32x256xf32>
      %cst_11 = arith.constant dense<0.000000e+00> : vector<256xf32>
      %22 = vector.multi_reduction <add>, %21, %cst_11 [0] : vector<32x256xf32> to vector<256xf32>
      %23 = vector.shape_cast %22 : vector<256xf32> to vector<1x256xf32>
      %cst_12 = arith.constant 9.99999996E-13 : f32
      %24 = vector.broadcast %cst_12 : f32 to vector<1x256xf32>
      %25 = arith.addf %23, %24 : vector<1x256xf32>
      %26 = math.rsqrt %25 : vector<1x256xf32>
      %27 = vector.broadcast %26 : vector<1x256xf32> to vector<32x256xf32>
      %28 = arith.mulf %20, %27 : vector<32x256xf32>
      %c0_13 = arith.constant 0 : index
      %c0_14 = arith.constant 0 : index
      %29 = vector.load %arg4[%c0_13, %c0_14] : memref<32x256xf32, #tpu.memory_space<vmem>>, vector<32x256xf32>
      tpu.vector_store %arg4[%c0_13, %c0_14], %28 {strides = array<i32>} : memref<32x256xf32, #tpu.memory_space<vmem>>, vector<32x256xf32>,
    } else {
    }
    return
  }
  func.func @transform_0(%arg0: i32, %arg1: i32) -> (i32, i32) {
    %c0_i32 = arith.constant 0 : i32
    %c0_i32_0 = arith.constant 0 : i32
    return %c0_i32, %arg0 : i32, i32
  }
  func.func @transform_1(%arg0: i32, %arg1: i32) -> (i32, i32) {
    %c0_i32 = arith.constant 0 : i32
    %c0_i32_0 = arith.constant 0 : i32
    return %c0_i32, %arg1 : i32, i32
  }
  func.func @transform_2(%arg0: i32, %arg1: i32) -> (i32, i32) {
    %c0_i32 = arith.constant 0 : i32
    %c0_i32_0 = arith.constant 0 : i32
    return %c0_i32, %arg0 : i32, i32
  }
}

</mosaic_0001>

<bundles_post_ra>
// kernel: _forward_impl.2
= control target key start
LH: loop header
LB: loop body
LE: loop exit
PB: predicated region body
PF: predicated region fallthrough
CT: control target
= control target key end

     0   :  { %8 = vsyncpa [#allocation3], 0  ;;  %s1001_s0 = inlined_call_operand.hbm [shape: f32[128,128], index: 0, kind: input, shape index: {}]   ;;  %s1002_s1 = inlined_call_operand.hbm [shape: f32[32,128], index: 1, kind: output, shape index: {0}]   ;;  %s1003_s2 = inlined_call_operand.hbm [shape: s32[32,128], index: 2, kind: output, shape index: {1}]  }
   0x1   :  { %10 = vsyncpa [#allocation3 + $0x1], 0 }
   0x2   :  { %11 = vsyncpa [#allocation4], 0 }
   0x3   :  { %13 = vsyncpa [#allocation4 + $0x1], 0 }
   0x4   :  { %14 = vsyncpa [#allocation7], 0 }
   0x5   :  { %16 = vsyncpa [#allocation7 + $0x1], 0  ;;  %s714_s9 = smov 0   ;;  %s716_s10 = smov 0  }
   0x6   :  { %s718_s11 = smov 0   ;;  %s720_s12 = smov 0  }
   0x7 LB: > { %s735_s13 = sadd.s32 4294967295, %s688_s12   ;;  %s467_s14 = sadd.s32 4294967294, %s688_s12   ;;  %s688_s12 = sphi %s720_s12, %s1019_s12   ;;  %s684_s11 = sphi %s718_s11, %s1018_s11   ;;  %s680_s10 = sphi %s716_s10, %s1017_s10   ;;  %s676_s9 = sphi %s714_s9, %s1016_s9  }
   0x8   : > { %s739_s15 = sadd.s32 1, %s688_s12   ;;  %s29_s16 = sadd.s32 1, %s684_s11 }
   0x9   : > { %s26_s17 = ssub.s32 %s688_s12, %s739_s15  ;;  %p36_p0 = scmp.ne.s32.totalorder %s684_s11, %s680_s10 }
   0xa   : > { %p27_p1 = scmp.eq.s32.totalorder %s26_s17, 0  ;;  %p37_p2 = scmp.eq.s32.totalorder %s688_s12, 0 }
   0xb   : > { %p42_p3 = scmp.ne.s32.totalorder %s680_s10, %s676_s9  ;;  %p43_p4 = scmp.eq.s32.totalorder %s735_s13, 0 }
   0xc   : > { %s751_s18 = scalar_select %p27_p1, %s684_s11, %s29_s16  }
   0xd   : > { %p753_p5 = por %p37_p2, %p36_p0  ;;  %p757_p6 = por %p43_p4, %p42_p3 }
   0xe   : > { %p66_p7 = scmp.eq.s32.totalorder %s735_s13, 1  ;;  %p72_p8 = scmp.eq.s32.totalorder %s467_s14, 1 }
   0xf   : > { %p520_p10 = scmp.lt.s32.totalorder %s688_s12, 2  ;;  %s118_s23 = sand.u32 1, %s684_s11  }
  0x10   : > { %p764_p11 = por %p66_p7, %p36_p0  ;;  %p768_p12 = por %p72_p8, %p42_p3 }
  0x11   : > { %s500_s24 = sshll.u32 %s688_s12, 10  ;;  %s470_s25 = sshll.u32 %s118_s23, 6 }
  0x12   : > { %s1007_s21 = scalar_select %p764_p11, 1, 0 }
  0x13   : > { %s1008_s22 = scalar_select %p768_p12, 1, 0 }
  0x14   : > { %s777_s28 = scalar_lea.hbm %s1001_s0, %s500_s24  ;;  %s122_s29 = scalar_lea.vmem [#allocation2], %s470_s25 }
  0x15   : > { %s129_s30 = sshll.u32 %s122_s29, 4  ;;  %p781_p13 = pnand %p520_p10, %p753_p5  ;;  %s785_s30 = int_to_ptr.vmem [resolvable:$true] %s129_s30 }
  0x16   : > { %s787_s4 = scalar_lea.sflag [#allocation3], %s118_s23  ;;  %s560_s5 = scalar_lea.hbm %s777_s28, 1024 }
  0x17   : > { %p561_p0 = scmp.ne.s32.totalorder %s777_s28, %s560_s5  ;;  %p562_p1 = pneg %p781_p13 }
  0x18   : > { %s565_s8 = scalar_lea.hbm %s1001_s0, 2048  ;;  %p566_p4 = scmp.lt.u32.totalorder %s777_s28, %s1001_s0 }
  0x19   : > { %p563_p2 = pnand %p562_p1, %p561_p0  ;;  %p567_p5 = scmp.lt.u32.totalorder %s565_s8, %s560_s5 }
  0x1a   : > { %p569_p8 = scmp.lt.u32.totalorder %s560_s5, %s777_s28 }
  0x1b   : > { %p564_p3 = pneg %p563_p2  ;;  %p568_p7 = por %p567_p5, %p566_p4 }
  0x1d   : > { %p570_p10 = por %p569_p8, %p568_p7 }
  0x1f   : > { %p571_p9 = pnand %p570_p10, %p564_p3 }
  0x21   : > { %574 = shalt.err (!%p571_p9)
}
  0x22   : > { %s575_s17 = scalar_lea.vmem %s785_s30, 1024  ;;  %s690_s19 = smov [#allocation2]  }
  0x23   : > { %p576_p0 = scmp.ne.s32.totalorder %s785_s30, %s575_s17  ;;  %s580_s23 = sshll.u32 %s690_s19, 4  ;;  %s581_s23 = int_to_ptr.vmem [resolvable:$false] %s580_s23 }
  0x24   : > { %s582_s24 = scalar_lea.vmem %s581_s23, 2048  ;;  %p583_p11 = scmp.lt.s32.totalorder %s785_s30, %s581_s23 }
  0x25   : > { %p578_p2 = pnand %p576_p0, %p562_p1  ;;  %p584_p4 = scmp.lt.s32.totalorder %s582_s24, %s575_s17 }
  0x27   : > { %p579_p12 = pneg %p578_p2  ;;  %p585_p5 = por %p584_p4, %p583_p11 }
  0x29   : > { %p586_p7 = pnand %p585_p5, %p579_p12 }
  0x2b   : > { %589 = shalt.err (!%p586_p7)
}
  0x2c   : > { %s691_s25 = smov 128   ;;  %s692_s26 = smov 8  }
  0x2d   : > { %512 = dma.hbm_to_vmem [thread:$0]  (!%p781_p13), %s777_s28, 1024, %s785_s30, %s787_s4, %s691_s25, %s691_s25, %s692_s26  }
  0x2e   : > { %p473_p9 = scmp.ge.s32.totalorder %s688_s12, 1  ;;  %p137_p1 = scmp.lt.s32.totalorder %s688_s12, 3 }
  0x30   : > { %p138_p3 = pnand %p473_p9, %p137_p1 }
  0x31   : > { %s818_s27 = sand.u32 (!%p138_p3), 1, %s680_s10  }
  0x32   : > { %141 = sbr.rel (%p138_p3) target bundleno = 151 (0x97), region = 24  ;;  %s474_s29 = sshll.u32 (!%p138_p3), %s818_s27, 6 }
  0x33   : > { %s144_s5 = scalar_lea.sflag (!%p138_p3), [#allocation3], %s818_s27  ;;  %s822_s6 = scalar_lea.vmem (!%p138_p3), [#allocation2], %s474_s29 }
  0x39   : > { %663 = dma.done.wait (%p757_p6), %s144_s5, 1024  }
  0x3a   : > { %665 = vsyncadd (%p757_p6), %s144_s5, 4294966272  ;;  %s475_s28 = sshll.u32 %s818_s27, 4  ;;  %v176_v0 = vlaneseq  ;;  %p181_p11 = scmp.gt.s32.totalorder %s735_s13, 0 }
  0x3b   : > { %p182_p12 = scmp.lt.s32.totalorder %s735_s13, 1  ;;  %s839_s20 = scalar_lea.vmem [#allocation5], %s475_s28 }
  0x3c   : > { %v177_v1 = vand.u32 127, %v176_v0  ;;  %s841_s3 = scalar_lea.vmem [#allocation6], %s475_s28 }
  0x3d   : > { %p831_p13 = pnand %p182_p12, %p181_p11 }
  0x3e   : > { %vm178_vm0 = vcmp.ge.s32.totalorder %v177_v1, 3  ;;  %vm179_vm1 = vcmp.lt.s32.totalorder %v177_v1, 125  ;;  %v187_v3 = vld [vmem:[%s822_s6] ss:$4 sm:$0xff] (!%p831_p13)  ;;  %v478_v4 = vld [vmem:[%s822_s6 + $0x1] ss:$4 sm:$0xff] (!%p831_p13) }
  0x3f   : > { %vm835_vm2 = vmand %vm178_vm0, %vm179_vm1  ;;  %186 = sbr.rel (%p831_p13) target bundleno = 74 (0x4a), region = 32  ;;  %v480_v5 = vld [vmem:[%s822_s6 + $0x2] ss:$4 sm:$0xff] (!%p831_p13)  ;;  %v482_v9 = vld [vmem:[%s822_s6 + $0x3] ss:$4 sm:$0xff] (!%p831_p13)  ;;  %v693_v22 = vmov (!%p831_p13), 0  }
  0x40   : > { %v190_v6 = vsel (!%p831_p13), %vm835_vm2, %v187_v3, 0.0  ;;  %v196_v7 = vsel (!%p831_p13), %vm835_vm2, %v478_v4, 0.0  ;;  %v208_v8 = vsel (!%p831_p13), %vm835_vm2, %v480_v5, 0.0  ;;  %v220_v10 = vsel (!%p831_p13), %vm835_vm2, %v482_v9, 0.0  ;;  %v477_v11 = vld [vmem:[%s822_s6 + $0x20] ss:$4 sm:$0xff] (!%p831_p13) }
  0x41   : > { %vm198_vm3 = vcmp.gt.f32.partialorder (!%p831_p13), %v196_v7, %v190_v6  ;;  %v479_v12 = vld [vmem:[%s822_s6 + $0x21] ss:$4 sm:$0xff] (!%p831_p13)  ;;  %v191_v14 = vsel (!%p831_p13), %vm835_vm2, %v477_v11, 0.0  ;;  %v481_v16 = vld [vmem:[%s822_s6 + $0x22] ss:$4 sm:$0xff] (!%p831_p13) }
  0x42   : > { %v200_v13 = vsel (!%p831_p13), %vm198_vm3, %v196_v7, %v190_v6  ;;  %v197_v15 = vsel (!%p831_p13), %vm835_vm2, %v479_v12, 0.0  ;;  %v483_v17 = vld [vmem:[%s822_s6 + $0x23] ss:$4 sm:$0xff] (!%p831_p13)  ;;  %v209_v18 = vsel (!%p831_p13), %vm835_vm2, %v481_v16, 0.0  ;;  %v202_v23 = vsel (!%p831_p13), %vm198_vm3, 1, %v693_v22 }
  0x43   : > { %vm210_vm4 = vcmp.gt.f32.partialorder (!%p831_p13), %v208_v8, %v200_v13  ;;  %vm199_vm5 = vcmp.gt.f32.partialorder (!%p831_p13), %v197_v15, %v191_v14  ;;  %v221_v19 = vsel (!%p831_p13), %vm835_vm2, %v483_v17, 0.0 }
  0x44   : > { %v212_v20 = vsel (!%p831_p13), %vm210_vm4, %v208_v8, %v200_v13  ;;  %v201_v21 = vsel (!%p831_p13), %vm199_vm5, %v197_v15, %v191_v14  ;;  %v203_v24 = vsel (!%p831_p13), %vm199_vm5, 1, %v693_v22  ;;  %v214_v25 = vsel (!%p831_p13), %vm210_vm4, 2, %v202_v23 }
  0x45   : > { %vm222_vm6 = vcmp.gt.f32.partialorder (!%p831_p13), %v220_v10, %v212_v20  ;;  %vm211_vm7 = vcmp.gt.f32.partialorder (!%p831_p13), %v209_v18, %v201_v21 }
  0x46   : > { %v224_v26 = vsel %vm222_vm6, %v220_v10, %v212_v20  ;;  %v213_v27 = vsel %vm211_vm7, %v209_v18, %v201_v21  ;;  %v226_v28 = vsel %vm222_vm6, 3, %v214_v25  ;;  %v215_v29 = vsel %vm211_vm7, 2, %v203_v24 }
  0x47   : > { %228 = vst [vmem:[%s839_s20] sm:$0xff] %v224_v26  ;;  %vm223_vm8 = vcmp.gt.f32.partialorder %v221_v19, %v213_v27  ;;  %230 = vst [vmem:[%s841_s3] sm:$0xff] %v226_v28 }
  0x48   : > { %v225_v30 = vsel %vm223_vm8, %v221_v19, %v213_v27  ;;  %v227_v31 = vsel %vm223_vm8, 3, %v215_v29 }
  0x49   : > { %229 = vst [vmem:[%s839_s20 + $0x8] sm:$0xff] %v225_v30  ;;  %231 = vst [vmem:[%s841_s3 + $0x8] sm:$0xff] %v227_v31 }
  0x4a PF: > { %234 = sbr.rel (!%p831_p13) target bundleno = 101 (0x65), region = 36  ;;  %s484_s4 = sshll.u32 (%p831_p13), %s735_s13, 6  ;;  %v237_v32 = vshrl.u32 (%p831_p13), %v176_v0, 7  ;;  %v241_v38 = vld [vmem:[%s822_s6] ss:$4 sm:$0xff] (%p831_p13)  ;;  %v694_v54 = vmov (%p831_p13), 0  }
  0x4b   : > { %v244_v33 = vstv (%p831_p13), %s484_s4  ;;  %v486_v43 = vld [vmem:[%s822_s6 + $0x1] ss:$4 sm:$0xff] (%p831_p13)  ;;  %v488_v45 = vld [vmem:[%s822_s6 + $0x2] ss:$4 sm:$0xff] (%p831_p13)  ;;  %v490_v48 = vld [vmem:[%s822_s6 + $0x3] ss:$4 sm:$0xff] (%p831_p13) }
  0x4c   : > { %v239_v34 = vmul.u32 (%p831_p13), 4, %v237_v32  ;;  %v238_v35 = vadd.s32 (%p831_p13), 8, %v237_v32  ;;  %v485_v52 = vld [vmem:[%s822_s6 + $0x20] ss:$4 sm:$0xff] (%p831_p13)  ;;  %v487_v59 = vld [vmem:[%s822_s6 + $0x21] ss:$4 sm:$0xff] (%p831_p13) }
  0x4d   : > { %v489_v63 = vld [vmem:[%s822_s6 + $0x22] ss:$4 sm:$0xff] (%p831_p13)  ;;  %v491_v1 = vld [vmem:[%s822_s6 + $0x23] ss:$4 sm:$0xff] (%p831_p13) }
  0x4e   : > { %v245_v36 = vadd.s32 (%p831_p13), %v244_v33, %v239_v34  ;;  %v240_v37 = vmul.u32 (%p831_p13), 4, %v238_v35 }
  0x50   : > { %vm247_vm9 = vcmp.ge.s32.totalorder (%p831_p13), %v245_v36, 3  ;;  %vm251_vm10 = vcmp.lt.s32.totalorder (%p831_p13), %v245_v36, 125  ;;  %v261_v39 = vadd.s32 (%p831_p13), 1, %v245_v36  ;;  %v283_v40 = vadd.s32 (%p831_p13), 2, %v245_v36 }
  0x51   : > { %vm249_vm11 = vmand %vm835_vm2, %vm247_vm9  ;;  %v305_v41 = vadd.s32 3, %v245_v36  ;;  %v246_v42 = vadd.s32 %v244_v33, %v240_v37 }
  0x52   : > { %vm253_vm12 = vmand %vm249_vm11, %vm251_vm10  ;;  %vm263_vm13 = vcmp.ge.s32.totalorder %v261_v39, 3  ;;  %vm267_vm14 = vcmp.lt.s32.totalorder %v261_v39, 125  ;;  %vm285_vm15 = vcmp.ge.s32.totalorder %v283_v40, 3  ;;  %vm289_vm1 = vcmp.lt.s32.totalorder %v283_v40, 125 }
  0x53   : > { %v255_v44 = vsel %vm253_vm12, %v241_v38, 0.0  ;;  %vm265_vm0 = vmand %vm835_vm2, %vm263_vm13  ;;  %vm307_vm4 = vcmp.ge.s32.totalorder %v305_v41, 3  ;;  %v262_v46 = vadd.s32 1, %v246_v42  ;;  %vm311_vm6 = vcmp.lt.s32.totalorder %v305_v41, 125 }
  0x54   : > { %vm269_vm3 = vmand %vm265_vm0, %vm267_vm14  ;;  %vm248_vm9 = vcmp.ge.s32.totalorder %v246_v42, 3  ;;  %v284_v49 = vadd.s32 2, %v246_v42  ;;  %vm252_vm11 = vcmp.lt.s32.totalorder %v246_v42, 125  ;;  %v306_v53 = vadd.s32 3, %v246_v42 }
  0x55   : > { %v271_v47 = vsel %vm269_vm3, %v486_v43, 0.0  ;;  %vm287_vm5 = vmand %vm835_vm2, %vm285_vm15  ;;  %vm264_vm14 = vcmp.ge.s32.totalorder %v262_v46, 3  ;;  %vm268_vm0 = vcmp.lt.s32.totalorder %v262_v46, 125 }
  0x56   : > { %vm273_vm7 = vcmp.gt.f32.partialorder %v271_v47, %v255_v44  ;;  %vm291_vm8 = vmand %vm287_vm5, %vm289_vm1 }
  0x57   : > { %v275_v50 = vsel %vm273_vm7, %v271_v47, %v255_v44  ;;  %v293_v51 = vsel %vm291_vm8, %v488_v45, 0.0  ;;  %vm309_vm10 = vmand %vm835_vm2, %vm307_vm4  ;;  %v277_v55 = vsel %vm273_vm7, 1, %v694_v54  ;;  %vm286_vm4 = vcmp.ge.s32.totalorder %v284_v49, 3 }
  0x58   : > { %vm295_vm12 = vcmp.gt.f32.partialorder %v293_v51, %v275_v50  ;;  %vm313_vm13 = vmand %vm309_vm10, %vm311_vm6  ;;  %vm290_vm6 = vcmp.lt.s32.totalorder %v284_v49, 125  ;;  %vm308_vm8 = vcmp.ge.s32.totalorder %v306_v53, 3  ;;  %vm312_vm10 = vcmp.lt.s32.totalorder %v306_v53, 125 }
  0x59   : > { %v297_v56 = vsel %vm295_vm12, %v293_v51, %v275_v50  ;;  %v315_v57 = vsel %vm313_vm13, %v490_v48, 0.0  ;;  %vm250_vm15 = vmand %vm835_vm2, %vm248_vm9  ;;  %v299_v58 = vsel %vm295_vm12, 2, %v277_v55 }
  0x5a   : > { %vm317_vm1 = vcmp.gt.f32.partialorder %v315_v57, %v297_v56  ;;  %vm254_vm3 = vmand %vm250_vm15, %vm252_vm11 }
  0x5b   : > { %v319_v60 = vsel %vm317_vm1, %v315_v57, %v297_v56  ;;  %v256_v61 = vsel %vm254_vm3, %v485_v52, 0.0  ;;  %vm266_vm5 = vmand %vm835_vm2, %vm264_vm14  ;;  %v321_v62 = vsel %vm317_vm1, 3, %v299_v58 }
  0x5c   : > { %323 = vst [vmem:[%s839_s20] sm:$0xff] %v319_v60  ;;  %vm270_vm7 = vmand %vm266_vm5, %vm268_vm0 }
  0x5d   : > { %325 = vst [vmem:[%s841_s3] sm:$0xff] %v321_v62  ;;  %v272_v0 = vsel %vm270_vm7, %v487_v59, 0.0  ;;  %vm288_vm9 = vmand %vm835_vm2, %vm286_vm4 }
  0x5e   : > { %vm274_vm11 = vcmp.gt.f32.partialorder %v272_v0, %v256_v61  ;;  %vm292_vm12 = vmand %vm288_vm9, %vm290_vm6 }
  0x5f   : > { %v276_v3 = vsel %vm274_vm11, %v272_v0, %v256_v61  ;;  %v294_v4 = vsel %vm292_vm12, %v489_v63, 0.0  ;;  %vm310_vm13 = vmand %vm835_vm2, %vm308_vm8  ;;  %v278_v5 = vsel %vm274_vm11, 1, %v694_v54 }
  0x60   : > { %vm296_vm14 = vcmp.gt.f32.partialorder %v294_v4, %v276_v3  ;;  %vm314_vm15 = vmand %vm310_vm13, %vm312_vm10 }
  0x61   : > { %v298_v6 = vsel %vm296_vm14, %v294_v4, %v276_v3  ;;  %v316_v7 = vsel %vm314_vm15, %v491_v1, 0.0  ;;  %v300_v8 = vsel %vm296_vm14, 2, %v278_v5 }
  0x62   : > { %vm318_vm0 = vcmp.gt.f32.partialorder %v316_v7, %v298_v6 }
  0x63   : > { %v320_v9 = vsel %vm318_vm0, %v316_v7, %v298_v6  ;;  %v322_v10 = vsel %vm318_vm0, 3, %v300_v8 }
  0x64   : > { %324 = vst [vmem:[%s839_s20 + $0x8] sm:$0xff] %v320_v9  ;;  %326 = vst [vmem:[%s841_s3 + $0x8] sm:$0xff] %v322_v10 }
  0x65 PF: > { %s501_s7 = sshll.u32 %s735_s13, 8  ;;  %s346_s17 = sshll.u32 %s839_s20, 4  ;;  %s917_s17 = int_to_ptr.vmem [resolvable:$true] %s346_s17 }
  0x66   : > { %s914_s16 = scalar_lea.hbm %s1002_s1, %s501_s7  ;;  %s328_s19 = scalar_lea.sflag [#allocation4], %s818_s27 }
  0x67   : > { %s590_s23 = scalar_lea.vmem %s917_s17, 256  ;;  %p1013_p8 = scmp.ne.s32.totalorder %s1007_s21, 0 }
  0x68   : > { %p591_p6 = scmp.ne.s32.totalorder %s917_s17, %s590_s23  ;;  %s695_s24 = smov [#allocation5]  }
  0x69   : > { %s594_s25 = sshll.u32 %s695_s24, 4  ;;  %s595_s25 = int_to_ptr.vmem [resolvable:$false] %s594_s25 }
  0x6a   : > { %p592_p10 = pnand %p591_p6, %p1013_p8  ;;  %s596_s26 = scalar_lea.vmem %s595_s25, 512 }
  0x6b   : > { %p597_p2 = scmp.lt.s32.totalorder %s917_s17, %s595_s25  ;;  %p598_p4 = scmp.lt.s32.totalorder %s596_s26, %s590_s23 }
  0x6c   : > { %p593_p0 = pneg %p592_p10 }
  0x6d   : > { %p599_p5 = por %p598_p4, %p597_p2 }
  0x6f   : > { %p600_p7 = pnand %p599_p5, %p593_p0 }
  0x71   : > { %603 = shalt.err (!%p600_p7)
}
  0x72   : > { %s604_s29 = scalar_lea.hbm %s914_s16, 256  ;;  %s608_s28 = scalar_lea.hbm %s1002_s1, 512 }
  0x73   : > { %p605_p9 = scmp.ne.s32.totalorder %s914_s16, %s604_s29  ;;  %p609_p11 = scmp.lt.u32.totalorder %s914_s16, %s1002_s1 }
  0x74   : > { %p610_p12 = scmp.lt.u32.totalorder %s608_s28, %s604_s29  ;;  %p612_p6 = scmp.lt.u32.totalorder %s604_s29, %s914_s16 }
  0x75   : > { %p606_p1 = pnand %p605_p9, %p1013_p8 }
  0x76   : > { %p611_p13 = por %p610_p12, %p609_p11 }
  0x77   : > { %p607_p3 = pneg %p606_p1 }
  0x78   : > { %p613_p10 = por %p612_p6, %p611_p13 }
  0x7a   : > { %p614_p0 = pnand %p613_p10, %p607_p3 }
  0x7c   : > { %617 = shalt.err (!%p614_p0)
}
  0x7d   : > { %s696_s4 = smov 128   ;;  %s697_s8 = smov 8  }
  0x7e   : > { %505 = dma.vmem_to_hbm [thread:$0]  (%p1013_p8), %s917_s17, 256, %s914_s16, %s328_s19, %s696_s4, %s696_s4, %s697_s8  }
  0x7f   : > { %s951_s24 = scalar_lea.hbm %s1003_s2, %s501_s7  ;;  %s362_s25 = sshll.u32 %s841_s3, 4  ;;  %s954_s25 = int_to_ptr.vmem [resolvable:$true] %s362_s25 }
  0x80   : > { %s333_s26 = scalar_lea.sflag [#allocation7], %s818_s27  ;;  %s618_s29 = scalar_lea.vmem %s954_s25, 256 }
  0x81   : > { %p619_p2 = scmp.ne.s32.totalorder %s954_s25, %s618_s29  ;;  %s698_s5 = smov [#allocation6]  }
  0x82   : > { %s622_s16 = sshll.u32 %s698_s5, 4  ;;  %s623_s16 = int_to_ptr.vmem [resolvable:$false] %s622_s16 }
  0x83   : > { %p620_p4 = pnand %p619_p2, %p1013_p8  ;;  %s624_s13 = scalar_lea.vmem %s623_s16, 512 }
  0x84   : > { %p625_p7 = scmp.lt.s32.totalorder %s954_s25, %s623_s16  ;;  %p626_p9 = scmp.lt.s32.totalorder %s624_s13, %s618_s29 }
  0x85   : > { %p621_p5 = pneg %p620_p4 }
  0x86   : > { %p627_p1 = por %p626_p9, %p625_p7 }
  0x88   : > { %p628_p3 = pnand %p627_p1, %p621_p5 }
  0x8a   : > { %631 = shalt.err (!%p628_p3)
}
  0x8b   : > { %s632_s3 = scalar_lea.hbm %s951_s24, 256  ;;  %s636_s19 = scalar_lea.hbm %s1003_s2, 512 }
  0x8c   : > { %p633_p11 = scmp.ne.s32.totalorder %s951_s24, %s632_s3  ;;  %p637_p6 = scmp.lt.u32.totalorder %s951_s24, %s1003_s2 }
  0x8d   : > { %p638_p10 = scmp.lt.u32.totalorder %s636_s19, %s632_s3  ;;  %p640_p2 = scmp.lt.u32.totalorder %s632_s3, %s951_s24 }
  0x8e   : > { %p634_p12 = pnand %p633_p11, %p1013_p8 }
  0x8f   : > { %p639_p0 = por %p638_p10, %p637_p6 }
  0x90   : > { %p635_p13 = pneg %p634_p12 }
  0x91   : > { %p641_p4 = por %p640_p2, %p639_p0 }
  0x93   : > { %p642_p5 = pnand %p641_p4, %p635_p13 }
  0x95   : > { %645 = shalt.err (!%p642_p5)
}
  0x96   : > { %506 = dma.vmem_to_hbm [thread:$0]  (%p1013_p8), %s954_s25, 256, %s951_s24, %s333_s26, %s696_s4, %s696_s4, %s697_s8  }
  0x97 PF: > { %s377_s30 = sand.u32 1, %s676_s9   ;;  %p1014_p7 = scmp.ne.s32.totalorder %s1008_s22, 0 }
  0x98   : > { %p1015_p9 = scmp.ge.s32.totalorder %s688_s12, 2  ;;  %s378_s20 = scalar_lea.sflag [#allocation4], %s377_s30 }
  0x9a   : > { %p514_p1 = pnand %p1015_p9, %p1014_p7 }
  0x9c   : > { %667 = dma.done.wait (!%p514_p1), %s378_s20, 256  }
  0x9d   : > { %669 = vsyncadd (!%p514_p1), %s378_s20, 4294967040  ;;  %s387_s21 = scalar_lea.sflag [#allocation7], %s377_s30 }
  0x9e   : > { %671 = dma.done.wait (!%p514_p1), %s387_s21, 256  }
  0x9f   : > { %673 = vsyncadd (!%p514_p1), %s387_s21, 4294967040  ;;  %p19_p8 = scmp.ge.s32.totalorder %s739_s15, 4   ;;  %s1016_s9 = smov %s680_s10 }
  0xa0   : > { %s1017_s10 = smov %s684_s11  ;;  %s1018_s11 = smov %s751_s18 }
  0xa1   : > { %s1019_s12 = smov %s739_s15  ;;  %21 = sbr.rel (!%p19_p8) target bundleno = 7 (0x7), region = 108 }
  0xa8   :  { %392 = vsyncpa [#allocation3], 1 }
  0xa9   :  { %394 = vsyncpa [#allocation3 + $0x1], 1 }
  0xaa   :  { %395 = vsyncpa [#allocation4], 1 }
  0xab   :  { %397 = vsyncpa [#allocation4 + $0x1], 1 }
  0xac   :  { %398 = vsyncpa [#allocation7], 1 }
  0xad   :  { %400 = vsyncpa [#allocation7 + $0x1], 1 }

// kernel: _forward_impl.3
= control target key start
LH: loop header
LB: loop body
LE: loop exit
PB: predicated region body
PF: predicated region fallthrough
CT: control target
= control target key end

     0   :  { %7 = vsyncpa [#allocation3], 0  ;;  %s7155_s0 = inlined_call_operand.hbm [shape: s32[1,256], index: 0, kind: input, shape index: {}]   ;;  %s7156_s1 = inlined_call_operand.hbm [shape: f32[32,16384], index: 1, kind: input, shape index: {}]   ;;  %s7157_s2 = inlined_call_operand.hbm [shape: f32[32,256], index: 2, kind: output, shape index: {}]  }
   0x1   :  { %8 = vsyncpa [#allocation6], 0 }
   0x2   :  { %10 = vsyncpa [#allocation6 + $0x1], 0 }
   0x3   :  { %11 = vsyncpa [#allocation4], 0  ;;  %s5071_s9 = smov 0   ;;  %s5073_s10 = smov 0  }
   0x4   :  { %s5075_s11 = smov 0   ;;  %s5077_s12 = smov 0  }
   0x5   :  { %s5079_s13 = smov 0   ;;  %s5081_s14 = smov 0  }
   0x6 LB: > { %s3208_s15 = sadd.s32 4294967295, %s5044_s14   ;;  %s62_s16 = sadd.s32 1, %s5032_s11  ;;  %s5044_s14 = sphi %s5081_s14, %s17_s14   ;;  %s5040_s13 = sphi %s5079_s13, %s7177_s13   ;;  %s5036_s12 = sphi %s5077_s12, %s7176_s12   ;;  %s5032_s11 = sphi %s5075_s11, %s7175_s11   ;;  %s5028_s10 = sphi %s5073_s10, %s7174_s10   ;;  %s5024_s9 = sphi %s5071_s9, %s7173_s9  }
   0x7   : > { %p69_p0 = scmp.ne.s32.totalorder %s5032_s11, %s5028_s10  ;;  %p70_p1 = scmp.eq.s32.totalorder %s5044_s14, 0 }
   0x8   : > { %p75_p2 = scmp.ne.s32.totalorder %s5028_s10, %s5024_s9  ;;  %p5107_p3 = scmp.eq.s32.totalorder %s3208_s15, 0 }
   0x9   : > { %p71_p4 = por %p70_p1, %p69_p0  ;;  %p3209_p5 = scmp.ge.s32.totalorder %s5044_s14, 1 }
   0xa   : > { %s7163_s17 = scalar_select %p5107_p3, 1, 0 }
   0xb   : > { %p5114_p6 = por %p5107_p3, %p75_p2  ;;  %p112_p7 = scmp.lt.s32.totalorder %s5044_s14, 9 }
   0xc   : > { %s5046_s20 = smov [#allocation2]   ;;  %p4837_p10 = scmp.lt.s32.totalorder %s5044_s14, 8 }
   0xd   : > { %s7164_s18 = scalar_select %p5114_p6, 1, 0 }
   0xe   : > { %p5119_p8 = pnand %p3209_p5, %p112_p7  ;;  %s128_s21 = sshll.u32 %s5046_s20, 4  ;;  %s129_s21 = int_to_ptr.vmem [resolvable:$true] %s128_s21 }
   0xf   : > { %s139_s22 = sand.u32 1, %s5032_s11   ;;  %p5133_p12 = pnand %p4837_p10, %p71_p4 }
  0x10   : > { %s7165_s19 = scalar_select %p5119_p8, 1, 0 }
  0x11   : > { %p4828_p9 = pneg %p5119_p8  ;;  %s4902_s27 = scalar_lea.hbm %s7155_s0, 32 }
  0x12   : > { %s7167_s24 = scalar_select %p5133_p12, 1, 0 }
  0x13   : > { %p5129_p11 = pnand %p4828_p9, %p5107_p3  ;;  %p4903_p13 = scmp.ne.s32.totalorder %s7155_s0, %s4902_s27 }
  0x14   : > { %p4909_p5 = scmp.lt.u32.totalorder %s4902_s27, %s7155_s0 }
  0x15   : > { %p4904_p0 = pneg %p5129_p11 }
  0x17   : > { %p4905_p1 = pnand %p4904_p0, %p4903_p13 }
  0x19   : > { %p4906_p2 = pneg %p4905_p1 }
  0x1b   : > { %p4911_p4 = pnand %p4909_p5, %p4906_p2 }
  0x1d   : > { %4914 = shalt.err (!%p4911_p4)
}
  0x1e   : > { %s4915_s4 = scalar_lea.vmem %s129_s21, 32  ;;  %p4923_p6 = scmp.lt.s32.totalorder %s129_s21, %s129_s21 }
  0x1f   : > { %p4916_p7 = scmp.ne.s32.totalorder %s129_s21, %s4915_s4  ;;  %p4924_p3 = scmp.lt.s32.totalorder %s4915_s4, %s4915_s4 }
  0x21   : > { %p4918_p9 = pnand %p4916_p7, %p4904_p0  ;;  %p4925_p8 = por %p4924_p3, %p4923_p6 }
  0x23   : > { %p4919_p10 = pneg %p4918_p9 }
  0x25   : > { %p4926_p12 = pnand %p4925_p8, %p4919_p10 }
  0x27   : > { %4929 = shalt.err (!%p4926_p12)
}
  0x28   : > { %4831 = dma.hbm_to_vmem [thread:$0]  (!%p5129_p11), %s7155_s0, 32, %s129_s21, [#allocation3]  }
  0x29   : > { %s26_s7 = sadd.s32 1, %s5040_s13  ;;  %s3212_s8 = sshll.u32 %s139_s22, 9 }
  0x2a   : > { %p27_p3 = scmp.ge.s32.totalorder %s26_s7, 8  ;;  %s4249_s9 = sshll.u32 %s5040_s13, 11 }
  0x2b   : > { %s143_s20 = scalar_lea.vmem [#allocation5], %s3212_s8  ;;  %s5162_s27 = scalar_lea.hbm %s7156_s1, %s4249_s9 }
  0x2c   : > { %s150_s23 = sshll.u32 %s143_s20, 4  ;;  %s7179_s7 = smov (%p27_p3, %s26_s7), 0  ;;  %s5164_s23 = int_to_ptr.vmem [resolvable:$true] %s150_s23 }
  0x2d   : > { %s59_s21 = ssub.s32 %s5040_s13, %s7179_s7  ;;  %s5175_s29 = scalar_lea.sflag [#allocation6], %s139_s22 }
  0x2e   : > { %p60_p6 = scmp.eq.s32.totalorder %s59_s21, 0  ;;  %s4930_s30 = scalar_lea.hbm %s5162_s27, 8192 }
  0x2f   : > { %p4931_p8 = scmp.ne.s32.totalorder %s5162_s27, %s4930_s30  ;;  %p7168_p11 = scmp.ne.s32.totalorder %s7167_s24, 0 }
  0x30   : > { %s5171_s28 = scalar_select %p60_p6, %s5032_s11, %s62_s16  }
  0x31   : > { %p4932_p12 = pneg %p7168_p11  ;;  %s4935_s5 = scalar_lea.hbm %s7156_s1, 65536 }
  0x32   : > { %p4936_p1 = scmp.lt.u32.totalorder %s5162_s27, %s7156_s1  ;;  %p4937_p2 = scmp.lt.u32.totalorder %s4935_s5, %s4930_s30 }
  0x33   : > { %p4933_p13 = pnand %p4932_p12, %p4931_p8  ;;  %p4939_p4 = scmp.lt.u32.totalorder %s4930_s30, %s5162_s27 }
  0x34   : > { %p4938_p5 = por %p4937_p2, %p4936_p1 }
  0x35   : > { %p4934_p0 = pneg %p4933_p13 }
  0x36   : > { %p4940_p7 = por %p4939_p4, %p4938_p5 }
  0x38   : > { %p4941_p9 = pnand %p4940_p7, %p4934_p0 }
  0x3a   : > { %4944 = shalt.err (!%p4941_p9)
}
  0x3b   : > { %s4945_s16 = scalar_lea.vmem %s5164_s23, 8192  ;;  %s5047_s22 = smov [#allocation5]  }
  0x3c   : > { %p4946_p10 = scmp.ne.s32.totalorder %s5164_s23, %s4945_s16  ;;  %s4950_s9 = sshll.u32 %s5047_s22, 4  ;;  %s4951_s9 = int_to_ptr.vmem [resolvable:$false] %s4950_s9 }
  0x3d   : > { %s4952_s20 = scalar_lea.vmem %s4951_s9, 16384  ;;  %p4953_p8 = scmp.lt.s32.totalorder %s5164_s23, %s4951_s9 }
  0x3e   : > { %p4948_p3 = pnand %p4946_p10, %p4932_p12  ;;  %p4954_p13 = scmp.lt.s32.totalorder %s4952_s20, %s4945_s16 }
  0x40   : > { %p4949_p6 = pneg %p4948_p3  ;;  %p4955_p1 = por %p4954_p13, %p4953_p8 }
  0x42   : > { %p4956_p2 = pnand %p4955_p1, %p4949_p6 }
  0x44   : > { %4959 = shalt.err (!%p4956_p2)
}
  0x45   : > { %s5048_s25 = smov 16384   ;;  %s5049_s26 = smov 2048  }
  0x46   : > { %s5050_s21 = smov 128   ;;  %p7169_p12 = scmp.ne.s32.totalorder %s7165_s19, 0 }
  0x47   : > { %4835 = dma.hbm_to_vmem [thread:$0]  (!%p7168_p11), %s5162_s27, 8192, %s5164_s23, %s5175_s29, %s5048_s25, %s5049_s26, %s5050_s21  }
  0x48   : > { %162 = sbr.rel (%p7169_p12) target bundleno = 658 (0x292), region = 28  ;;  %p7170_p0 = scmp.ne.s32.totalorder (!%p7169_p12), %s7163_s17, 0 }
  0x4f   : > { %5011 = dma.done.wait (%p7170_p0), [#allocation3], 32  }
  0x50   : > { %5013 = vsyncadd (%p7170_p0), [#allocation3], 4294967264  ;;  %s168_s30 = sand.u32 1, %s5028_s10   ;;  %p7171_p5 = scmp.ne.s32.totalorder %s7164_s18, 0 }
  0x51   : > { %s3217_s3 = sshll.u32 %s168_s30, 9  ;;  %s169_s4 = scalar_lea.sflag [#allocation6], %s168_s30 }
  0x52   : > { %s5210_s5 = scalar_lea.vmem [#allocation5], %s3217_s3 }
  0x53   : > { %5015 = dma.done.wait (%p7171_p5), %s169_s4, 8192  }
  0x54   : > { %5017 = vsyncadd (%p7171_p5), %s169_s4, 4294959104  ;;  %p3218_p11 = scmp.ne.s32.totalorder %s5036_s12, 0 }
  0x55   : > { %v5051_v0 = vmov (!%p3218_p11), 0.0  }
  0x56   : > { %194 = sbr.rel (%p3218_p11) target bundleno = 93 (0x5d), region = 40  ;;  %195 = vst [vmem:[#allocation7] sm:$0xff] (!%p3218_p11), %v5051_v0  ;;  %196 = vst [vmem:[#allocation7 + $0x8] sm:$0xff] (!%p3218_p11), %v5051_v0 }
  0x57   : > { %197 = vst [vmem:[#allocation7 + $0x10] sm:$0xff] (!%p3218_p11), %v5051_v0  ;;  %198 = vst [vmem:[#allocation7 + $0x18] sm:$0xff] (!%p3218_p11), %v5051_v0 }
  0x58   : > { %199 = vst [vmem:[#allocation7 + $0x20] sm:$0xff] (!%p3218_p11), %v5051_v0  ;;  %200 = vst [vmem:[#allocation7 + $0x28] sm:$0xff] (!%p3218_p11), %v5051_v0 }
  0x59   : > { %201 = vst [vmem:[#allocation7 + $0x30] sm:$0xff] (!%p3218_p11), %v5051_v0  ;;  %202 = vst [vmem:[#allocation7 + $0x38] sm:$0xff] (!%p3218_p11), %v5051_v0 }
  0x5d PF: > { %s3219_s17 = sshll.u32 %s5036_s12, 11  ;;  %v204_v1 = vlaneseq  ;;  %v2272_v2 = vld [vmem:[%s5210_s5 + $0x8] sm:$0xff]  ;;  %v718_v6 = vld [vmem:[#allocation2] sm:$0x3]  ;;  %v5052_v24 = vmov 1.0|1.0  }
  0x5e   : > { %v5219_v3 = vstv %s3219_s17  ;;  %2399 = vmatprep.mubr.f32.mxu1 %v2272_v2  ;;  %v2280_v4 = vld [vmem:[%s5210_s5 + $0x48] sm:$0xff]  ;;  %p4244_p4 = scmp.ne.s32.totalorder %s5036_s12, 7 }
  0x5f   : > { %v5222_v5 = vshrl.u32 %v204_v1, 7  ;;  %2755 = vmatprep.mubr.f32.mxu0 %v2280_v4 }
  0x61   : > { %v206_v7 = vadd.s32 8, %v5222_v5  ;;  %v462_v8 = vadd.s32 %v5219_v3, %v5222_v5  ;;  %v725_v9 = vsub.s32 1, %v5222_v5  ;;  %v333_v10 = vadd.s32 1024, %v5222_v5 }
  0x62   : > { %v334_v11 = vadd.s32 1032, %v5222_v5  ;;  %v721_v12 = vsub.s32 0, %v5222_v5  ;;  %v207_v13 = vadd.s32 16, %v5222_v5  ;;  %v208_v14 = vadd.s32 24, %v5222_v5 }
  0x63   : > { %v463_v15 = vadd.s32 %v5219_v3, %v206_v7  ;;  %v5234_v16 = vrot.slane %v718_v6, %v725_v9  ;;  %v590_v17 = vadd.s32 %v5219_v3, %v333_v10  ;;  %v335_v18 = vadd.s32 1040, %v5222_v5 }
  0x64   : > { %v591_v19 = vadd.s32 %v5219_v3, %v334_v11  ;;  %v5239_v20 = vrot.slane %v718_v6, %v721_v12  ;;  %v464_v21 = vadd.s32 %v5219_v3, %v207_v13  ;;  %v465_v22 = vadd.s32 %v5219_v3, %v208_v14 }
  0x65   : > { %vm728_vm0 = vcmp.eq.s32.totalorder %v462_v8, %v5234_v16  ;;  %vm730_vm1 = vcmp.eq.s32.totalorder %v463_v15, %v5234_v16  ;;  %vm984_vm2 = vcmp.eq.s32.totalorder %v590_v17, %v5234_v16  ;;  %v336_v23 = vadd.s32 1048, %v5222_v5 }
  0x66   : > { %vm4250_vm3 = vmpackc.low %vm730_vm1, %vm728_vm0  ;;  %vm986_vm4 = vcmp.eq.s32.totalorder %v591_v19, %v5234_v16  ;;  %vm727_vm5 = vcmp.eq.s32.totalorder %v462_v8, %v5239_v20  ;;  %vm729_vm6 = vcmp.eq.s32.totalorder %v463_v15, %v5239_v20  ;;  %vm983_vm7 = vcmp.eq.s32.totalorder %v590_v17, %v5239_v20 }
  0x67   : > { %4251 = vmatprep.subr.msk.bf16.mxu1 %vm4250_vm3, %v5052_v24  ;;  %vm4506_vm8 = vmpackc.low %vm986_vm4, %vm984_vm2  ;;  %vm985_vm9 = vcmp.eq.s32.totalorder %v591_v19, %v5239_v20  ;;  %vm732_vm10 = vcmp.eq.s32.totalorder %v464_v21, %v5234_v16  ;;  %vm734_vm11 = vcmp.eq.s32.totalorder %v465_v22, %v5234_v16  ;;  %v592_v25 = vadd.s32 %v5219_v3, %v335_v18 }
  0x68   : > { %4507 = vmatprep.subr.msk.bf16.mxu0 %vm4506_vm8, %v5052_v24  ;;  %vm4252_vm12 = vmpackc.low %vm729_vm6, %vm727_vm5  ;;  %v593_v26 = vadd.s32 %v5219_v3, %v336_v23  ;;  %vm731_vm13 = vcmp.eq.s32.totalorder %v464_v21, %v5239_v20  ;;  %vm733_vm14 = vcmp.eq.s32.totalorder %v465_v22, %v5239_v20  ;;  %v209_v27 = vadd.s32 32, %v5222_v5 }
  0x69   : > { %4253 = vmatpush1.bf16.msk.msra.mxu1 %vm4252_vm12, %v5052_v24  ;;  %vm4508_vm15 = vmpackc.low %vm985_vm9, %vm983_vm7  ;;  %vm988_vm0 = vcmp.eq.s32.totalorder %v592_v25, %v5234_v16  ;;  %vm987_vm1 = vcmp.eq.s32.totalorder %v592_v25, %v5239_v20  ;;  %v210_v28 = vadd.s32 40, %v5222_v5  ;;  %v337_v29 = vadd.s32 1056, %v5222_v5 }
  0x6a   : > { %4509 = vmatpush1.bf16.msk.msra.mxu0 %vm4508_vm15, %v5052_v24  ;;  %vm4254_vm2 = vmpackc.low %vm734_vm11, %vm732_vm10  ;;  %vm990_vm3 = vcmp.eq.s32.totalorder %v593_v26, %v5234_v16  ;;  %vm989_vm4 = vcmp.eq.s32.totalorder %v593_v26, %v5239_v20  ;;  %v466_v30 = vadd.s32 %v5219_v3, %v209_v27  ;;  %v338_v31 = vadd.s32 1064, %v5222_v5 }
  0x6b   : > { %4255 = vmatprep.subr.msk.bf16.mxu1 %vm4254_vm2, %v5052_v24  ;;  %vm4510_vm5 = vmpackc.low %vm990_vm3, %vm988_vm0  ;;  %v467_v32 = vadd.s32 %v5219_v3, %v210_v28  ;;  %v594_v33 = vadd.s32 %v5219_v3, %v337_v29  ;;  %v211_v34 = vadd.s32 48, %v5222_v5  ;;  %v212_v35 = vadd.s32 56, %v5222_v5 }
  0x6c   : > { %4511 = vmatprep.subr.msk.bf16.mxu0 %vm4510_vm5, %v5052_v24  ;;  %vm4256_vm6 = vmpackc.low %vm733_vm14, %vm731_vm13  ;;  %vm736_vm7 = vcmp.eq.s32.totalorder %v466_v30, %v5234_v16  ;;  %v595_v36 = vadd.s32 %v5219_v3, %v338_v31  ;;  %vm735_vm8 = vcmp.eq.s32.totalorder %v466_v30, %v5239_v20  ;;  %v339_v37 = vadd.s32 1072, %v5222_v5 }
  0x6d   : > { %4257 = vmatpush1.bf16.msk.msra.mxu1 %vm4256_vm6, %v5052_v24  ;;  %vm4512_vm9 = vmpackc.low %vm989_vm4, %vm987_vm1  ;;  %vm738_vm10 = vcmp.eq.s32.totalorder %v467_v32, %v5234_v16  ;;  %vm992_vm11 = vcmp.eq.s32.totalorder %v594_v33, %v5234_v16  ;;  %vm737_vm12 = vcmp.eq.s32.totalorder %v467_v32, %v5239_v20  ;;  %vm991_vm13 = vcmp.eq.s32.totalorder %v594_v33, %v5239_v20 }
  0x6e   : > { %4513 = vmatpush1.bf16.msk.msra.mxu0 %vm4512_vm9, %v5052_v24  ;;  %vm4258_vm14 = vmpackc.low %vm738_vm10, %vm736_vm7  ;;  %vm994_vm15 = vcmp.eq.s32.totalorder %v595_v36, %v5234_v16  ;;  %vm993_vm0 = vcmp.eq.s32.totalorder %v595_v36, %v5239_v20  ;;  %v468_v38 = vadd.s32 %v5219_v3, %v211_v34  ;;  %v469_v39 = vadd.s32 %v5219_v3, %v212_v35 }
  0x6f   : > { %4259 = vmatprep.subr.msk.bf16.mxu1 %vm4258_vm14, %v5052_v24  ;;  %vm4514_vm1 = vmpackc.low %vm994_vm15, %vm992_vm11  ;;  %v340_v40 = vadd.s32 1080, %v5222_v5  ;;  %v596_v41 = vadd.s32 %v5219_v3, %v339_v37  ;;  %v213_v42 = vadd.s32 64, %v5222_v5  ;;  %v214_v43 = vadd.s32 72, %v5222_v5 }
  0x70   : > { %4515 = vmatprep.subr.msk.bf16.mxu0 %vm4514_vm1, %v5052_v24  ;;  %vm4260_vm2 = vmpackc.low %vm737_vm12, %vm735_vm8  ;;  %vm740_vm3 = vcmp.eq.s32.totalorder %v468_v38, %v5234_v16  ;;  %vm742_vm4 = vcmp.eq.s32.totalorder %v469_v39, %v5234_v16  ;;  %vm739_vm5 = vcmp.eq.s32.totalorder %v468_v38, %v5239_v20  ;;  %vm741_vm6 = vcmp.eq.s32.totalorder %v469_v39, %v5239_v20 }
  0x71   : > { %4261 = vmatpush1.bf16.msk.msra.mxu1 %vm4260_vm2, %v5052_v24  ;;  %vm4516_vm7 = vmpackc.low %vm993_vm0, %vm991_vm13  ;;  %v597_v44 = vadd.s32 %v5219_v3, %v340_v40  ;;  %vm996_vm9 = vcmp.eq.s32.totalorder %v596_v41, %v5234_v16  ;;  %vm995_vm8 = vcmp.eq.s32.totalorder %v596_v41, %v5239_v20  ;;  %v470_v45 = vadd.s32 %v5219_v3, %v213_v42 }
  0x72   : > { %4517 = vmatpush1.bf16.msk.msra.mxu0 %vm4516_vm7, %v5052_v24  ;;  %vm4262_vm10 = vmpackc.low %vm742_vm4, %vm740_vm3  ;;  %v471_v46 = vadd.s32 %v5219_v3, %v214_v43  ;;  %v341_v47 = vadd.s32 1088, %v5222_v5  ;;  %v342_v48 = vadd.s32 1096, %v5222_v5  ;;  %v215_v49 = vadd.s32 80, %v5222_v5 }
  0x73   : > { %4263 = vmatprep.subr.msk.bf16.mxu1 %vm4262_vm10, %v5052_v24  ;;  %vm998_vm11 = vcmp.eq.s32.totalorder %v597_v44, %v5234_v16  ;;  %vm4264_vm12 = vmpackc.low %vm741_vm6, %vm739_vm5  ;;  %vm997_vm13 = vcmp.eq.s32.totalorder %v597_v44, %v5239_v20  ;;  %vm744_vm14 = vcmp.eq.s32.totalorder %v470_v45, %v5234_v16  ;;  %vm743_vm15 = vcmp.eq.s32.totalorder %v470_v45, %v5239_v20 }
  0x74   : > { %vm4518_vm0 = vmpackc.low %vm998_vm11, %vm996_vm9  ;;  %vm746_vm1 = vcmp.eq.s32.totalorder %v471_v46, %v5234_v16  ;;  %v598_v50 = vadd.s32 %v5219_v3, %v341_v47  ;;  %v599_v51 = vadd.s32 %v5219_v3, %v342_v48  ;;  %vm745_vm2 = vcmp.eq.s32.totalorder %v471_v46, %v5239_v20 }
  0x75   : > { %4519 = vmatprep.subr.msk.bf16.mxu0 %vm4518_vm0, %v5052_v24  ;;  %4265 = vmatpush1.bf16.msk.msra.mxu1 %vm4264_vm12, %v5052_v24  ;;  %vm4520_vm3 = vmpackc.low %vm997_vm13, %vm995_vm8  ;;  %v216_v52 = vadd.s32 88, %v5222_v5  ;;  %v472_v53 = vadd.s32 %v5219_v3, %v215_v49  ;;  %v343_v54 = vadd.s32 1104, %v5222_v5  ;;  %v344_v55 = vadd.s32 1112, %v5222_v5 }
  0x76   : > { %4521 = vmatpush1.bf16.msk.msra.mxu0 %vm4520_vm3, %v5052_v24  ;;  %vm4266_vm4 = vmpackc.low %vm746_vm1, %vm744_vm14  ;;  %vm1000_vm5 = vcmp.eq.s32.totalorder %v598_v50, %v5234_v16  ;;  %vm1002_vm6 = vcmp.eq.s32.totalorder %v599_v51, %v5234_v16  ;;  %vm999_vm7 = vcmp.eq.s32.totalorder %v598_v50, %v5239_v20  ;;  %vm1001_vm9 = vcmp.eq.s32.totalorder %v599_v51, %v5239_v20 }
  0x77   : > { %4267 = vmatprep.subr.msk.bf16.mxu1 %vm4266_vm4, %v5052_v24  ;;  %vm4522_vm8 = vmpackc.low %vm1002_vm6, %vm1000_vm5  ;;  %v473_v56 = vadd.s32 %v5219_v3, %v216_v52  ;;  %vm748_vm10 = vcmp.eq.s32.totalorder %v472_v53, %v5234_v16  ;;  %v600_v57 = vadd.s32 %v5219_v3, %v343_v54  ;;  %v601_v58 = vadd.s32 %v5219_v3, %v344_v55 }
  0x78   : > { %4523 = vmatprep.subr.msk.bf16.mxu0 %vm4522_vm8, %v5052_v24  ;;  %vm4268_vm11 = vmpackc.low %vm745_vm2, %vm743_vm15  ;;  %vm747_vm12 = vcmp.eq.s32.totalorder %v472_v53, %v5239_v20  ;;  %v217_v59 = vadd.s32 96, %v5222_v5  ;;  %v218_v60 = vadd.s32 104, %v5222_v5  ;;  %v345_v61 = vadd.s32 1120, %v5222_v5 }
  0x79   : > { %4269 = vmatpush1.bf16.msk.msra.mxu1 %vm4268_vm11, %v5052_v24  ;;  %vm4524_vm13 = vmpackc.low %vm1001_vm9, %vm999_vm7  ;;  %vm750_vm14 = vcmp.eq.s32.totalorder %v473_v56, %v5234_v16  ;;  %vm1004_vm0 = vcmp.eq.s32.totalorder %v600_v57, %v5234_v16  ;;  %vm1006_vm1 = vcmp.eq.s32.totalorder %v601_v58, %v5234_v16  ;;  %vm749_vm15 = vcmp.eq.s32.totalorder %v473_v56, %v5239_v20 }
  0x7a   : > { %4525 = vmatpush1.bf16.msk.msra.mxu0 %vm4524_vm13, %v5052_v24  ;;  %vm4270_vm2 = vmpackc.low %vm750_vm14, %vm748_vm10  ;;  %vm1003_vm3 = vcmp.eq.s32.totalorder %v600_v57, %v5239_v20  ;;  %vm1005_vm4 = vcmp.eq.s32.totalorder %v601_v58, %v5239_v20  ;;  %v474_v62 = vadd.s32 %v5219_v3, %v217_v59  ;;  %v475_v63 = vadd.s32 %v5219_v3, %v218_v60 }
  0x7b   : > { %4271 = vmatprep.subr.msk.bf16.mxu1 %vm4270_vm2, %v5052_v24  ;;  %vm4526_vm5 = vmpackc.low %vm1006_vm1, %vm1004_vm0  ;;  %v346_v0 = vadd.s32 1128, %v5222_v5  ;;  %v602_v1 = vadd.s32 %v5219_v3, %v345_v61  ;;  %v219_v2 = vadd.s32 112, %v5222_v5  ;;  %v220_v4 = vadd.s32 120, %v5222_v5 }
  0x7c   : > { %4527 = vmatprep.subr.msk.bf16.mxu0 %vm4526_vm5, %v5052_v24  ;;  %vm4272_vm6 = vmpackc.low %vm749_vm15, %vm747_vm12  ;;  %vm752_vm7 = vcmp.eq.s32.totalorder %v474_v62, %v5234_v16  ;;  %vm754_vm9 = vcmp.eq.s32.totalorder %v475_v63, %v5234_v16  ;;  %vm751_vm8 = vcmp.eq.s32.totalorder %v474_v62, %v5239_v20  ;;  %vm753_vm10 = vcmp.eq.s32.totalorder %v475_v63, %v5239_v20 }
  0x7d   : > { %4273 = vmatpush1.bf16.msk.msra.mxu1 %vm4272_vm6, %v5052_v24  ;;  %vm4528_vm11 = vmpackc.low %vm1005_vm4, %vm1003_vm3  ;;  %v603_v6 = vadd.s32 %v5219_v3, %v346_v0  ;;  %vm1008_vm13 = vcmp.eq.s32.totalorder %v602_v1, %v5234_v16  ;;  %vm1007_vm12 = vcmp.eq.s32.totalorder %v602_v1, %v5239_v20  ;;  %v476_v7 = vadd.s32 %v5219_v3, %v219_v2 }
  0x7e   : > { %4529 = vmatpush1.bf16.msk.msra.mxu0 %vm4528_vm11, %v5052_v24  ;;  %vm4274_vm14 = vmpackc.low %vm754_vm9, %vm752_vm7  ;;  %v477_v8 = vadd.s32 %v5219_v3, %v220_v4  ;;  %v347_v9 = vadd.s32 1136, %v5222_v5  ;;  %v348_v10 = vadd.s32 1144, %v5222_v5  ;;  %v221_v11 = vadd.s32 128, %v5222_v5 }
  0x7f   : > { %4275 = vmatprep.subr.msk.bf16.mxu1 %vm4274_vm14, %v5052_v24  ;;  %vm1010_vm0 = vcmp.eq.s32.totalorder %v603_v6, %v5234_v16  ;;  %vm4276_vm1 = vmpackc.low %vm753_vm10, %vm751_vm8  ;;  %vm1009_vm15 = vcmp.eq.s32.totalorder %v603_v6, %v5239_v20  ;;  %vm756_vm2 = vcmp.eq.s32.totalorder %v476_v7, %v5234_v16  ;;  %vm755_vm3 = vcmp.eq.s32.totalorder %v476_v7, %v5239_v20 }
  0x80   : > { %vm4530_vm4 = vmpackc.low %vm1010_vm0, %vm1008_vm13  ;;  %vm758_vm5 = vcmp.eq.s32.totalorder %v477_v8, %v5234_v16  ;;  %v604_v12 = vadd.s32 %v5219_v3, %v347_v9  ;;  %v605_v13 = vadd.s32 %v5219_v3, %v348_v10  ;;  %vm757_vm6 = vcmp.eq.s32.totalorder %v477_v8, %v5239_v20 }
  0x81   : > { %4531 = vmatprep.subr.msk.bf16.mxu0 %vm4530_vm4, %v5052_v24  ;;  %4277 = vmatpush1.bf16.msk.msra.mxu1 %vm4276_vm1, %v5052_v24  ;;  %vm4532_vm7 = vmpackc.low %vm1009_vm15, %vm1007_vm12  ;;  %v222_v14 = vadd.s32 136, %v5222_v5  ;;  %v478_v15 = vadd.s32 %v5219_v3, %v221_v11  ;;  %v349_v17 = vadd.s32 1152, %v5222_v5  ;;  %v350_v18 = vadd.s32 1160, %v5222_v5 }
  0x82   : > { %4533 = vmatpush1.bf16.msk.msra.mxu0 %vm4532_vm7, %v5052_v24  ;;  %vm4278_vm9 = vmpackc.low %vm758_vm5, %vm756_vm2  ;;  %vm1012_vm8 = vcmp.eq.s32.totalorder %v604_v12, %v5234_v16  ;;  %vm1014_vm10 = vcmp.eq.s32.totalorder %v605_v13, %v5234_v16  ;;  %vm1011_vm11 = vcmp.eq.s32.totalorder %v604_v12, %v5239_v20  ;;  %vm1013_vm13 = vcmp.eq.s32.totalorder %v605_v13, %v5239_v20 }
  0x83   : > { %4279 = vmatprep.subr.msk.bf16.mxu1 %vm4278_vm9, %v5052_v24  ;;  %vm4534_vm12 = vmpackc.low %vm1014_vm10, %vm1012_vm8  ;;  %v479_v19 = vadd.s32 %v5219_v3, %v222_v14  ;;  %vm760_vm14 = vcmp.eq.s32.totalorder %v478_v15, %v5234_v16  ;;  %v606_v21 = vadd.s32 %v5219_v3, %v349_v17  ;;  %v607_v22 = vadd.s32 %v5219_v3, %v350_v18 }
  0x84   : > { %4535 = vmatprep.subr.msk.bf16.mxu0 %vm4534_vm12, %v5052_v24  ;;  %vm4280_vm0 = vmpackc.low %vm757_vm6, %vm755_vm3  ;;  %vm759_vm1 = vcmp.eq.s32.totalorder %v478_v15, %v5239_v20  ;;  %v223_v23 = vadd.s32 144, %v5222_v5  ;;  %v224_v25 = vadd.s32 152, %v5222_v5  ;;  %v351_v26 = vadd.s32 1168, %v5222_v5 }
  0x85   : > { %4281 = vmatpush1.bf16.msk.msra.mxu1 %vm4280_vm0, %v5052_v24  ;;  %vm4536_vm15 = vmpackc.low %vm1013_vm13, %vm1011_vm11  ;;  %vm762_vm2 = vcmp.eq.s32.totalorder %v479_v19, %v5234_v16  ;;  %vm1016_vm4 = vcmp.eq.s32.totalorder %v606_v21, %v5234_v16  ;;  %vm1018_vm5 = vcmp.eq.s32.totalorder %v607_v22, %v5234_v16  ;;  %vm761_vm3 = vcmp.eq.s32.totalorder %v479_v19, %v5239_v20 }
  0x86   : > { %4537 = vmatpush1.bf16.msk.msra.mxu0 %vm4536_vm15, %v5052_v24  ;;  %vm4282_vm6 = vmpackc.low %vm762_vm2, %vm760_vm14  ;;  %vm1015_vm7 = vcmp.eq.s32.totalorder %v606_v21, %v5239_v20  ;;  %vm1017_vm9 = vcmp.eq.s32.totalorder %v607_v22, %v5239_v20  ;;  %v480_v27 = vadd.s32 %v5219_v3, %v223_v23  ;;  %v481_v28 = vadd.s32 %v5219_v3, %v224_v25 }
  0x87   : > { %4283 = vmatprep.subr.msk.bf16.mxu1 %vm4282_vm6, %v5052_v24  ;;  %vm4538_vm8 = vmpackc.low %vm1018_vm5, %vm1016_vm4  ;;  %v352_v29 = vadd.s32 1176, %v5222_v5  ;;  %v608_v30 = vadd.s32 %v5219_v3, %v351_v26  ;;  %v225_v31 = vadd.s32 160, %v5222_v5  ;;  %v226_v32 = vadd.s32 168, %v5222_v5 }
  0x88   : > { %4539 = vmatprep.subr.msk.bf16.mxu0 %vm4538_vm8, %v5052_v24  ;;  %vm4284_vm10 = vmpackc.low %vm761_vm3, %vm759_vm1  ;;  %vm764_vm11 = vcmp.eq.s32.totalorder %v480_v27, %v5234_v16  ;;  %vm766_vm13 = vcmp.eq.s32.totalorder %v481_v28, %v5234_v16  ;;  %vm763_vm12 = vcmp.eq.s32.totalorder %v480_v27, %v5239_v20  ;;  %vm765_vm14 = vcmp.eq.s32.totalorder %v481_v28, %v5239_v20 }
  0x89   : > { %4285 = vmatpush1.bf16.msk.msra.mxu1 %vm4284_vm10, %v5052_v24  ;;  %vm4540_vm0 = vmpackc.low %vm1017_vm9, %vm1015_vm7  ;;  %v609_v33 = vadd.s32 %v5219_v3, %v352_v29  ;;  %vm1020_vm15 = vcmp.eq.s32.totalorder %v608_v30, %v5234_v16  ;;  %vm1019_vm1 = vcmp.eq.s32.totalorder %v608_v30, %v5239_v20  ;;  %v482_v34 = vadd.s32 %v5219_v3, %v225_v31  ;;  %v2271_v30 = vld [vmem:[%s5210_s5] sm:$0xff] }
  0x8a   : > { %4541 = vmatpush1.bf16.msk.msra.mxu0 %vm4540_vm0, %v5052_v24  ;;  %vm4286_vm2 = vmpackc.low %vm766_vm13, %vm764_vm11  ;;  %v483_v35 = vadd.s32 %v5219_v3, %v226_v32  ;;  %v353_v36 = vadd.s32 1184, %v5222_v5  ;;  %v354_v37 = vadd.s32 1192, %v5222_v5  ;;  %v227_v38 = vadd.s32 176, %v5222_v5 }
  0x8b   : > { %4287 = vmatprep.subr.msk.bf16.mxu1 %vm4286_vm2, %v5052_v24  ;;  %vm1022_vm4 = vcmp.eq.s32.totalorder %v609_v33, %v5234_v16  ;;  %vm4288_vm5 = vmpackc.low %vm765_vm14, %vm763_vm12  ;;  %vm1021_vm3 = vcmp.eq.s32.totalorder %v609_v33, %v5239_v20  ;;  %vm768_vm6 = vcmp.eq.s32.totalorder %v482_v34, %v5234_v16  ;;  %vm767_vm7 = vcmp.eq.s32.totalorder %v482_v34, %v5239_v20 }
  0x8c   : > { %vm4542_vm9 = vmpackc.low %vm1022_vm4, %vm1020_vm15  ;;  %vm770_vm8 = vcmp.eq.s32.totalorder %v483_v35, %v5234_v16  ;;  %v610_v39 = vadd.s32 %v5219_v3, %v353_v36  ;;  %v611_v40 = vadd.s32 %v5219_v3, %v354_v37  ;;  %vm769_vm10 = vcmp.eq.s32.totalorder %v483_v35, %v5239_v20  ;;  %v2279_v35 = vld [vmem:[%s5210_s5 + $0x40] sm:$0xff] }
  0x8d   : > { %4543 = vmatprep.subr.msk.bf16.mxu0 %vm4542_vm9, %v5052_v24  ;;  %4289 = vmatpush1.bf16.msk.msra.mxu1 %vm4288_vm5, %v5052_v24  ;;  %vm4544_vm11 = vmpackc.low %vm1021_vm3, %vm1019_vm1  ;;  %v228_v41 = vadd.s32 184, %v5222_v5  ;;  %v484_v42 = vadd.s32 %v5219_v3, %v227_v38  ;;  %v355_v43 = vadd.s32 1200, %v5222_v5  ;;  %v356_v44 = vadd.s32 1208, %v5222_v5 }
  0x8e   : > { %4545 = vmatpush1.bf16.msk.msra.mxu0 %vm4544_vm11, %v5052_v24  ;;  %vm4290_vm13 = vmpackc.low %vm770_vm8, %vm768_vm6  ;;  %vm1024_vm12 = vcmp.eq.s32.totalorder %v610_v39, %v5234_v16  ;;  %vm1026_vm14 = vcmp.eq.s32.totalorder %v611_v40, %v5234_v16  ;;  %vm1023_vm0 = vcmp.eq.s32.totalorder %v610_v39, %v5239_v20  ;;  %vm1025_vm15 = vcmp.eq.s32.totalorder %v611_v40, %v5239_v20 }
  0x8f   : > { %4291 = vmatprep.subr.msk.bf16.mxu1 %vm4290_vm13, %v5052_v24  ;;  %vm4546_vm1 = vmpackc.low %vm1026_vm14, %vm1024_vm12  ;;  %v485_v45 = vadd.s32 %v5219_v3, %v228_v41  ;;  %vm772_vm2 = vcmp.eq.s32.totalorder %v484_v42, %v5234_v16  ;;  %v612_v46 = vadd.s32 %v5219_v3, %v355_v43  ;;  %v613_v47 = vadd.s32 %v5219_v3, %v356_v44  ;;  %v2296_v44 = vld [vmem:[%s5210_s5 + $0xc8] sm:$0xff] }
  0x90   : > { %4547 = vmatprep.subr.msk.bf16.mxu0 %vm4546_vm1, %v5052_v24  ;;  %vm4292_vm4 = vmpackc.low %vm769_vm10, %vm767_vm7  ;;  %vm771_vm5 = vcmp.eq.s32.totalorder %v484_v42, %v5239_v20  ;;  %v229_v48 = vadd.s32 192, %v5222_v5  ;;  %v230_v49 = vadd.s32 200, %v5222_v5  ;;  %v357_v50 = vadd.s32 1216, %v5222_v5  ;;  %v2288_v42 = vld [vmem:[%s5210_s5 + $0x88] sm:$0xff] }
  0x91   : > { %4293 = vmatpush1.bf16.msk.msra.mxu1 %vm4292_vm4, %v5052_v24  ;;  %vm4548_vm3 = vmpackc.low %vm1025_vm15, %vm1023_vm0  ;;  %vm774_vm6 = vcmp.eq.s32.totalorder %v485_v45, %v5234_v16  ;;  %vm1028_vm9 = vcmp.eq.s32.totalorder %v612_v46, %v5234_v16  ;;  %vm1030_vm8 = vcmp.eq.s32.totalorder %v613_v47, %v5234_v16  ;;  %vm773_vm7 = vcmp.eq.s32.totalorder %v485_v45, %v5239_v20 }
  0x92   : > { %4549 = vmatpush1.bf16.msk.msra.mxu0 %vm4548_vm3, %v5052_v24  ;;  %vm4294_vm10 = vmpackc.low %vm774_vm6, %vm772_vm2  ;;  %vm1027_vm11 = vcmp.eq.s32.totalorder %v612_v46, %v5239_v20  ;;  %vm1029_vm13 = vcmp.eq.s32.totalorder %v613_v47, %v5239_v20  ;;  %v486_v51 = vadd.s32 %v5219_v3, %v229_v48  ;;  %v487_v52 = vadd.s32 %v5219_v3, %v230_v49 }
  0x93   : > { %4295 = vmatprep.subr.msk.bf16.mxu1 %vm4294_vm10, %v5052_v24  ;;  %vm4550_vm12 = vmpackc.low %vm1030_vm8, %vm1028_vm9  ;;  %v358_v53 = vadd.s32 1224, %v5222_v5  ;;  %v614_v54 = vadd.s32 %v5219_v3, %v357_v50  ;;  %v231_v55 = vadd.s32 208, %v5222_v5  ;;  %v232_v56 = vadd.s32 216, %v5222_v5 }
  0x94   : > { %4551 = vmatprep.subr.msk.bf16.mxu0 %vm4550_vm12, %v5052_v24  ;;  %vm4296_vm14 = vmpackc.low %vm773_vm7, %vm771_vm5  ;;  %vm776_vm0 = vcmp.eq.s32.totalorder %v486_v51, %v5234_v16  ;;  %vm778_vm15 = vcmp.eq.s32.totalorder %v487_v52, %v5234_v16  ;;  %vm775_vm1 = vcmp.eq.s32.totalorder %v486_v51, %v5239_v20  ;;  %vm777_vm2 = vcmp.eq.s32.totalorder %v487_v52, %v5239_v20  ;;  %v2287_v52 = vld [vmem:[%s5210_s5 + $0x80] sm:$0xff] }
  0x95   : > { %4297 = vmatpush1.bf16.msk.msra.mxu1 %vm4296_vm14, %v5052_v24  ;;  %vm4552_vm4 = vmpackc.low %vm1029_vm13, %vm1027_vm11  ;;  %v615_v57 = vadd.s32 %v5219_v3, %v358_v53  ;;  %vm1032_vm3 = vcmp.eq.s32.totalorder %v614_v54, %v5234_v16  ;;  %vm1031_vm5 = vcmp.eq.s32.totalorder %v614_v54, %v5239_v20  ;;  %v488_v58 = vadd.s32 %v5219_v3, %v231_v55 }
  0x96   : > { %4553 = vmatpush1.bf16.msk.msra.mxu0 %vm4552_vm4, %v5052_v24  ;;  %vm4298_vm6 = vmpackc.low %vm778_vm15, %vm776_vm0  ;;  %v489_v59 = vadd.s32 %v5219_v3, %v232_v56  ;;  %v359_v60 = vadd.s32 1232, %v5222_v5  ;;  %v360_v61 = vadd.s32 1240, %v5222_v5  ;;  %v233_v62 = vadd.s32 224, %v5222_v5 }
  0x97   : > { %4299 = vmatprep.subr.msk.bf16.mxu1 %vm4298_vm6, %v5052_v24  ;;  %vm1034_vm9 = vcmp.eq.s32.totalorder %v615_v57, %v5234_v16  ;;  %vm4300_vm8 = vmpackc.low %vm777_vm2, %vm775_vm1  ;;  %vm1033_vm7 = vcmp.eq.s32.totalorder %v615_v57, %v5239_v20  ;;  %vm780_vm10 = vcmp.eq.s32.totalorder %v488_v58, %v5234_v16  ;;  %vm779_vm11 = vcmp.eq.s32.totalorder %v488_v58, %v5239_v20 }
  0x98   : > { %vm4554_vm13 = vmpackc.low %vm1034_vm9, %vm1032_vm3  ;;  %vm782_vm12 = vcmp.eq.s32.totalorder %v489_v59, %v5234_v16  ;;  %v616_v63 = vadd.s32 %v5219_v3, %v359_v60  ;;  %v617_v0 = vadd.s32 %v5219_v3, %v360_v61  ;;  %vm781_vm14 = vcmp.eq.s32.totalorder %v489_v59, %v5239_v20  ;;  %v2304_v59 = vld [vmem:[%s5210_s5 + $0x108] sm:$0xff] }
  0x99   : > { %4555 = vmatprep.subr.msk.bf16.mxu0 %vm4554_vm13, %v5052_v24  ;;  %4301 = vmatpush1.bf16.msk.msra.mxu1 %vm4300_vm8, %v5052_v24  ;;  %vm4556_vm0 = vmpackc.low %vm1033_vm7, %vm1031_vm5  ;;  %v234_v1 = vadd.s32 232, %v5222_v5  ;;  %v490_v2 = vadd.s32 %v5219_v3, %v233_v62  ;;  %v361_v4 = vadd.s32 1248, %v5222_v5  ;;  %v362_v6 = vadd.s32 1256, %v5222_v5  ;;  %v2295_v62 = vld [vmem:[%s5210_s5 + $0xc0] sm:$0xff] }
  0x9a   : > { %4557 = vmatpush1.bf16.msk.msra.mxu0 %vm4556_vm0, %v5052_v24  ;;  %vm4302_vm15 = vmpackc.low %vm782_vm12, %vm780_vm10  ;;  %vm1036_vm1 = vcmp.eq.s32.totalorder %v616_v63, %v5234_v16  ;;  %vm1038_vm2 = vcmp.eq.s32.totalorder %v617_v0, %v5234_v16  ;;  %vm1035_vm4 = vcmp.eq.s32.totalorder %v616_v63, %v5239_v20  ;;  %vm1037_vm3 = vcmp.eq.s32.totalorder %v617_v0, %v5239_v20 }
  0x9b   : > { %4303 = vmatprep.subr.msk.bf16.mxu1 %vm4302_vm15, %v5052_v24  ;;  %vm4558_vm5 = vmpackc.low %vm1038_vm2, %vm1036_vm1  ;;  %v491_v7 = vadd.s32 %v5219_v3, %v234_v1  ;;  %vm784_vm6 = vcmp.eq.s32.totalorder %v490_v2, %v5234_v16  ;;  %v618_v8 = vadd.s32 %v5219_v3, %v361_v4  ;;  %v619_v9 = vadd.s32 %v5219_v3, %v362_v6 }
  0x9c   : > { %4559 = vmatprep.subr.msk.bf16.mxu0 %vm4558_vm5, %v5052_v24  ;;  %vm4304_vm9 = vmpackc.low %vm781_vm14, %vm779_vm11  ;;  %vm783_vm8 = vcmp.eq.s32.totalorder %v490_v2, %v5239_v20  ;;  %v235_v10 = vadd.s32 240, %v5222_v5  ;;  %v236_v11 = vadd.s32 248, %v5222_v5  ;;  %v363_v12 = vadd.s32 1264, %v5222_v5 }
  0x9d   : > { %4305 = vmatpush1.bf16.msk.msra.mxu1 %vm4304_vm9, %v5052_v24  ;;  %vm4560_vm7 = vmpackc.low %vm1037_vm3, %vm1035_vm4  ;;  %vm786_vm10 = vcmp.eq.s32.totalorder %v491_v7, %v5234_v16  ;;  %vm1040_vm13 = vcmp.eq.s32.totalorder %v618_v8, %v5234_v16  ;;  %vm1042_vm12 = vcmp.eq.s32.totalorder %v619_v9, %v5234_v16  ;;  %vm785_vm11 = vcmp.eq.s32.totalorder %v491_v7, %v5239_v20 }
  0x9e   : > { %4561 = vmatpush1.bf16.msk.msra.mxu0 %vm4560_vm7, %v5052_v24  ;;  %vm4306_vm14 = vmpackc.low %vm786_vm10, %vm784_vm6  ;;  %vm1039_vm0 = vcmp.eq.s32.totalorder %v618_v8, %v5239_v20  ;;  %vm1041_vm15 = vcmp.eq.s32.totalorder %v619_v9, %v5239_v20  ;;  %v492_v13 = vadd.s32 %v5219_v3, %v235_v10  ;;  %v493_v14 = vadd.s32 %v5219_v3, %v236_v11  ;;  %v2312_v11 = vld [vmem:[%s5210_s5 + $0x148] sm:$0xff] }
  0x9f   : > { %4307 = vmatprep.subr.msk.bf16.mxu1 %vm4306_vm14, %v5052_v24  ;;  %vm4562_vm1 = vmpackc.low %vm1042_vm12, %vm1040_vm13  ;;  %v364_v15 = vadd.s32 1272, %v5222_v5  ;;  %v620_v17 = vadd.s32 %v5219_v3, %v363_v12  ;;  %v237_v18 = vadd.s32 256, %v5222_v5  ;;  %v238_v19 = vadd.s32 264, %v5222_v5 }
  0xa0   : > { %4563 = vmatprep.subr.msk.bf16.mxu0 %vm4562_vm1, %v5052_v24  ;;  %vm4308_vm2 = vmpackc.low %vm785_vm11, %vm783_vm8  ;;  %vm788_vm4 = vcmp.eq.s32.totalorder %v492_v13, %v5234_v16  ;;  %vm790_vm3 = vcmp.eq.s32.totalorder %v493_v14, %v5234_v16  ;;  %vm787_vm5 = vcmp.eq.s32.totalorder %v492_v13, %v5239_v20  ;;  %vm789_vm6 = vcmp.eq.s32.totalorder %v493_v14, %v5239_v20 }
  0xa1   : > { %4309 = vmatpush1.bf16.msk.msra.mxu1 %vm4308_vm2, %v5052_v24  ;;  %vm4564_vm9 = vmpackc.low %vm1041_vm15, %vm1039_vm0  ;;  %v621_v21 = vadd.s32 %v5219_v3, %v364_v15  ;;  %vm1044_vm7 = vcmp.eq.s32.totalorder %v620_v17, %v5234_v16  ;;  %vm1043_vm8 = vcmp.eq.s32.totalorder %v620_v17, %v5239_v20  ;;  %v494_v22 = vadd.s32 %v5219_v3, %v237_v18 }
  0xa2   : > { %4565 = vmatpush1.bf16.msk.msra.mxu0 %vm4564_vm9, %v5052_v24  ;;  %vm4310_vm10 = vmpackc.low %vm790_vm3, %vm788_vm4  ;;  %v495_v23 = vadd.s32 %v5219_v3, %v238_v19  ;;  %v365_v25 = vadd.s32 1280, %v5222_v5  ;;  %v366_v26 = vadd.s32 1288, %v5222_v5  ;;  %v239_v27 = vadd.s32 272, %v5222_v5  ;;  %v2303_v19 = vld [vmem:[%s5210_s5 + $0x100] sm:$0xff] }
  0xa3   : > { %4311 = vmatprep.subr.msk.bf16.mxu1 %vm4310_vm10, %v5052_v24  ;;  %vm1046_vm13 = vcmp.eq.s32.totalorder %v621_v21, %v5234_v16  ;;  %vm4312_vm12 = vmpackc.low %vm789_vm6, %vm787_vm5  ;;  %vm1045_vm11 = vcmp.eq.s32.totalorder %v621_v21, %v5239_v20  ;;  %vm792_vm14 = vcmp.eq.s32.totalorder %v494_v22, %v5234_v16  ;;  %vm791_vm0 = vcmp.eq.s32.totalorder %v494_v22, %v5239_v20 }
  0xa4   : > { %vm4566_vm15 = vmpackc.low %vm1046_vm13, %vm1044_vm7  ;;  %vm794_vm1 = vcmp.eq.s32.totalorder %v495_v23, %v5234_v16  ;;  %v622_v28 = vadd.s32 %v5219_v3, %v365_v25  ;;  %v623_v29 = vadd.s32 %v5219_v3, %v366_v26  ;;  %vm793_vm2 = vcmp.eq.s32.totalorder %v495_v23, %v5239_v20 }
  0xa5   : > { %4567 = vmatprep.subr.msk.bf16.mxu0 %vm4566_vm15, %v5052_v24  ;;  %4313 = vmatpush1.bf16.msk.msra.mxu1 %vm4312_vm12, %v5052_v24  ;;  %vm4568_vm4 = vmpackc.low %vm1045_vm11, %vm1043_vm8  ;;  %v240_v31 = vadd.s32 280, %v5222_v5  ;;  %v496_v32 = vadd.s32 %v5219_v3, %v239_v27  ;;  %v367_v33 = vadd.s32 1296, %v5222_v5  ;;  %v368_v34 = vadd.s32 1304, %v5222_v5 }
  0xa6   : > { %4569 = vmatpush1.bf16.msk.msra.mxu0 %vm4568_vm4, %v5052_v24  ;;  %vm4314_vm3 = vmpackc.low %vm794_vm1, %vm792_vm14  ;;  %vm1048_vm5 = vcmp.eq.s32.totalorder %v622_v28, %v5234_v16  ;;  %vm1050_vm6 = vcmp.eq.s32.totalorder %v623_v29, %v5234_v16  ;;  %vm1047_vm9 = vcmp.eq.s32.totalorder %v622_v28, %v5239_v20  ;;  %vm1049_vm7 = vcmp.eq.s32.totalorder %v623_v29, %v5239_v20  ;;  %v2320_v28 = vld [vmem:[%s5210_s5 + $0x188] sm:$0xff] }
  0xa7   : > { %4315 = vmatprep.subr.msk.bf16.mxu1 %vm4314_vm3, %v5052_v24  ;;  %vm4570_vm8 = vmpackc.low %vm1050_vm6, %vm1048_vm5  ;;  %v497_v36 = vadd.s32 %v5219_v3, %v240_v31  ;;  %vm796_vm10 = vcmp.eq.s32.totalorder %v496_v32, %v5234_v16  ;;  %v624_v37 = vadd.s32 %v5219_v3, %v367_v33  ;;  %v625_v38 = vadd.s32 %v5219_v3, %v368_v34  ;;  %v2311_v31 = vld [vmem:[%s5210_s5 + $0x140] sm:$0xff] }
  0xa8   : > { %4571 = vmatprep.subr.msk.bf16.mxu0 %vm4570_vm8, %v5052_v24  ;;  %2400 = vmatmul.mubr.f32.vlgmr.msra.gmra.mrb[0].mxu1 %v2271_v30  ;;  %vm4316_vm13 = vmpackc.low %vm793_vm2, %vm791_vm0  ;;  %vm795_vm12 = vcmp.eq.s32.totalorder %v496_v32, %v5239_v20  ;;  %v241_v39 = vadd.s32 288, %v5222_v5  ;;  %v242_v40 = vadd.s32 296, %v5222_v5  ;;  %v369_v41 = vadd.s32 1312, %v5222_v5 }
  0xa9   : > { %4317 = vmatpush1.bf16.msk.msra.mxu1 %vm4316_vm13, %v5052_v24  ;;  %2756 = vmatmul.mubr.f32.vlgmr.msra.gmra.mrb[0].mxu0 %v2279_v35  ;;  %vm4572_vm11 = vmpackc.low %vm1049_vm7, %vm1047_vm9  ;;  %vm798_vm14 = vcmp.eq.s32.totalorder %v497_v36, %v5234_v16  ;;  %vm1052_vm0 = vcmp.eq.s32.totalorder %v624_v37, %v5234_v16  ;;  %vm1054_vm15 = vcmp.eq.s32.totalorder %v625_v38, %v5234_v16  ;;  %v370_v43 = vadd.s32 1320, %v5222_v5 }
  0xaa   : > { %4573 = vmatpush1.bf16.msk.msra.mxu0 %vm4572_vm11, %v5052_v24  ;;  %vm4318_vm1 = vmpackc.low %vm798_vm14, %vm796_vm10  ;;  %vm797_vm2 = vcmp.eq.s32.totalorder %v497_v36, %v5239_v20  ;;  %vm1051_vm4 = vcmp.eq.s32.totalorder %v624_v37, %v5239_v20  ;;  %vm1053_vm3 = vcmp.eq.s32.totalorder %v625_v38, %v5239_v20  ;;  %v498_v45 = vadd.s32 %v5219_v3, %v241_v39 }
  0xab   : > { %4319 = vmatprep.subr.msk.bf16.mxu1 %vm4318_vm1, %v5052_v24  ;;  %vm4574_vm5 = vmpackc.low %vm1054_vm15, %vm1052_vm0  ;;  %v499_v46 = vadd.s32 %v5219_v3, %v242_v40  ;;  %v626_v47 = vadd.s32 %v5219_v3, %v369_v41  ;;  %v627_v48 = vadd.s32 %v5219_v3, %v370_v43  ;;  %v243_v49 = vadd.s32 304, %v5222_v5  ;;  %2405 = vmatprep.mubr.f32.mxu1 %v2288_v42  ;;  %v2328_v42 = vld [vmem:[%s5210_s5 + $0x1c8] sm:$0xff] }
  0xac   : > { %4575 = vmatprep.subr.msk.bf16.mxu0 %vm4574_vm5, %v5052_v24  ;;  %vm4320_vm6 = vmpackc.low %vm797_vm2, %vm795_vm12  ;;  %vm800_vm9 = vcmp.eq.s32.totalorder %v498_v45, %v5234_v16  ;;  %vm799_vm7 = vcmp.eq.s32.totalorder %v498_v45, %v5239_v20  ;;  %v244_v50 = vadd.s32 312, %v5222_v5  ;;  %v371_v51 = vadd.s32 1328, %v5222_v5  ;;  %2761 = vmatprep.mubr.f32.mxu0 %v2296_v44 }
  0xad   : > { %4321 = vmatpush1.bf16.msk.msra.mxu1 %vm4320_vm6, %v5052_v24  ;;  %vm4576_vm8 = vmpackc.low %vm1053_vm3, %vm1051_vm4  ;;  %vm802_vm10 = vcmp.eq.s32.totalorder %v499_v46, %v5234_v16  ;;  %vm1056_vm13 = vcmp.eq.s32.totalorder %v626_v47, %v5234_v16  ;;  %vm1058_vm12 = vcmp.eq.s32.totalorder %v627_v48, %v5234_v16  ;;  %vm801_vm11 = vcmp.eq.s32.totalorder %v499_v46, %v5239_v20 }
  0xae   : > { %4577 = vmatpush1.bf16.msk.msra.mxu0 %vm4576_vm8, %v5052_v24  ;;  %vm4322_vm14 = vmpackc.low %vm802_vm10, %vm800_vm9  ;;  %vm1055_vm0 = vcmp.eq.s32.totalorder %v626_v47, %v5239_v20  ;;  %vm1057_vm15 = vcmp.eq.s32.totalorder %v627_v48, %v5239_v20  ;;  %v500_v53 = vadd.s32 %v5219_v3, %v243_v49  ;;  %v501_v54 = vadd.s32 %v5219_v3, %v244_v50  ;;  %v2319_v49 = vld [vmem:[%s5210_s5 + $0x180] sm:$0xff] }
  0xaf   : > { %4323 = vmatprep.subr.msk.bf16.mxu1 %vm4322_vm14, %v5052_v24  ;;  %vm4578_vm1 = vmpackc.low %vm1058_vm12, %vm1056_vm13  ;;  %v372_v55 = vadd.s32 1336, %v5222_v5  ;;  %v628_v56 = vadd.s32 %v5219_v3, %v371_v51  ;;  %v245_v57 = vadd.s32 320, %v5222_v5  ;;  %v246_v58 = vadd.s32 328, %v5222_v5  ;;  %2406 = vmatmul.mubr.f32.gmra.mrb[2].mxu1 %v2287_v52 }
  0xb0   : > { %4579 = vmatprep.subr.msk.bf16.mxu0 %vm4578_vm1, %v5052_v24  ;;  %vm4324_vm2 = vmpackc.low %vm801_vm11, %vm799_vm7  ;;  %vm804_vm4 = vcmp.eq.s32.totalorder %v500_v53, %v5234_v16  ;;  %vm806_vm3 = vcmp.eq.s32.totalorder %v501_v54, %v5234_v16  ;;  %vm803_vm5 = vcmp.eq.s32.totalorder %v500_v53, %v5239_v20  ;;  %vm805_vm6 = vcmp.eq.s32.totalorder %v501_v54, %v5239_v20 }
  0xb1   : > { %4325 = vmatpush1.bf16.msk.msra.mxu1 %vm4324_vm2, %v5052_v24  ;;  %vm4580_vm9 = vmpackc.low %vm1057_vm15, %vm1055_vm0  ;;  %v629_v60 = vadd.s32 %v5219_v3, %v372_v55  ;;  %vm1060_vm8 = vcmp.eq.s32.totalorder %v628_v56, %v5234_v16  ;;  %vm1059_vm7 = vcmp.eq.s32.totalorder %v628_v56, %v5239_v20  ;;  %v502_v61 = vadd.s32 %v5219_v3, %v245_v57  ;;  %v2274_v56 = vld [vmem:[%s5210_s5 + $0x18] sm:$0xff] }
  0xb2   : > { %4581 = vmatpush1.bf16.msk.msra.mxu0 %vm4580_vm9, %v5052_v24  ;;  %vm4326_vm10 = vmpackc.low %vm806_vm3, %vm804_vm4  ;;  %v503_v63 = vadd.s32 %v5219_v3, %v246_v58  ;;  %v373_v0 = vadd.s32 1344, %v5222_v5  ;;  %v374_v1 = vadd.s32 1352, %v5222_v5  ;;  %v247_v2 = vadd.s32 336, %v5222_v5  ;;  %2411 = vmatprep.mubr.f32.mxu1 %v2304_v59  ;;  %v2327_v59 = vld [vmem:[%s5210_s5 + $0x1c0] sm:$0xff] }
  0xb3   : > { %4327 = vmatprep.subr.msk.bf16.mxu1 %vm4326_vm10, %v5052_v24  ;;  %vm1062_vm13 = vcmp.eq.s32.totalorder %v629_v60, %v5234_v16  ;;  %vm4328_vm12 = vmpackc.low %vm805_vm6, %vm803_vm5  ;;  %vm1061_vm11 = vcmp.eq.s32.totalorder %v629_v60, %v5239_v20  ;;  %vm808_vm14 = vcmp.eq.s32.totalorder %v502_v61, %v5234_v16  ;;  %vm807_vm0 = vcmp.eq.s32.totalorder %v502_v61, %v5239_v20 }
  0xb4   : > { %vm4582_vm15 = vmpackc.low %vm1062_vm13, %vm1060_vm8  ;;  %vm810_vm1 = vcmp.eq.s32.totalorder %v503_v63, %v5234_v16  ;;  %v630_v4 = vadd.s32 %v5219_v3, %v373_v0  ;;  %v631_v6 = vadd.s32 %v5219_v3, %v374_v1  ;;  %vm809_vm2 = vcmp.eq.s32.totalorder %v503_v63, %v5239_v20  ;;  %2762 = vmatmul.mubr.f32.gmra.mrb[2].mxu0 %v2295_v62 }
  0xb5   : > { %4583 = vmatprep.subr.msk.bf16.mxu0 %vm4582_vm15, %v5052_v24  ;;  %4329 = vmatpush1.bf16.msk.msra.mxu1 %vm4328_vm12, %v5052_v24  ;;  %vm4584_vm4 = vmpackc.low %vm1061_vm11, %vm1059_vm7  ;;  %v248_v7 = vadd.s32 344, %v5222_v5  ;;  %v504_v8 = vadd.s32 %v5219_v3, %v247_v2  ;;  %v375_v9 = vadd.s32 1360, %v5222_v5  ;;  %v376_v10 = vadd.s32 1368, %v5222_v5 }
  0xb6   : > { %4585 = vmatpush1.bf16.msk.msra.mxu0 %vm4584_vm4, %v5052_v24  ;;  %vm4330_vm3 = vmpackc.low %vm810_vm1, %vm808_vm14  ;;  %vm1064_vm5 = vcmp.eq.s32.totalorder %v630_v4, %v5234_v16  ;;  %vm1066_vm6 = vcmp.eq.s32.totalorder %v631_v6, %v5234_v16  ;;  %vm1063_vm9 = vcmp.eq.s32.totalorder %v630_v4, %v5239_v20  ;;  %vm1065_vm8 = vcmp.eq.s32.totalorder %v631_v6, %v5239_v20 }
  0xb7   : > { %4331 = vmatprep.subr.msk.bf16.mxu1 %vm4330_vm3, %v5052_v24  ;;  %vm4586_vm7 = vmpackc.low %vm1066_vm6, %vm1064_vm5  ;;  %v505_v12 = vadd.s32 %v5219_v3, %v248_v7  ;;  %vm812_vm10 = vcmp.eq.s32.totalorder %v504_v8, %v5234_v16  ;;  %v632_v13 = vadd.s32 %v5219_v3, %v375_v9  ;;  %v633_v14 = vadd.s32 %v5219_v3, %v376_v10 }
  0xb8   : > { %4587 = vmatprep.subr.msk.bf16.mxu0 %vm4586_vm7, %v5052_v24  ;;  %vm4332_vm13 = vmpackc.low %vm809_vm2, %vm807_vm0  ;;  %vm811_vm12 = vcmp.eq.s32.totalorder %v504_v8, %v5239_v20  ;;  %v249_v15 = vadd.s32 352, %v5222_v5  ;;  %v250_v17 = vadd.s32 360, %v5222_v5  ;;  %v377_v18 = vadd.s32 1376, %v5222_v5  ;;  %2767 = vmatprep.mubr.f32.mxu0 %v2312_v11  ;;  %v2282_v8 = vld [vmem:[%s5210_s5 + $0x58] sm:$0xff] }
  0xb9   : > { %4333 = vmatpush1.bf16.msk.msra.mxu1 %vm4332_vm13, %v5052_v24  ;;  %vm4588_vm11 = vmpackc.low %vm1065_vm8, %vm1063_vm9  ;;  %vm814_vm14 = vcmp.eq.s32.totalorder %v505_v12, %v5234_v16  ;;  %vm1068_vm0 = vcmp.eq.s32.totalorder %v632_v13, %v5234_v16  ;;  %vm1070_vm15 = vcmp.eq.s32.totalorder %v633_v14, %v5234_v16  ;;  %vm813_vm1 = vcmp.eq.s32.totalorder %v505_v12, %v5239_v20 }
  0xba   : > { %4589 = vmatpush1.bf16.msk.msra.mxu0 %vm4588_vm11, %v5052_v24  ;;  %vm4334_vm2 = vmpackc.low %vm814_vm14, %vm812_vm10  ;;  %vm1067_vm4 = vcmp.eq.s32.totalorder %v632_v13, %v5239_v20  ;;  %vm1069_vm3 = vcmp.eq.s32.totalorder %v633_v14, %v5239_v20  ;;  %v506_v21 = vadd.s32 %v5219_v3, %v249_v15  ;;  %v507_v22 = vadd.s32 %v5219_v3, %v250_v17 }
  0xbb   : > { %4335 = vmatprep.subr.msk.bf16.mxu1 %vm4334_vm2, %v5052_v24  ;;  %vm4590_vm5 = vmpackc.low %vm1070_vm15, %vm1068_vm0  ;;  %v378_v23 = vadd.s32 1384, %v5222_v5  ;;  %v634_v25 = vadd.s32 %v5219_v3, %v377_v18  ;;  %v251_v26 = vadd.s32 368, %v5222_v5  ;;  %v252_v27 = vadd.s32 376, %v5222_v5  ;;  %2412 = vmatmul.mubr.f32.gmra.mrb[4].mxu1 %v2303_v19 }
  0xbc   : > { %4591 = vmatprep.subr.msk.bf16.mxu0 %vm4590_vm5, %v5052_v24  ;;  %vm4336_vm6 = vmpackc.low %vm813_vm1, %vm811_vm12  ;;  %vm816_vm9 = vcmp.eq.s32.totalorder %v506_v21, %v5234_v16  ;;  %vm818_vm8 = vcmp.eq.s32.totalorder %v507_v22, %v5234_v16  ;;  %vm815_vm7 = vcmp.eq.s32.totalorder %v506_v21, %v5239_v20  ;;  %vm817_vm10 = vcmp.eq.s32.totalorder %v507_v22, %v5239_v20 }
  0xbd   : > { %4337 = vmatpush1.bf16.msk.msra.mxu1 %vm4336_vm6, %v5052_v24  ;;  %vm4592_vm13 = vmpackc.low %vm1069_vm3, %vm1067_vm4  ;;  %v635_v29 = vadd.s32 %v5219_v3, %v378_v23  ;;  %vm1072_vm11 = vcmp.eq.s32.totalorder %v634_v25, %v5234_v16  ;;  %vm1071_vm12 = vcmp.eq.s32.totalorder %v634_v25, %v5239_v20  ;;  %v508_v30 = vadd.s32 %v5219_v3, %v251_v26 }
  0xbe   : > { %4593 = vmatpush1.bf16.msk.msra.mxu0 %vm4592_vm13, %v5052_v24  ;;  %vm4338_vm14 = vmpackc.low %vm818_vm8, %vm816_vm9  ;;  %v509_v32 = vadd.s32 %v5219_v3, %v252_v27  ;;  %v379_v33 = vadd.s32 1392, %v5222_v5  ;;  %v380_v34 = vadd.s32 1400, %v5222_v5  ;;  %v253_v35 = vadd.s32 384, %v5222_v5  ;;  %2417 = vmatprep.mubr.f32.mxu1 %v2320_v28 }
  0xbf   : > { %4339 = vmatprep.subr.msk.bf16.mxu1 %vm4338_vm14, %v5052_v24  ;;  %vm1074_vm0 = vcmp.eq.s32.totalorder %v635_v29, %v5234_v16  ;;  %vm4340_vm15 = vmpackc.low %vm817_vm10, %vm815_vm7  ;;  %vm1073_vm1 = vcmp.eq.s32.totalorder %v635_v29, %v5239_v20  ;;  %vm820_vm2 = vcmp.eq.s32.totalorder %v508_v30, %v5234_v16  ;;  %vm819_vm4 = vcmp.eq.s32.totalorder %v508_v30, %v5239_v20 }
  0xc0   : > { %vm4594_vm3 = vmpackc.low %vm1074_vm0, %vm1072_vm11  ;;  %vm822_vm5 = vcmp.eq.s32.totalorder %v509_v32, %v5234_v16  ;;  %v636_v36 = vadd.s32 %v5219_v3, %v379_v33  ;;  %v637_v37 = vadd.s32 %v5219_v3, %v380_v34  ;;  %vm821_vm6 = vcmp.eq.s32.totalorder %v509_v32, %v5239_v20  ;;  %2768 = vmatmul.mubr.f32.gmra.mrb[4].mxu0 %v2311_v31 }
  0xc1   : > { %4595 = vmatprep.subr.msk.bf16.mxu0 %vm4594_vm3, %v5052_v24  ;;  %4341 = vmatpush1.bf16.msk.msra.mxu1 %vm4340_vm15, %v5052_v24  ;;  %vm4596_vm9 = vmpackc.low %vm1073_vm1, %vm1071_vm12  ;;  %v254_v38 = vadd.s32 392, %v5222_v5  ;;  %v510_v39 = vadd.s32 %v5219_v3, %v253_v35  ;;  %v381_v40 = vadd.s32 1408, %v5222_v5  ;;  %v382_v41 = vadd.s32 1416, %v5222_v5 }
  0xc2   : > { %4597 = vmatpush1.bf16.msk.msra.mxu0 %vm4596_vm9, %v5052_v24  ;;  %vm4342_vm8 = vmpackc.low %vm822_vm5, %vm820_vm2  ;;  %vm1076_vm7 = vcmp.eq.s32.totalorder %v636_v36, %v5234_v16  ;;  %vm1078_vm10 = vcmp.eq.s32.totalorder %v637_v37, %v5234_v16  ;;  %vm1075_vm13 = vcmp.eq.s32.totalorder %v636_v36, %v5239_v20  ;;  %vm1077_vm11 = vcmp.eq.s32.totalorder %v637_v37, %v5239_v20 }
  0xc3   : > { %4343 = vmatprep.subr.msk.bf16.mxu1 %vm4342_vm8, %v5052_v24  ;;  %vm4598_vm12 = vmpackc.low %vm1078_vm10, %vm1076_vm7  ;;  %v511_v43 = vadd.s32 %v5219_v3, %v254_v38  ;;  %vm824_vm14 = vcmp.eq.s32.totalorder %v510_v39, %v5234_v16  ;;  %v638_v44 = vadd.s32 %v5219_v3, %v381_v40  ;;  %v639_v45 = vadd.s32 %v5219_v3, %v382_v41 }
  0xc4   : > { %4599 = vmatprep.subr.msk.bf16.mxu0 %vm4598_vm12, %v5052_v24  ;;  %vm4344_vm0 = vmpackc.low %vm821_vm6, %vm819_vm4  ;;  %vm823_vm15 = vcmp.eq.s32.totalorder %v510_v39, %v5239_v20  ;;  %v255_v46 = vadd.s32 400, %v5222_v5  ;;  %v256_v47 = vadd.s32 408, %v5222_v5  ;;  %v383_v48 = vadd.s32 1424, %v5222_v5  ;;  %2773 = vmatprep.mubr.f32.mxu0 %v2328_v42 }
  0xc5   : > { %4345 = vmatpush1.bf16.msk.msra.mxu1 %vm4344_vm0, %v5052_v24  ;;  %vm4600_vm1 = vmpackc.low %vm1077_vm11, %vm1075_vm13  ;;  %vm826_vm2 = vcmp.eq.s32.totalorder %v511_v43, %v5234_v16  ;;  %vm1080_vm4 = vcmp.eq.s32.totalorder %v638_v44, %v5234_v16  ;;  %vm1082_vm3 = vcmp.eq.s32.totalorder %v639_v45, %v5234_v16  ;;  %vm825_vm5 = vcmp.eq.s32.totalorder %v511_v43, %v5239_v20 }
  0xc6   : > { %4601 = vmatpush1.bf16.msk.msra.mxu0 %vm4600_vm1, %v5052_v24  ;;  %vm4346_vm6 = vmpackc.low %vm826_vm2, %vm824_vm14  ;;  %vm1079_vm9 = vcmp.eq.s32.totalorder %v638_v44, %v5239_v20  ;;  %vm1081_vm8 = vcmp.eq.s32.totalorder %v639_v45, %v5239_v20  ;;  %v512_v50 = vadd.s32 %v5219_v3, %v255_v46  ;;  %v513_v51 = vadd.s32 %v5219_v3, %v256_v47 }
  0xc7   : > { %4347 = vmatprep.subr.msk.bf16.mxu1 %vm4346_vm6, %v5052_v24  ;;  %vm4602_vm7 = vmpackc.low %vm1082_vm3, %vm1080_vm4  ;;  %v384_v52 = vadd.s32 1432, %v5222_v5  ;;  %v640_v53 = vadd.s32 %v5219_v3, %v383_v48  ;;  %v257_v54 = vadd.s32 416, %v5222_v5  ;;  %v258_v55 = vadd.s32 424, %v5222_v5  ;;  %2418 = vmatmul.mubr.f32.gmra.mrb[6].mxu1 %v2319_v49 }
  0xc8   : > { %4603 = vmatprep.subr.msk.bf16.mxu0 %vm4602_vm7, %v5052_v24  ;;  %vm4348_vm10 = vmpackc.low %vm825_vm5, %vm823_vm15  ;;  %vm828_vm13 = vcmp.eq.s32.totalorder %v512_v50, %v5234_v16  ;;  %vm830_vm11 = vcmp.eq.s32.totalorder %v513_v51, %v5234_v16  ;;  %vm827_vm12 = vcmp.eq.s32.totalorder %v512_v50, %v5239_v20  ;;  %vm829_vm14 = vcmp.eq.s32.totalorder %v513_v51, %v5239_v20 }
  0xc9   : > { %4349 = vmatpush1.bf16.msk.msra.mxu1 %vm4348_vm10, %v5052_v24  ;;  %vm4604_vm0 = vmpackc.low %vm1081_vm8, %vm1079_vm9  ;;  %v641_v57 = vadd.s32 %v5219_v3, %v384_v52  ;;  %vm1084_vm1 = vcmp.eq.s32.totalorder %v640_v53, %v5234_v16  ;;  %vm1083_vm15 = vcmp.eq.s32.totalorder %v640_v53, %v5239_v20  ;;  %v514_v58 = vadd.s32 %v5219_v3, %v257_v54 }
  0xca   : > { %4605 = vmatpush1.bf16.msk.msra.mxu0 %vm4604_vm0, %v5052_v24  ;;  %vm4350_vm2 = vmpackc.low %vm830_vm11, %vm828_vm13  ;;  %v515_v60 = vadd.s32 %v5219_v3, %v258_v55  ;;  %v385_v61 = vadd.s32 1440, %v5222_v5  ;;  %v386_v62 = vadd.s32 1448, %v5222_v5  ;;  %v259_v63 = vadd.s32 432, %v5222_v5  ;;  %2488 = vmatprep.mubr.f32.mxu1 %v2274_v56  ;;  %v2273_v56 = vld [vmem:[%s5210_s5 + $0x10] sm:$0xff] }
  0xcb   : > { %4351 = vmatprep.subr.msk.bf16.mxu1 %vm4350_vm2, %v5052_v24  ;;  %vm1086_vm4 = vcmp.eq.s32.totalorder %v641_v57, %v5234_v16  ;;  %vm4352_vm3 = vmpackc.low %vm829_vm14, %vm827_vm12  ;;  %vm1085_vm5 = vcmp.eq.s32.totalorder %v641_v57, %v5239_v20  ;;  %vm832_vm6 = vcmp.eq.s32.totalorder %v514_v58, %v5234_v16  ;;  %vm831_vm9 = vcmp.eq.s32.totalorder %v514_v58, %v5239_v20 }
  0xcc   : > { %vm4606_vm8 = vmpackc.low %vm1086_vm4, %vm1084_vm1  ;;  %vm834_vm7 = vcmp.eq.s32.totalorder %v515_v60, %v5234_v16  ;;  %v642_v0 = vadd.s32 %v5219_v3, %v385_v61  ;;  %v643_v1 = vadd.s32 %v5219_v3, %v386_v62  ;;  %vm833_vm10 = vcmp.eq.s32.totalorder %v515_v60, %v5239_v20  ;;  %2774 = vmatmul.mubr.f32.gmra.mrb[6].mxu0 %v2327_v59  ;;  %v2281_v61 = vld [vmem:[%s5210_s5 + $0x50] sm:$0xff] }
  0xcd   : > { %4607 = vmatprep.subr.msk.bf16.mxu0 %vm4606_vm8, %v5052_v24  ;;  %4353 = vmatpush1.bf16.msk.msra.mxu1 %vm4352_vm3, %v5052_v24  ;;  %vm4608_vm13 = vmpackc.low %vm1085_vm5, %vm1083_vm15  ;;  %v260_v2 = vadd.s32 440, %v5222_v5  ;;  %v516_v4 = vadd.s32 %v5219_v3, %v259_v63  ;;  %v387_v6 = vadd.s32 1456, %v5222_v5  ;;  %v388_v7 = vadd.s32 1464, %v5222_v5 }
  0xce   : > { %4609 = vmatpush1.bf16.msk.msra.mxu0 %vm4608_vm13, %v5052_v24  ;;  %vm4354_vm11 = vmpackc.low %vm834_vm7, %vm832_vm6  ;;  %vm1088_vm12 = vcmp.eq.s32.totalorder %v642_v0, %v5234_v16  ;;  %vm1090_vm14 = vcmp.eq.s32.totalorder %v643_v1, %v5234_v16  ;;  %vm1087_vm0 = vcmp.eq.s32.totalorder %v642_v0, %v5239_v20  ;;  %vm1089_vm1 = vcmp.eq.s32.totalorder %v643_v1, %v5239_v20 }
  0xcf   : > { %4355 = vmatprep.subr.msk.bf16.mxu1 %vm4354_vm11, %v5052_v24  ;;  %vm4610_vm15 = vmpackc.low %vm1090_vm14, %vm1088_vm12  ;;  %v517_v9 = vadd.s32 %v5219_v3, %v260_v2  ;;  %vm836_vm2 = vcmp.eq.s32.totalorder %v516_v4, %v5234_v16  ;;  %v644_v10 = vadd.s32 %v5219_v3, %v387_v6  ;;  %v645_v11 = vadd.s32 %v5219_v3, %v388_v7  ;;  %v2290_v6 = vld [vmem:[%s5210_s5 + $0x98] sm:$0xff] }
  0xd0   : > { %4611 = vmatprep.subr.msk.bf16.mxu0 %vm4610_vm15, %v5052_v24  ;;  %vm4356_vm4 = vmpackc.low %vm833_vm10, %vm831_vm9  ;;  %vm835_vm3 = vcmp.eq.s32.totalorder %v516_v4, %v5239_v20  ;;  %v261_v12 = vadd.s32 448, %v5222_v5  ;;  %v262_v13 = vadd.s32 456, %v5222_v5  ;;  %v389_v14 = vadd.s32 1472, %v5222_v5  ;;  %2844 = vmatprep.mubr.f32.mxu0 %v2282_v8  ;;  %v2298_v8 = vld [vmem:[%s5210_s5 + $0xd8] sm:$0xff] }
  0xd1   : > { %4357 = vmatpush1.bf16.msk.msra.mxu1 %vm4356_vm4, %v5052_v24  ;;  %vm4612_vm5 = vmpackc.low %vm1089_vm1, %vm1087_vm0  ;;  %vm838_vm6 = vcmp.eq.s32.totalorder %v517_v9, %v5234_v16  ;;  %vm1092_vm9 = vcmp.eq.s32.totalorder %v644_v10, %v5234_v16  ;;  %vm1094_vm8 = vcmp.eq.s32.totalorder %v645_v11, %v5234_v16  ;;  %vm837_vm7 = vcmp.eq.s32.totalorder %v517_v9, %v5239_v20 }
  0xd2   : > { %4613 = vmatpush1.bf16.msk.msra.mxu0 %vm4612_vm5, %v5052_v24  ;;  %vm4358_vm10 = vmpackc.low %vm838_vm6, %vm836_vm2  ;;  %vm1091_vm13 = vcmp.eq.s32.totalorder %v644_v10, %v5239_v20  ;;  %vm1093_vm11 = vcmp.eq.s32.totalorder %v645_v11, %v5239_v20  ;;  %v518_v15 = vadd.s32 %v5219_v3, %v261_v12  ;;  %v519_v17 = vadd.s32 %v5219_v3, %v262_v13 }
  0xd3   : > { %4359 = vmatprep.subr.msk.bf16.mxu1 %vm4358_vm10, %v5052_v24  ;;  %vm4614_vm12 = vmpackc.low %vm1094_vm8, %vm1092_vm9  ;;  %v390_v18 = vadd.s32 1480, %v5222_v5  ;;  %v646_v19 = vadd.s32 %v5219_v3, %v389_v14  ;;  %v263_v21 = vadd.s32 464, %v5222_v5  ;;  %v264_v22 = vadd.s32 472, %v5222_v5 }
  0xd4   : > { %4615 = vmatprep.subr.msk.bf16.mxu0 %vm4614_vm12, %v5052_v24  ;;  %vm4360_vm14 = vmpackc.low %vm837_vm7, %vm835_vm3  ;;  %vm840_vm0 = vcmp.eq.s32.totalorder %v518_v15, %v5234_v16  ;;  %vm842_vm1 = vcmp.eq.s32.totalorder %v519_v17, %v5234_v16  ;;  %vm839_vm15 = vcmp.eq.s32.totalorder %v518_v15, %v5239_v20  ;;  %vm841_vm2 = vcmp.eq.s32.totalorder %v519_v17, %v5239_v20  ;;  %v2289_v17 = vld [vmem:[%s5210_s5 + $0x90] sm:$0xff] }
  0xd5   : > { %4361 = vmatpush1.bf16.msk.msra.mxu1 %vm4360_vm14, %v5052_v24  ;;  %vm4616_vm4 = vmpackc.low %vm1093_vm11, %vm1091_vm13  ;;  %v647_v23 = vadd.s32 %v5219_v3, %v390_v18  ;;  %vm1096_vm5 = vcmp.eq.s32.totalorder %v646_v19, %v5234_v16  ;;  %vm1095_vm3 = vcmp.eq.s32.totalorder %v646_v19, %v5239_v20  ;;  %v520_v25 = vadd.s32 %v5219_v3, %v263_v21 }
  0xd6   : > { %4617 = vmatpush1.bf16.msk.msra.mxu0 %vm4616_vm4, %v5052_v24  ;;  %vm4362_vm6 = vmpackc.low %vm842_vm1, %vm840_vm0  ;;  %v521_v26 = vadd.s32 %v5219_v3, %v264_v22  ;;  %v391_v27 = vadd.s32 1488, %v5222_v5  ;;  %v392_v28 = vadd.s32 1496, %v5222_v5  ;;  %v265_v29 = vadd.s32 480, %v5222_v5 }
  0xd7   : > { %4363 = vmatprep.subr.msk.bf16.mxu1 %vm4362_vm6, %v5052_v24  ;;  %vm1098_vm9 = vcmp.eq.s32.totalorder %v647_v23, %v5234_v16  ;;  %vm4364_vm8 = vmpackc.low %vm841_vm2, %vm839_vm15  ;;  %vm1097_vm7 = vcmp.eq.s32.totalorder %v647_v23, %v5239_v20  ;;  %vm844_vm10 = vcmp.eq.s32.totalorder %v520_v25, %v5234_v16  ;;  %vm843_vm13 = vcmp.eq.s32.totalorder %v520_v25, %v5239_v20 }
  0xd8   : > { %vm4618_vm11 = vmpackc.low %vm1098_vm9, %vm1096_vm5  ;;  %vm846_vm12 = vcmp.eq.s32.totalorder %v521_v26, %v5234_v16  ;;  %v648_v30 = vadd.s32 %v5219_v3, %v391_v27  ;;  %v649_v31 = vadd.s32 %v5219_v3, %v392_v28  ;;  %vm845_vm14 = vcmp.eq.s32.totalorder %v521_v26, %v5239_v20  ;;  %v2306_v26 = vld [vmem:[%s5210_s5 + $0x118] sm:$0xff] }
  0xd9   : > { %4619 = vmatprep.subr.msk.bf16.mxu0 %vm4618_vm11, %v5052_v24  ;;  %4365 = vmatpush1.bf16.msk.msra.mxu1 %vm4364_vm8, %v5052_v24  ;;  %vm4620_vm0 = vmpackc.low %vm1097_vm7, %vm1095_vm3  ;;  %v266_v32 = vadd.s32 488, %v5222_v5  ;;  %v522_v33 = vadd.s32 %v5219_v3, %v265_v29  ;;  %v393_v34 = vadd.s32 1504, %v5222_v5  ;;  %v394_v35 = vadd.s32 1512, %v5222_v5  ;;  %v2297_v29 = vld [vmem:[%s5210_s5 + $0xd0] sm:$0xff] }
  0xda   : > { %4621 = vmatpush1.bf16.msk.msra.mxu0 %vm4620_vm0, %v5052_v24  ;;  %vm4366_vm1 = vmpackc.low %vm846_vm12, %vm844_vm10  ;;  %vm1100_vm15 = vcmp.eq.s32.totalorder %v648_v30, %v5234_v16  ;;  %vm1102_vm2 = vcmp.eq.s32.totalorder %v649_v31, %v5234_v16  ;;  %vm1099_vm4 = vcmp.eq.s32.totalorder %v648_v30, %v5239_v20  ;;  %vm1101_vm5 = vcmp.eq.s32.totalorder %v649_v31, %v5239_v20 }
  0xdb   : > { %4367 = vmatprep.subr.msk.bf16.mxu1 %vm4366_vm1, %v5052_v24  ;;  %vm4622_vm3 = vmpackc.low %vm1102_vm2, %vm1100_vm15  ;;  %v523_v36 = vadd.s32 %v5219_v3, %v266_v32  ;;  %vm848_vm6 = vcmp.eq.s32.totalorder %v522_v33, %v5234_v16  ;;  %v650_v37 = vadd.s32 %v5219_v3, %v393_v34  ;;  %v651_v38 = vadd.s32 %v5219_v3, %v394_v35 }
  0xdc   : > { %4623 = vmatprep.subr.msk.bf16.mxu0 %vm4622_vm3, %v5052_v24  ;;  %vm4368_vm9 = vmpackc.low %vm845_vm14, %vm843_vm13  ;;  %vm847_vm8 = vcmp.eq.s32.totalorder %v522_v33, %v5239_v20  ;;  %v267_v39 = vadd.s32 496, %v5222_v5  ;;  %v268_v40 = vadd.s32 504, %v5222_v5  ;;  %v395_v41 = vadd.s32 1520, %v5222_v5 }
  0xdd   : > { %4369 = vmatpush1.bf16.msk.msra.mxu1 %vm4368_vm9, %v5052_v24  ;;  %vm4624_vm7 = vmpackc.low %vm1101_vm5, %vm1099_vm4  ;;  %vm850_vm10 = vcmp.eq.s32.totalorder %v523_v36, %v5234_v16  ;;  %vm1104_vm11 = vcmp.eq.s32.totalorder %v650_v37, %v5234_v16  ;;  %vm1106_vm12 = vcmp.eq.s32.totalorder %v651_v38, %v5234_v16  ;;  %vm849_vm13 = vcmp.eq.s32.totalorder %v523_v36, %v5239_v20 }
  0xde   : > { %4625 = vmatpush1.bf16.msk.msra.mxu0 %vm4624_vm7, %v5052_v24  ;;  %vm4370_vm14 = vmpackc.low %vm850_vm10, %vm848_vm6  ;;  %vm1103_vm0 = vcmp.eq.s32.totalorder %v650_v37, %v5239_v20  ;;  %vm1105_vm1 = vcmp.eq.s32.totalorder %v651_v38, %v5239_v20  ;;  %v524_v42 = vadd.s32 %v5219_v3, %v267_v39  ;;  %v525_v43 = vadd.s32 %v5219_v3, %v268_v40  ;;  %v2314_v40 = vld [vmem:[%s5210_s5 + $0x158] sm:$0xff] }
  0xdf   : > { %4371 = vmatprep.subr.msk.bf16.mxu1 %vm4370_vm14, %v5052_v24  ;;  %vm4626_vm15 = vmpackc.low %vm1106_vm12, %vm1104_vm11  ;;  %v396_v44 = vadd.s32 1528, %v5222_v5  ;;  %v652_v45 = vadd.s32 %v5219_v3, %v395_v41  ;;  %v269_v46 = vadd.s32 512, %v5222_v5  ;;  %v270_v47 = vadd.s32 520, %v5222_v5 }
  0xe0   : > { %4627 = vmatprep.subr.msk.bf16.mxu0 %vm4626_vm15, %v5052_v24  ;;  %vm4372_vm2 = vmpackc.low %vm849_vm13, %vm847_vm8  ;;  %vm852_vm4 = vcmp.eq.s32.totalorder %v524_v42, %v5234_v16  ;;  %vm854_vm5 = vcmp.eq.s32.totalorder %v525_v43, %v5234_v16  ;;  %vm851_vm3 = vcmp.eq.s32.totalorder %v524_v42, %v5239_v20  ;;  %vm853_vm6 = vcmp.eq.s32.totalorder %v525_v43, %v5239_v20 }
  0xe1   : > { %4373 = vmatpush1.bf16.msk.msra.mxu1 %vm4372_vm2, %v5052_v24  ;;  %vm4628_vm9 = vmpackc.low %vm1105_vm1, %vm1103_vm0  ;;  %v653_v48 = vadd.s32 %v5219_v3, %v396_v44  ;;  %vm1108_vm7 = vcmp.eq.s32.totalorder %v652_v45, %v5234_v16  ;;  %vm1107_vm8 = vcmp.eq.s32.totalorder %v652_v45, %v5239_v20  ;;  %v526_v49 = vadd.s32 %v5219_v3, %v269_v46 }
  0xe2   : > { %4629 = vmatpush1.bf16.msk.msra.mxu0 %vm4628_vm9, %v5052_v24  ;;  %vm4374_vm10 = vmpackc.low %vm854_vm5, %vm852_vm4  ;;  %v527_v50 = vadd.s32 %v5219_v3, %v270_v47  ;;  %v397_v51 = vadd.s32 1536, %v5222_v5  ;;  %v398_v52 = vadd.s32 1544, %v5222_v5  ;;  %v271_v53 = vadd.s32 528, %v5222_v5  ;;  %v2305_v47 = vld [vmem:[%s5210_s5 + $0x110] sm:$0xff] }
  0xe3   : > { %4375 = vmatprep.subr.msk.bf16.mxu1 %vm4374_vm10, %v5052_v24  ;;  %vm1110_vm11 = vcmp.eq.s32.totalorder %v653_v48, %v5234_v16  ;;  %vm4376_vm12 = vmpackc.low %vm853_vm6, %vm851_vm3  ;;  %vm1109_vm13 = vcmp.eq.s32.totalorder %v653_v48, %v5239_v20  ;;  %vm856_vm14 = vcmp.eq.s32.totalorder %v526_v49, %v5234_v16  ;;  %vm855_vm0 = vcmp.eq.s32.totalorder %v526_v49, %v5239_v20 }
  0xe4   : > { %vm4630_vm1 = vmpackc.low %vm1110_vm11, %vm1108_vm7  ;;  %vm858_vm15 = vcmp.eq.s32.totalorder %v527_v50, %v5234_v16  ;;  %v654_v54 = vadd.s32 %v5219_v3, %v397_v51  ;;  %v655_v55 = vadd.s32 %v5219_v3, %v398_v52  ;;  %vm857_vm2 = vcmp.eq.s32.totalorder %v527_v50, %v5239_v20 }
  0xe5   : > { %4631 = vmatprep.subr.msk.bf16.mxu0 %vm4630_vm1, %v5052_v24  ;;  %4377 = vmatpush1.bf16.msk.msra.mxu1 %vm4376_vm12, %v5052_v24  ;;  %vm4632_vm4 = vmpackc.low %vm1109_vm13, %vm1107_vm8  ;;  %v272_v57 = vadd.s32 536, %v5222_v5  ;;  %v528_v58 = vadd.s32 %v5219_v3, %v271_v53  ;;  %v399_v59 = vadd.s32 1552, %v5222_v5  ;;  %v400_v60 = vadd.s32 1560, %v5222_v5 }
  0xe6   : > { %4633 = vmatpush1.bf16.msk.msra.mxu0 %vm4632_vm4, %v5052_v24  ;;  %vm4378_vm5 = vmpackc.low %vm858_vm15, %vm856_vm14  ;;  %vm1112_vm3 = vcmp.eq.s32.totalorder %v654_v54, %v5234_v16  ;;  %vm1114_vm6 = vcmp.eq.s32.totalorder %v655_v55, %v5234_v16  ;;  %vm1111_vm9 = vcmp.eq.s32.totalorder %v654_v54, %v5239_v20  ;;  %vm1113_vm7 = vcmp.eq.s32.totalorder %v655_v55, %v5239_v20  ;;  %v2322_v54 = vld [vmem:[%s5210_s5 + $0x198] sm:$0xff] }
  0xe7   : > { %4379 = vmatprep.subr.msk.bf16.mxu1 %vm4378_vm5, %v5052_v24  ;;  %vm4634_vm8 = vmpackc.low %vm1114_vm6, %vm1112_vm3  ;;  %v529_v62 = vadd.s32 %v5219_v3, %v272_v57  ;;  %vm860_vm10 = vcmp.eq.s32.totalorder %v528_v58, %v5234_v16  ;;  %v656_v63 = vadd.s32 %v5219_v3, %v399_v59  ;;  %v657_v0 = vadd.s32 %v5219_v3, %v400_v60  ;;  %v2313_v57 = vld [vmem:[%s5210_s5 + $0x150] sm:$0xff] }
  0xe8   : > { %4635 = vmatprep.subr.msk.bf16.mxu0 %vm4634_vm8, %v5052_v24  ;;  %2489 = vmatmul.mubr.f32.vlgmr.msra.gmra.mrb[0].mxu1 %v2273_v56  ;;  %vm4380_vm11 = vmpackc.low %vm857_vm2, %vm855_vm0  ;;  %vm859_vm12 = vcmp.eq.s32.totalorder %v528_v58, %v5239_v20  ;;  %v273_v1 = vadd.s32 544, %v5222_v5  ;;  %v274_v2 = vadd.s32 552, %v5222_v5  ;;  %v401_v4 = vadd.s32 1568, %v5222_v5 }
  0xe9   : > { %4381 = vmatpush1.bf16.msk.msra.mxu1 %vm4380_vm11, %v5052_v24  ;;  %2845 = vmatmul.mubr.f32.vlgmr.msra.gmra.mrb[0].mxu0 %v2281_v61  ;;  %vm4636_vm13 = vmpackc.low %vm1113_vm7, %vm1111_vm9  ;;  %vm862_vm14 = vcmp.eq.s32.totalorder %v529_v62, %v5234_v16  ;;  %vm1116_vm0 = vcmp.eq.s32.totalorder %v656_v63, %v5234_v16  ;;  %vm1118_vm1 = vcmp.eq.s32.totalorder %v657_v0, %v5234_v16  ;;  %v402_v7 = vadd.s32 1576, %v5222_v5 }
  0xea   : > { %4637 = vmatpush1.bf16.msk.msra.mxu0 %vm4636_vm13, %v5052_v24  ;;  %vm4382_vm15 = vmpackc.low %vm862_vm14, %vm860_vm10  ;;  %vm861_vm2 = vcmp.eq.s32.totalorder %v529_v62, %v5239_v20  ;;  %vm1115_vm4 = vcmp.eq.s32.totalorder %v656_v63, %v5239_v20  ;;  %vm1117_vm5 = vcmp.eq.s32.totalorder %v657_v0, %v5239_v20  ;;  %v530_v9 = vadd.s32 %v5219_v3, %v273_v1 }
  0xeb   : > { %4383 = vmatprep.subr.msk.bf16.mxu1 %vm4382_vm15, %v5052_v24  ;;  %vm4638_vm3 = vmpackc.low %vm1118_vm1, %vm1116_vm0  ;;  %v531_v10 = vadd.s32 %v5219_v3, %v274_v2  ;;  %v658_v11 = vadd.s32 %v5219_v3, %v401_v4  ;;  %v659_v12 = vadd.s32 %v5219_v3, %v402_v7  ;;  %v275_v13 = vadd.s32 560, %v5222_v5  ;;  %2494 = vmatprep.mubr.f32.mxu1 %v2290_v6  ;;  %v2330_v6 = vld [vmem:[%s5210_s5 + $0x1d8] sm:$0xff] }
  0xec   : > { %4639 = vmatprep.subr.msk.bf16.mxu0 %vm4638_vm3, %v5052_v24  ;;  %vm4384_vm6 = vmpackc.low %vm861_vm2, %vm859_vm12  ;;  %vm864_vm9 = vcmp.eq.s32.totalorder %v530_v9, %v5234_v16  ;;  %vm863_vm7 = vcmp.eq.s32.totalorder %v530_v9, %v5239_v20  ;;  %v276_v14 = vadd.s32 568, %v5222_v5  ;;  %v403_v15 = vadd.s32 1584, %v5222_v5  ;;  %2850 = vmatprep.mubr.f32.mxu0 %v2298_v8 }
  0xed   : > { %4385 = vmatpush1.bf16.msk.msra.mxu1 %vm4384_vm6, %v5052_v24  ;;  %vm4640_vm8 = vmpackc.low %vm1117_vm5, %vm1115_vm4  ;;  %vm866_vm10 = vcmp.eq.s32.totalorder %v531_v10, %v5234_v16  ;;  %vm1120_vm11 = vcmp.eq.s32.totalorder %v658_v11, %v5234_v16  ;;  %vm1122_vm12 = vcmp.eq.s32.totalorder %v659_v12, %v5234_v16  ;;  %vm865_vm13 = vcmp.eq.s32.totalorder %v531_v10, %v5239_v20 }
  0xee   : > { %4641 = vmatpush1.bf16.msk.msra.mxu0 %vm4640_vm8, %v5052_v24  ;;  %vm4386_vm14 = vmpackc.low %vm866_vm10, %vm864_vm9  ;;  %vm1119_vm0 = vcmp.eq.s32.totalorder %v658_v11, %v5239_v20  ;;  %vm1121_vm1 = vcmp.eq.s32.totalorder %v659_v12, %v5239_v20  ;;  %v532_v18 = vadd.s32 %v5219_v3, %v275_v13  ;;  %v533_v19 = vadd.s32 %v5219_v3, %v276_v14  ;;  %v2321_v13 = vld [vmem:[%s5210_s5 + $0x190] sm:$0xff] }
  0xef   : > { %4387 = vmatprep.subr.msk.bf16.mxu1 %vm4386_vm14, %v5052_v24  ;;  %vm4642_vm15 = vmpackc.low %vm1122_vm12, %vm1120_vm11  ;;  %v404_v21 = vadd.s32 1592, %v5222_v5  ;;  %v660_v22 = vadd.s32 %v5219_v3, %v403_v15  ;;  %v277_v23 = vadd.s32 576, %v5222_v5  ;;  %v278_v25 = vadd.s32 584, %v5222_v5  ;;  %2495 = vmatmul.mubr.f32.gmra.mrb[2].mxu1 %v2289_v17 }
  0xf0   : > { %4643 = vmatprep.subr.msk.bf16.mxu0 %vm4642_vm15, %v5052_v24  ;;  %vm4388_vm2 = vmpackc.low %vm865_vm13, %vm863_vm7  ;;  %vm868_vm4 = vcmp.eq.s32.totalorder %v532_v18, %v5234_v16  ;;  %vm870_vm5 = vcmp.eq.s32.totalorder %v533_v19, %v5234_v16  ;;  %vm867_vm3 = vcmp.eq.s32.totalorder %v532_v18, %v5239_v20  ;;  %vm869_vm6 = vcmp.eq.s32.totalorder %v533_v19, %v5239_v20 }
  0xf1   : > { %4389 = vmatpush1.bf16.msk.msra.mxu1 %vm4388_vm2, %v5052_v24  ;;  %vm4644_vm9 = vmpackc.low %vm1121_vm1, %vm1119_vm0  ;;  %v661_v27 = vadd.s32 %v5219_v3, %v404_v21  ;;  %vm1124_vm8 = vcmp.eq.s32.totalorder %v660_v22, %v5234_v16  ;;  %vm1123_vm7 = vcmp.eq.s32.totalorder %v660_v22, %v5239_v20  ;;  %v534_v28 = vadd.s32 %v5219_v3, %v277_v23  ;;  %v2276_v22 = vld [vmem:[%s5210_s5 + $0x28] sm:$0xff] }
  0xf2   : > { %4645 = vmatpush1.bf16.msk.msra.mxu0 %vm4644_vm9, %v5052_v24  ;;  %vm4390_vm10 = vmpackc.low %vm870_vm5, %vm868_vm4  ;;  %v535_v30 = vadd.s32 %v5219_v3, %v278_v25  ;;  %v405_v31 = vadd.s32 1600, %v5222_v5  ;;  %v406_v32 = vadd.s32 1608, %v5222_v5  ;;  %v279_v33 = vadd.s32 592, %v5222_v5  ;;  %2500 = vmatprep.mubr.f32.mxu1 %v2306_v26  ;;  %v2329_v26 = vld [vmem:[%s5210_s5 + $0x1d0] sm:$0xff] }
  0xf3   : > { %4391 = vmatprep.subr.msk.bf16.mxu1 %vm4390_vm10, %v5052_v24  ;;  %vm1126_vm11 = vcmp.eq.s32.totalorder %v661_v27, %v5234_v16  ;;  %vm4392_vm12 = vmpackc.low %vm869_vm6, %vm867_vm3  ;;  %vm1125_vm13 = vcmp.eq.s32.totalorder %v661_v27, %v5239_v20  ;;  %vm872_vm14 = vcmp.eq.s32.totalorder %v534_v28, %v5234_v16  ;;  %vm871_vm0 = vcmp.eq.s32.totalorder %v534_v28, %v5239_v20 }
  0xf4   : > { %vm4646_vm1 = vmpackc.low %vm1126_vm11, %vm1124_vm8  ;;  %vm874_vm15 = vcmp.eq.s32.totalorder %v535_v30, %v5234_v16  ;;  %v662_v34 = vadd.s32 %v5219_v3, %v405_v31  ;;  %v663_v35 = vadd.s32 %v5219_v3, %v406_v32  ;;  %vm873_vm2 = vcmp.eq.s32.totalorder %v535_v30, %v5239_v20  ;;  %2851 = vmatmul.mubr.f32.gmra.mrb[2].mxu0 %v2297_v29 }
  0xf5   : > { %4647 = vmatprep.subr.msk.bf16.mxu0 %vm4646_vm1, %v5052_v24  ;;  %4393 = vmatpush1.bf16.msk.msra.mxu1 %vm4392_vm12, %v5052_v24  ;;  %vm4648_vm4 = vmpackc.low %vm1125_vm13, %vm1123_vm7  ;;  %v280_v36 = vadd.s32 600, %v5222_v5  ;;  %v536_v37 = vadd.s32 %v5219_v3, %v279_v33  ;;  %v407_v38 = vadd.s32 1616, %v5222_v5  ;;  %v408_v39 = vadd.s32 1624, %v5222_v5 }
  0xf6   : > { %4649 = vmatpush1.bf16.msk.msra.mxu0 %vm4648_vm4, %v5052_v24  ;;  %vm4394_vm5 = vmpackc.low %vm874_vm15, %vm872_vm14  ;;  %vm1128_vm3 = vcmp.eq.s32.totalorder %v662_v34, %v5234_v16  ;;  %vm1130_vm6 = vcmp.eq.s32.totalorder %v663_v35, %v5234_v16  ;;  %vm1127_vm9 = vcmp.eq.s32.totalorder %v662_v34, %v5239_v20  ;;  %vm1129_vm8 = vcmp.eq.s32.totalorder %v663_v35, %v5239_v20 }
  0xf7   : > { %4395 = vmatprep.subr.msk.bf16.mxu1 %vm4394_vm5, %v5052_v24  ;;  %vm4650_vm7 = vmpackc.low %vm1130_vm6, %vm1128_vm3  ;;  %v537_v41 = vadd.s32 %v5219_v3, %v280_v36  ;;  %vm876_vm10 = vcmp.eq.s32.totalorder %v536_v37, %v5234_v16  ;;  %v664_v42 = vadd.s32 %v5219_v3, %v407_v38  ;;  %v665_v43 = vadd.s32 %v5219_v3, %v408_v39 }
  0xf8   : > { %4651 = vmatprep.subr.msk.bf16.mxu0 %vm4650_vm7, %v5052_v24  ;;  %vm4396_vm11 = vmpackc.low %vm873_vm2, %vm871_vm0  ;;  %vm875_vm12 = vcmp.eq.s32.totalorder %v536_v37, %v5239_v20  ;;  %v281_v44 = vadd.s32 608, %v5222_v5  ;;  %v282_v45 = vadd.s32 616, %v5222_v5  ;;  %v409_v46 = vadd.s32 1632, %v5222_v5  ;;  %2856 = vmatprep.mubr.f32.mxu0 %v2314_v40  ;;  %v2284_v37 = vld [vmem:[%s5210_s5 + $0x68] sm:$0xff] }
  0xf9   : > { %4397 = vmatpush1.bf16.msk.msra.mxu1 %vm4396_vm11, %v5052_v24  ;;  %vm4652_vm13 = vmpackc.low %vm1129_vm8, %vm1127_vm9  ;;  %vm878_vm14 = vcmp.eq.s32.totalorder %v537_v41, %v5234_v16  ;;  %vm1132_vm0 = vcmp.eq.s32.totalorder %v664_v42, %v5234_v16  ;;  %vm1134_vm1 = vcmp.eq.s32.totalorder %v665_v43, %v5234_v16  ;;  %vm877_vm15 = vcmp.eq.s32.totalorder %v537_v41, %v5239_v20 }
  0xfa   : > { %4653 = vmatpush1.bf16.msk.msra.mxu0 %vm4652_vm13, %v5052_v24  ;;  %vm4398_vm2 = vmpackc.low %vm878_vm14, %vm876_vm10  ;;  %vm1131_vm4 = vcmp.eq.s32.totalorder %v664_v42, %v5239_v20  ;;  %vm1133_vm5 = vcmp.eq.s32.totalorder %v665_v43, %v5239_v20  ;;  %v538_v48 = vadd.s32 %v5219_v3, %v281_v44  ;;  %v539_v49 = vadd.s32 %v5219_v3, %v282_v45 }
  0xfb   : > { %4399 = vmatprep.subr.msk.bf16.mxu1 %vm4398_vm2, %v5052_v24  ;;  %vm4654_vm3 = vmpackc.low %vm1134_vm1, %vm1132_vm0  ;;  %v410_v50 = vadd.s32 1640, %v5222_v5  ;;  %v666_v51 = vadd.s32 %v5219_v3, %v409_v46  ;;  %v283_v52 = vadd.s32 624, %v5222_v5  ;;  %v284_v53 = vadd.s32 632, %v5222_v5  ;;  %2501 = vmatmul.mubr.f32.gmra.mrb[4].mxu1 %v2305_v47 }
  0xfc   : > { %4655 = vmatprep.subr.msk.bf16.mxu0 %vm4654_vm3, %v5052_v24  ;;  %vm4400_vm6 = vmpackc.low %vm877_vm15, %vm875_vm12  ;;  %vm880_vm9 = vcmp.eq.s32.totalorder %v538_v48, %v5234_v16  ;;  %vm882_vm8 = vcmp.eq.s32.totalorder %v539_v49, %v5234_v16  ;;  %vm879_vm7 = vcmp.eq.s32.totalorder %v538_v48, %v5239_v20  ;;  %vm881_vm10 = vcmp.eq.s32.totalorder %v539_v49, %v5239_v20 }
  0xfd   : > { %4401 = vmatpush1.bf16.msk.msra.mxu1 %vm4400_vm6, %v5052_v24  ;;  %vm4656_vm11 = vmpackc.low %vm1133_vm5, %vm1131_vm4  ;;  %v667_v55 = vadd.s32 %v5219_v3, %v410_v50  ;;  %vm1136_vm13 = vcmp.eq.s32.totalorder %v666_v51, %v5234_v16  ;;  %vm1135_vm12 = vcmp.eq.s32.totalorder %v666_v51, %v5239_v20  ;;  %v540_v56 = vadd.s32 %v5219_v3, %v283_v52 }
  0xfe   : > { %4657 = vmatpush1.bf16.msk.msra.mxu0 %vm4656_vm11, %v5052_v24  ;;  %vm4402_vm14 = vmpackc.low %vm882_vm8, %vm880_vm9  ;;  %v541_v58 = vadd.s32 %v5219_v3, %v284_v53  ;;  %v411_v59 = vadd.s32 1648, %v5222_v5  ;;  %v412_v60 = vadd.s32 1656, %v5222_v5  ;;  %v285_v61 = vadd.s32 640, %v5222_v5  ;;  %2506 = vmatprep.mubr.f32.mxu1 %v2322_v54 }
  0xff   : > { %4403 = vmatprep.subr.msk.bf16.mxu1 %vm4402_vm14, %v5052_v24  ;;  %vm1138_vm0 = vcmp.eq.s32.totalorder %v667_v55, %v5234_v16  ;;  %vm4404_vm1 = vmpackc.low %vm881_vm10, %vm879_vm7  ;;  %vm1137_vm15 = vcmp.eq.s32.totalorder %v667_v55, %v5239_v20  ;;  %vm884_vm2 = vcmp.eq.s32.totalorder %v540_v56, %v5234_v16  ;;  %vm883_vm4 = vcmp.eq.s32.totalorder %v540_v56, %v5239_v20 }
 0x100   : > { %vm4658_vm5 = vmpackc.low %vm1138_vm0, %vm1136_vm13  ;;  %vm886_vm3 = vcmp.eq.s32.totalorder %v541_v58, %v5234_v16  ;;  %v668_v62 = vadd.s32 %v5219_v3, %v411_v59  ;;  %v669_v63 = vadd.s32 %v5219_v3, %v412_v60  ;;  %vm885_vm6 = vcmp.eq.s32.totalorder %v541_v58, %v5239_v20  ;;  %2857 = vmatmul.mubr.f32.gmra.mrb[4].mxu0 %v2313_v57 }
 0x101   : > { %4659 = vmatprep.subr.msk.bf16.mxu0 %vm4658_vm5, %v5052_v24  ;;  %4405 = vmatpush1.bf16.msk.msra.mxu1 %vm4404_vm1, %v5052_v24  ;;  %vm4660_vm9 = vmpackc.low %vm1137_vm15, %vm1135_vm12  ;;  %v286_v0 = vadd.s32 648, %v5222_v5  ;;  %v542_v1 = vadd.s32 %v5219_v3, %v285_v61  ;;  %v413_v2 = vadd.s32 1664, %v5222_v5  ;;  %v414_v4 = vadd.s32 1672, %v5222_v5 }
 0x102   : > { %4661 = vmatpush1.bf16.msk.msra.mxu0 %vm4660_vm9, %v5052_v24  ;;  %vm4406_vm8 = vmpackc.low %vm886_vm3, %vm884_vm2  ;;  %vm1140_vm7 = vcmp.eq.s32.totalorder %v668_v62, %v5234_v16  ;;  %vm1142_vm10 = vcmp.eq.s32.totalorder %v669_v63, %v5234_v16  ;;  %vm1139_vm11 = vcmp.eq.s32.totalorder %v668_v62, %v5239_v20  ;;  %vm1141_vm13 = vcmp.eq.s32.totalorder %v669_v63, %v5239_v20 }
 0x103   : > { %4407 = vmatprep.subr.msk.bf16.mxu1 %vm4406_vm8, %v5052_v24  ;;  %vm4662_vm12 = vmpackc.low %vm1142_vm10, %vm1140_vm7  ;;  %v543_v7 = vadd.s32 %v5219_v3, %v286_v0  ;;  %vm888_vm14 = vcmp.eq.s32.totalorder %v542_v1, %v5234_v16  ;;  %v670_v8 = vadd.s32 %v5219_v3, %v413_v2  ;;  %v671_v9 = vadd.s32 %v5219_v3, %v414_v4 }
 0x104   : > { %4663 = vmatprep.subr.msk.bf16.mxu0 %vm4662_vm12, %v5052_v24  ;;  %vm4408_vm0 = vmpackc.low %vm885_vm6, %vm883_vm4  ;;  %vm887_vm1 = vcmp.eq.s32.totalorder %v542_v1, %v5239_v20  ;;  %v287_v10 = vadd.s32 656, %v5222_v5  ;;  %v288_v11 = vadd.s32 664, %v5222_v5  ;;  %v415_v12 = vadd.s32 1680, %v5222_v5  ;;  %2862 = vmatprep.mubr.f32.mxu0 %v2330_v6 }
 0x105   : > { %4409 = vmatpush1.bf16.msk.msra.mxu1 %vm4408_vm0, %v5052_v24  ;;  %vm4664_vm15 = vmpackc.low %vm1141_vm13, %vm1139_vm11  ;;  %vm890_vm2 = vcmp.eq.s32.totalorder %v543_v7, %v5234_v16  ;;  %vm1144_vm4 = vcmp.eq.s32.totalorder %v670_v8, %v5234_v16  ;;  %vm1146_vm5 = vcmp.eq.s32.totalorder %v671_v9, %v5234_v16  ;;  %vm889_vm3 = vcmp.eq.s32.totalorder %v543_v7, %v5239_v20 }
 0x106   : > { %4665 = vmatpush1.bf16.msk.msra.mxu0 %vm4664_vm15, %v5052_v24  ;;  %vm4410_vm6 = vmpackc.low %vm890_vm2, %vm888_vm14  ;;  %vm1143_vm9 = vcmp.eq.s32.totalorder %v670_v8, %v5239_v20  ;;  %vm1145_vm8 = vcmp.eq.s32.totalorder %v671_v9, %v5239_v20  ;;  %v544_v14 = vadd.s32 %v5219_v3, %v287_v10  ;;  %v545_v15 = vadd.s32 %v5219_v3, %v288_v11 }
 0x107   : > { %4411 = vmatprep.subr.msk.bf16.mxu1 %vm4410_vm6, %v5052_v24  ;;  %vm4666_vm7 = vmpackc.low %vm1146_vm5, %vm1144_vm4  ;;  %v416_v17 = vadd.s32 1688, %v5222_v5  ;;  %v672_v18 = vadd.s32 %v5219_v3, %v415_v12  ;;  %v289_v19 = vadd.s32 672, %v5222_v5  ;;  %v290_v21 = vadd.s32 680, %v5222_v5  ;;  %2507 = vmatmul.mubr.f32.gmra.mrb[6].mxu1 %v2321_v13 }
 0x108   : > { %4667 = vmatprep.subr.msk.bf16.mxu0 %vm4666_vm7, %v5052_v24  ;;  %vm4412_vm10 = vmpackc.low %vm889_vm3, %vm887_vm1  ;;  %vm892_vm11 = vcmp.eq.s32.totalorder %v544_v14, %v5234_v16  ;;  %vm894_vm13 = vcmp.eq.s32.totalorder %v545_v15, %v5234_v16  ;;  %vm891_vm12 = vcmp.eq.s32.totalorder %v544_v14, %v5239_v20  ;;  %vm893_vm14 = vcmp.eq.s32.totalorder %v545_v15, %v5239_v20 }
 0x109   : > { %4413 = vmatpush1.bf16.msk.msra.mxu1 %vm4412_vm10, %v5052_v24  ;;  %vm4668_vm0 = vmpackc.low %vm1145_vm8, %vm1143_vm9  ;;  %v673_v23 = vadd.s32 %v5219_v3, %v416_v17  ;;  %vm1148_vm15 = vcmp.eq.s32.totalorder %v672_v18, %v5234_v16  ;;  %vm1147_vm1 = vcmp.eq.s32.totalorder %v672_v18, %v5239_v20  ;;  %v546_v25 = vadd.s32 %v5219_v3, %v289_v19 }
 0x10a   : > { %4669 = vmatpush1.bf16.msk.msra.mxu0 %vm4668_vm0, %v5052_v24  ;;  %vm4414_vm2 = vmpackc.low %vm894_vm13, %vm892_vm11  ;;  %v547_v27 = vadd.s32 %v5219_v3, %v290_v21  ;;  %v417_v28 = vadd.s32 1696, %v5222_v5  ;;  %v418_v29 = vadd.s32 1704, %v5222_v5  ;;  %v291_v30 = vadd.s32 688, %v5222_v5  ;;  %2577 = vmatprep.mubr.f32.mxu1 %v2276_v22  ;;  %v2275_v22 = vld [vmem:[%s5210_s5 + $0x20] sm:$0xff] }
 0x10b   : > { %4415 = vmatprep.subr.msk.bf16.mxu1 %vm4414_vm2, %v5052_v24  ;;  %vm1150_vm4 = vcmp.eq.s32.totalorder %v673_v23, %v5234_v16  ;;  %vm4416_vm5 = vmpackc.low %vm893_vm14, %vm891_vm12  ;;  %vm1149_vm3 = vcmp.eq.s32.totalorder %v673_v23, %v5239_v20  ;;  %vm896_vm6 = vcmp.eq.s32.totalorder %v546_v25, %v5234_v16  ;;  %vm895_vm9 = vcmp.eq.s32.totalorder %v546_v25, %v5239_v20 }
 0x10c   : > { %vm4670_vm8 = vmpackc.low %vm1150_vm4, %vm1148_vm15  ;;  %vm898_vm7 = vcmp.eq.s32.totalorder %v547_v27, %v5234_v16  ;;  %v674_v31 = vadd.s32 %v5219_v3, %v417_v28  ;;  %v675_v32 = vadd.s32 %v5219_v3, %v418_v29  ;;  %vm897_vm10 = vcmp.eq.s32.totalorder %v547_v27, %v5239_v20  ;;  %2863 = vmatmul.mubr.f32.gmra.mrb[6].mxu0 %v2329_v26  ;;  %v2283_v28 = vld [vmem:[%s5210_s5 + $0x60] sm:$0xff] }
 0x10d   : > { %4671 = vmatprep.subr.msk.bf16.mxu0 %vm4670_vm8, %v5052_v24  ;;  %4417 = vmatpush1.bf16.msk.msra.mxu1 %vm4416_vm5, %v5052_v24  ;;  %vm4672_vm11 = vmpackc.low %vm1149_vm3, %vm1147_vm1  ;;  %v292_v33 = vadd.s32 696, %v5222_v5  ;;  %v548_v34 = vadd.s32 %v5219_v3, %v291_v30  ;;  %v419_v35 = vadd.s32 1712, %v5222_v5  ;;  %v420_v36 = vadd.s32 1720, %v5222_v5 }
 0x10e   : > { %4673 = vmatpush1.bf16.msk.msra.mxu0 %vm4672_vm11, %v5052_v24  ;;  %vm4418_vm13 = vmpackc.low %vm898_vm7, %vm896_vm6  ;;  %vm1152_vm12 = vcmp.eq.s32.totalorder %v674_v31, %v5234_v16  ;;  %vm1154_vm14 = vcmp.eq.s32.totalorder %v675_v32, %v5234_v16  ;;  %vm1151_vm0 = vcmp.eq.s32.totalorder %v674_v31, %v5239_v20  ;;  %vm1153_vm15 = vcmp.eq.s32.totalorder %v675_v32, %v5239_v20 }
 0x10f   : > { %4419 = vmatprep.subr.msk.bf16.mxu1 %vm4418_vm13, %v5052_v24  ;;  %vm4674_vm1 = vmpackc.low %vm1154_vm14, %vm1152_vm12  ;;  %v549_v38 = vadd.s32 %v5219_v3, %v292_v33  ;;  %vm900_vm2 = vcmp.eq.s32.totalorder %v548_v34, %v5234_v16  ;;  %v676_v39 = vadd.s32 %v5219_v3, %v419_v35  ;;  %v677_v40 = vadd.s32 %v5219_v3, %v420_v36  ;;  %v2292_v35 = vld [vmem:[%s5210_s5 + $0xa8] sm:$0xff] }
 0x110   : > { %4675 = vmatprep.subr.msk.bf16.mxu0 %vm4674_vm1, %v5052_v24  ;;  %vm4420_vm4 = vmpackc.low %vm897_vm10, %vm895_vm9  ;;  %vm899_vm5 = vcmp.eq.s32.totalorder %v548_v34, %v5239_v20  ;;  %v293_v41 = vadd.s32 704, %v5222_v5  ;;  %v294_v42 = vadd.s32 712, %v5222_v5  ;;  %v421_v43 = vadd.s32 1728, %v5222_v5  ;;  %2933 = vmatprep.mubr.f32.mxu0 %v2284_v37  ;;  %v2300_v37 = vld [vmem:[%s5210_s5 + $0xe8] sm:$0xff] }
 0x111   : > { %4421 = vmatpush1.bf16.msk.msra.mxu1 %vm4420_vm4, %v5052_v24  ;;  %vm4676_vm3 = vmpackc.low %vm1153_vm15, %vm1151_vm0  ;;  %vm902_vm6 = vcmp.eq.s32.totalorder %v549_v38, %v5234_v16  ;;  %vm1156_vm9 = vcmp.eq.s32.totalorder %v676_v39, %v5234_v16  ;;  %vm1158_vm8 = vcmp.eq.s32.totalorder %v677_v40, %v5234_v16  ;;  %vm901_vm7 = vcmp.eq.s32.totalorder %v549_v38, %v5239_v20 }
 0x112   : > { %4677 = vmatpush1.bf16.msk.msra.mxu0 %vm4676_vm3, %v5052_v24  ;;  %vm4422_vm10 = vmpackc.low %vm902_vm6, %vm900_vm2  ;;  %vm1155_vm11 = vcmp.eq.s32.totalorder %v676_v39, %v5239_v20  ;;  %vm1157_vm13 = vcmp.eq.s32.totalorder %v677_v40, %v5239_v20  ;;  %v550_v44 = vadd.s32 %v5219_v3, %v293_v41  ;;  %v551_v45 = vadd.s32 %v5219_v3, %v294_v42 }
 0x113   : > { %4423 = vmatprep.subr.msk.bf16.mxu1 %vm4422_vm10, %v5052_v24  ;;  %vm4678_vm12 = vmpackc.low %vm1158_vm8, %vm1156_vm9  ;;  %v422_v46 = vadd.s32 1736, %v5222_v5  ;;  %v678_v47 = vadd.s32 %v5219_v3, %v421_v43  ;;  %v295_v48 = vadd.s32 720, %v5222_v5  ;;  %v296_v49 = vadd.s32 728, %v5222_v5 }
 0x114   : > { %4679 = vmatprep.subr.msk.bf16.mxu0 %vm4678_vm12, %v5052_v24  ;;  %vm4424_vm14 = vmpackc.low %vm901_vm7, %vm899_vm5  ;;  %vm904_vm0 = vcmp.eq.s32.totalorder %v550_v44, %v5234_v16  ;;  %vm906_vm15 = vcmp.eq.s32.totalorder %v551_v45, %v5234_v16  ;;  %vm903_vm1 = vcmp.eq.s32.totalorder %v550_v44, %v5239_v20  ;;  %vm905_vm2 = vcmp.eq.s32.totalorder %v551_v45, %v5239_v20  ;;  %v2291_v45 = vld [vmem:[%s5210_s5 + $0xa0] sm:$0xff] }
 0x115   : > { %4425 = vmatpush1.bf16.msk.msra.mxu1 %vm4424_vm14, %v5052_v24  ;;  %vm4680_vm4 = vmpackc.low %vm1157_vm13, %vm1155_vm11  ;;  %v679_v50 = vadd.s32 %v5219_v3, %v422_v46  ;;  %vm1160_vm3 = vcmp.eq.s32.totalorder %v678_v47, %v5234_v16  ;;  %vm1159_vm5 = vcmp.eq.s32.totalorder %v678_v47, %v5239_v20  ;;  %v552_v51 = vadd.s32 %v5219_v3, %v295_v48 }
 0x116   : > { %4681 = vmatpush1.bf16.msk.msra.mxu0 %vm4680_vm4, %v5052_v24  ;;  %vm4426_vm6 = vmpackc.low %vm906_vm15, %vm904_vm0  ;;  %v553_v52 = vadd.s32 %v5219_v3, %v296_v49  ;;  %v423_v53 = vadd.s32 1744, %v5222_v5  ;;  %v424_v54 = vadd.s32 1752, %v5222_v5  ;;  %v297_v55 = vadd.s32 736, %v5222_v5 }
 0x117   : > { %4427 = vmatprep.subr.msk.bf16.mxu1 %vm4426_vm6, %v5052_v24  ;;  %vm1162_vm9 = vcmp.eq.s32.totalorder %v679_v50, %v5234_v16  ;;  %vm4428_vm8 = vmpackc.low %vm905_vm2, %vm903_vm1  ;;  %vm1161_vm7 = vcmp.eq.s32.totalorder %v679_v50, %v5239_v20  ;;  %vm908_vm10 = vcmp.eq.s32.totalorder %v552_v51, %v5234_v16  ;;  %vm907_vm11 = vcmp.eq.s32.totalorder %v552_v51, %v5239_v20 }
 0x118   : > { %vm4682_vm13 = vmpackc.low %vm1162_vm9, %vm1160_vm3  ;;  %vm910_vm12 = vcmp.eq.s32.totalorder %v553_v52, %v5234_v16  ;;  %v680_v56 = vadd.s32 %v5219_v3, %v423_v53  ;;  %v681_v57 = vadd.s32 %v5219_v3, %v424_v54  ;;  %vm909_vm14 = vcmp.eq.s32.totalorder %v553_v52, %v5239_v20  ;;  %v2308_v52 = vld [vmem:[%s5210_s5 + $0x128] sm:$0xff] }
 0x119   : > { %4683 = vmatprep.subr.msk.bf16.mxu0 %vm4682_vm13, %v5052_v24  ;;  %4429 = vmatpush1.bf16.msk.msra.mxu1 %vm4428_vm8, %v5052_v24  ;;  %vm4684_vm0 = vmpackc.low %vm1161_vm7, %vm1159_vm5  ;;  %v298_v58 = vadd.s32 744, %v5222_v5  ;;  %v554_v59 = vadd.s32 %v5219_v3, %v297_v55  ;;  %v425_v60 = vadd.s32 1760, %v5222_v5  ;;  %v426_v61 = vadd.s32 1768, %v5222_v5  ;;  %v2299_v55 = vld [vmem:[%s5210_s5 + $0xe0] sm:$0xff] }
 0x11a   : > { %4685 = vmatpush1.bf16.msk.msra.mxu0 %vm4684_vm0, %v5052_v24  ;;  %vm4430_vm15 = vmpackc.low %vm910_vm12, %vm908_vm10  ;;  %vm1164_vm1 = vcmp.eq.s32.totalorder %v680_v56, %v5234_v16  ;;  %vm1166_vm2 = vcmp.eq.s32.totalorder %v681_v57, %v5234_v16  ;;  %vm1163_vm4 = vcmp.eq.s32.totalorder %v680_v56, %v5239_v20  ;;  %vm1165_vm3 = vcmp.eq.s32.totalorder %v681_v57, %v5239_v20 }
 0x11b   : > { %4431 = vmatprep.subr.msk.bf16.mxu1 %vm4430_vm15, %v5052_v24  ;;  %vm4686_vm5 = vmpackc.low %vm1166_vm2, %vm1164_vm1  ;;  %v555_v62 = vadd.s32 %v5219_v3, %v298_v58  ;;  %vm912_vm6 = vcmp.eq.s32.totalorder %v554_v59, %v5234_v16  ;;  %v682_v63 = vadd.s32 %v5219_v3, %v425_v60  ;;  %v683_v0 = vadd.s32 %v5219_v3, %v426_v61 }
 0x11c   : > { %4687 = vmatprep.subr.msk.bf16.mxu0 %vm4686_vm5, %v5052_v24  ;;  %vm4432_vm9 = vmpackc.low %vm909_vm14, %vm907_vm11  ;;  %vm911_vm8 = vcmp.eq.s32.totalorder %v554_v59, %v5239_v20  ;;  %v299_v1 = vadd.s32 752, %v5222_v5  ;;  %v300_v2 = vadd.s32 760, %v5222_v5  ;;  %v427_v4 = vadd.s32 1776, %v5222_v5 }
 0x11d   : > { %4433 = vmatpush1.bf16.msk.msra.mxu1 %vm4432_vm9, %v5052_v24  ;;  %vm4688_vm7 = vmpackc.low %vm1165_vm3, %vm1163_vm4  ;;  %vm914_vm10 = vcmp.eq.s32.totalorder %v555_v62, %v5234_v16  ;;  %vm1168_vm13 = vcmp.eq.s32.totalorder %v682_v63, %v5234_v16  ;;  %vm1170_vm12 = vcmp.eq.s32.totalorder %v683_v0, %v5234_v16  ;;  %vm913_vm11 = vcmp.eq.s32.totalorder %v555_v62, %v5239_v20 }
 0x11e   : > { %4689 = vmatpush1.bf16.msk.msra.mxu0 %vm4688_vm7, %v5052_v24  ;;  %vm4434_vm14 = vmpackc.low %vm914_vm10, %vm912_vm6  ;;  %vm1167_vm0 = vcmp.eq.s32.totalorder %v682_v63, %v5239_v20  ;;  %vm1169_vm15 = vcmp.eq.s32.totalorder %v683_v0, %v5239_v20  ;;  %v556_v6 = vadd.s32 %v5219_v3, %v299_v1  ;;  %v557_v7 = vadd.s32 %v5219_v3, %v300_v2  ;;  %v2316_v2 = vld [vmem:[%s5210_s5 + $0x168] sm:$0xff] }
 0x11f   : > { %4435 = vmatprep.subr.msk.bf16.mxu1 %vm4434_vm14, %v5052_v24  ;;  %vm4690_vm1 = vmpackc.low %vm1170_vm12, %vm1168_vm13  ;;  %v428_v8 = vadd.s32 1784, %v5222_v5  ;;  %v684_v9 = vadd.s32 %v5219_v3, %v427_v4  ;;  %v301_v10 = vadd.s32 768, %v5222_v5  ;;  %v302_v11 = vadd.s32 776, %v5222_v5 }
 0x120   : > { %4691 = vmatprep.subr.msk.bf16.mxu0 %vm4690_vm1, %v5052_v24  ;;  %vm4436_vm2 = vmpackc.low %vm913_vm11, %vm911_vm8  ;;  %vm916_vm4 = vcmp.eq.s32.totalorder %v556_v6, %v5234_v16  ;;  %vm918_vm3 = vcmp.eq.s32.totalorder %v557_v7, %v5234_v16  ;;  %vm915_vm5 = vcmp.eq.s32.totalorder %v556_v6, %v5239_v20  ;;  %vm917_vm6 = vcmp.eq.s32.totalorder %v557_v7, %v5239_v20 }
 0x121   : > { %4437 = vmatpush1.bf16.msk.msra.mxu1 %vm4436_vm2, %v5052_v24  ;;  %vm4692_vm9 = vmpackc.low %vm1169_vm15, %vm1167_vm0  ;;  %v685_v12 = vadd.s32 %v5219_v3, %v428_v8  ;;  %vm1172_vm7 = vcmp.eq.s32.totalorder %v684_v9, %v5234_v16  ;;  %vm1171_vm8 = vcmp.eq.s32.totalorder %v684_v9, %v5239_v20  ;;  %v558_v13 = vadd.s32 %v5219_v3, %v301_v10 }
 0x122   : > { %4693 = vmatpush1.bf16.msk.msra.mxu0 %vm4692_vm9, %v5052_v24  ;;  %vm4438_vm10 = vmpackc.low %vm918_vm3, %vm916_vm4  ;;  %v559_v14 = vadd.s32 %v5219_v3, %v302_v11  ;;  %v429_v15 = vadd.s32 1792, %v5222_v5  ;;  %v430_v17 = vadd.s32 1800, %v5222_v5  ;;  %v303_v18 = vadd.s32 784, %v5222_v5  ;;  %v2307_v11 = vld [vmem:[%s5210_s5 + $0x120] sm:$0xff] }
 0x123   : > { %4439 = vmatprep.subr.msk.bf16.mxu1 %vm4438_vm10, %v5052_v24  ;;  %vm1174_vm13 = vcmp.eq.s32.totalorder %v685_v12, %v5234_v16  ;;  %vm4440_vm12 = vmpackc.low %vm917_vm6, %vm915_vm5  ;;  %vm1173_vm11 = vcmp.eq.s32.totalorder %v685_v12, %v5239_v20  ;;  %vm920_vm14 = vcmp.eq.s32.totalorder %v558_v13, %v5234_v16  ;;  %vm919_vm0 = vcmp.eq.s32.totalorder %v558_v13, %v5239_v20 }
 0x124   : > { %vm4694_vm15 = vmpackc.low %vm1174_vm13, %vm1172_vm7  ;;  %vm922_vm1 = vcmp.eq.s32.totalorder %v559_v14, %v5234_v16  ;;  %v686_v19 = vadd.s32 %v5219_v3, %v429_v15  ;;  %v687_v21 = vadd.s32 %v5219_v3, %v430_v17  ;;  %vm921_vm2 = vcmp.eq.s32.totalorder %v559_v14, %v5239_v20 }
 0x125   : > { %4695 = vmatprep.subr.msk.bf16.mxu0 %vm4694_vm15, %v5052_v24  ;;  %4441 = vmatpush1.bf16.msk.msra.mxu1 %vm4440_vm12, %v5052_v24  ;;  %vm4696_vm4 = vmpackc.low %vm1173_vm11, %vm1171_vm8  ;;  %v304_v23 = vadd.s32 792, %v5222_v5  ;;  %v560_v25 = vadd.s32 %v5219_v3, %v303_v18  ;;  %v431_v26 = vadd.s32 1808, %v5222_v5  ;;  %v432_v27 = vadd.s32 1816, %v5222_v5 }
 0x126   : > { %4697 = vmatpush1.bf16.msk.msra.mxu0 %vm4696_vm4, %v5052_v24  ;;  %vm4442_vm3 = vmpackc.low %vm922_vm1, %vm920_vm14  ;;  %vm1176_vm5 = vcmp.eq.s32.totalorder %v686_v19, %v5234_v16  ;;  %vm1178_vm6 = vcmp.eq.s32.totalorder %v687_v21, %v5234_v16  ;;  %vm1175_vm9 = vcmp.eq.s32.totalorder %v686_v19, %v5239_v20  ;;  %vm1177_vm7 = vcmp.eq.s32.totalorder %v687_v21, %v5239_v20  ;;  %v2324_v19 = vld [vmem:[%s5210_s5 + $0x1a8] sm:$0xff] }
 0x127   : > { %4443 = vmatprep.subr.msk.bf16.mxu1 %vm4442_vm3, %v5052_v24  ;;  %vm4698_vm8 = vmpackc.low %vm1178_vm6, %vm1176_vm5  ;;  %v561_v29 = vadd.s32 %v5219_v3, %v304_v23  ;;  %vm924_vm10 = vcmp.eq.s32.totalorder %v560_v25, %v5234_v16  ;;  %v688_v30 = vadd.s32 %v5219_v3, %v431_v26  ;;  %v689_v31 = vadd.s32 %v5219_v3, %v432_v27  ;;  %v2315_v23 = vld [vmem:[%s5210_s5 + $0x160] sm:$0xff] }
 0x128   : > { %4699 = vmatprep.subr.msk.bf16.mxu0 %vm4698_vm8, %v5052_v24  ;;  %2578 = vmatmul.mubr.f32.vlgmr.msra.gmra.mrb[0].mxu1 %v2275_v22  ;;  %vm4444_vm13 = vmpackc.low %vm921_vm2, %vm919_vm0  ;;  %vm923_vm12 = vcmp.eq.s32.totalorder %v560_v25, %v5239_v20  ;;  %v305_v32 = vadd.s32 800, %v5222_v5  ;;  %v306_v33 = vadd.s32 808, %v5222_v5  ;;  %v433_v34 = vadd.s32 1824, %v5222_v5 }
 0x129   : > { %4445 = vmatpush1.bf16.msk.msra.mxu1 %vm4444_vm13, %v5052_v24  ;;  %2934 = vmatmul.mubr.f32.vlgmr.msra.gmra.mrb[0].mxu0 %v2283_v28  ;;  %vm4700_vm11 = vmpackc.low %vm1177_vm7, %vm1175_vm9  ;;  %vm926_vm14 = vcmp.eq.s32.totalorder %v561_v29, %v5234_v16  ;;  %vm1180_vm0 = vcmp.eq.s32.totalorder %v688_v30, %v5234_v16  ;;  %vm1182_vm15 = vcmp.eq.s32.totalorder %v689_v31, %v5234_v16  ;;  %v434_v36 = vadd.s32 1832, %v5222_v5 }
 0x12a   : > { %4701 = vmatpush1.bf16.msk.msra.mxu0 %vm4700_vm11, %v5052_v24  ;;  %vm4446_vm1 = vmpackc.low %vm926_vm14, %vm924_vm10  ;;  %vm925_vm2 = vcmp.eq.s32.totalorder %v561_v29, %v5239_v20  ;;  %vm1179_vm4 = vcmp.eq.s32.totalorder %v688_v30, %v5239_v20  ;;  %vm1181_vm3 = vcmp.eq.s32.totalorder %v689_v31, %v5239_v20  ;;  %v562_v38 = vadd.s32 %v5219_v3, %v305_v32 }
 0x12b   : > { %4447 = vmatprep.subr.msk.bf16.mxu1 %vm4446_vm1, %v5052_v24  ;;  %vm4702_vm5 = vmpackc.low %vm1182_vm15, %vm1180_vm0  ;;  %v563_v39 = vadd.s32 %v5219_v3, %v306_v33  ;;  %v690_v40 = vadd.s32 %v5219_v3, %v433_v34  ;;  %v691_v41 = vadd.s32 %v5219_v3, %v434_v36  ;;  %v307_v42 = vadd.s32 816, %v5222_v5  ;;  %2583 = vmatprep.mubr.f32.mxu1 %v2292_v35  ;;  %v2332_v35 = vld [vmem:[%s5210_s5 + $0x1e8] sm:$0xff] }
 0x12c   : > { %4703 = vmatprep.subr.msk.bf16.mxu0 %vm4702_vm5, %v5052_v24  ;;  %vm4448_vm6 = vmpackc.low %vm925_vm2, %vm923_vm12  ;;  %vm928_vm9 = vcmp.eq.s32.totalorder %v562_v38, %v5234_v16  ;;  %vm927_vm7 = vcmp.eq.s32.totalorder %v562_v38, %v5239_v20  ;;  %v308_v43 = vadd.s32 824, %v5222_v5  ;;  %v435_v44 = vadd.s32 1840, %v5222_v5  ;;  %2939 = vmatprep.mubr.f32.mxu0 %v2300_v37 }
 0x12d   : > { %4449 = vmatpush1.bf16.msk.msra.mxu1 %vm4448_vm6, %v5052_v24  ;;  %vm4704_vm8 = vmpackc.low %vm1181_vm3, %vm1179_vm4  ;;  %vm930_vm10 = vcmp.eq.s32.totalorder %v563_v39, %v5234_v16  ;;  %vm1184_vm13 = vcmp.eq.s32.totalorder %v690_v40, %v5234_v16  ;;  %vm1186_vm12 = vcmp.eq.s32.totalorder %v691_v41, %v5234_v16  ;;  %vm929_vm11 = vcmp.eq.s32.totalorder %v563_v39, %v5239_v20 }
 0x12e   : > { %4705 = vmatpush1.bf16.msk.msra.mxu0 %vm4704_vm8, %v5052_v24  ;;  %vm4450_vm14 = vmpackc.low %vm930_vm10, %vm928_vm9  ;;  %vm1183_vm0 = vcmp.eq.s32.totalorder %v690_v40, %v5239_v20  ;;  %vm1185_vm15 = vcmp.eq.s32.totalorder %v691_v41, %v5239_v20  ;;  %v564_v46 = vadd.s32 %v5219_v3, %v307_v42  ;;  %v565_v47 = vadd.s32 %v5219_v3, %v308_v43  ;;  %v2323_v42 = vld [vmem:[%s5210_s5 + $0x1a0] sm:$0xff] }
 0x12f   : > { %4451 = vmatprep.subr.msk.bf16.mxu1 %vm4450_vm14, %v5052_v24  ;;  %vm4706_vm1 = vmpackc.low %vm1186_vm12, %vm1184_vm13  ;;  %v436_v48 = vadd.s32 1848, %v5222_v5  ;;  %v692_v49 = vadd.s32 %v5219_v3, %v435_v44  ;;  %v309_v50 = vadd.s32 832, %v5222_v5  ;;  %v310_v51 = vadd.s32 840, %v5222_v5  ;;  %2584 = vmatmul.mubr.f32.gmra.mrb[2].mxu1 %v2291_v45 }
 0x130   : > { %4707 = vmatprep.subr.msk.bf16.mxu0 %vm4706_vm1, %v5052_v24  ;;  %vm4452_vm2 = vmpackc.low %vm929_vm11, %vm927_vm7  ;;  %vm932_vm4 = vcmp.eq.s32.totalorder %v564_v46, %v5234_v16  ;;  %vm934_vm3 = vcmp.eq.s32.totalorder %v565_v47, %v5234_v16  ;;  %vm931_vm5 = vcmp.eq.s32.totalorder %v564_v46, %v5239_v20  ;;  %vm933_vm6 = vcmp.eq.s32.totalorder %v565_v47, %v5239_v20 }
 0x131   : > { %4453 = vmatpush1.bf16.msk.msra.mxu1 %vm4452_vm2, %v5052_v24  ;;  %vm4708_vm9 = vmpackc.low %vm1185_vm15, %vm1183_vm0  ;;  %v693_v53 = vadd.s32 %v5219_v3, %v436_v48  ;;  %vm1188_vm8 = vcmp.eq.s32.totalorder %v692_v49, %v5234_v16  ;;  %vm1187_vm7 = vcmp.eq.s32.totalorder %v692_v49, %v5239_v20  ;;  %v566_v54 = vadd.s32 %v5219_v3, %v309_v50  ;;  %v2278_v49 = vld [vmem:[%s5210_s5 + $0x38] sm:$0xff] }
 0x132   : > { %4709 = vmatpush1.bf16.msk.msra.mxu0 %vm4708_vm9, %v5052_v24  ;;  %vm4454_vm10 = vmpackc.low %vm934_vm3, %vm932_vm4  ;;  %v567_v56 = vadd.s32 %v5219_v3, %v310_v51  ;;  %v437_v57 = vadd.s32 1856, %v5222_v5  ;;  %v438_v58 = vadd.s32 1864, %v5222_v5  ;;  %v311_v59 = vadd.s32 848, %v5222_v5  ;;  %2589 = vmatprep.mubr.f32.mxu1 %v2308_v52  ;;  %v2331_v52 = vld [vmem:[%s5210_s5 + $0x1e0] sm:$0xff] }
 0x133   : > { %4455 = vmatprep.subr.msk.bf16.mxu1 %vm4454_vm10, %v5052_v24  ;;  %vm1190_vm13 = vcmp.eq.s32.totalorder %v693_v53, %v5234_v16  ;;  %vm4456_vm12 = vmpackc.low %vm933_vm6, %vm931_vm5  ;;  %vm1189_vm11 = vcmp.eq.s32.totalorder %v693_v53, %v5239_v20  ;;  %vm936_vm14 = vcmp.eq.s32.totalorder %v566_v54, %v5234_v16  ;;  %vm935_vm0 = vcmp.eq.s32.totalorder %v566_v54, %v5239_v20 }
 0x134   : > { %vm4710_vm15 = vmpackc.low %vm1190_vm13, %vm1188_vm8  ;;  %vm938_vm1 = vcmp.eq.s32.totalorder %v567_v56, %v5234_v16  ;;  %v694_v60 = vadd.s32 %v5219_v3, %v437_v57  ;;  %v695_v61 = vadd.s32 %v5219_v3, %v438_v58  ;;  %vm937_vm2 = vcmp.eq.s32.totalorder %v567_v56, %v5239_v20  ;;  %2940 = vmatmul.mubr.f32.gmra.mrb[2].mxu0 %v2299_v55 }
 0x135   : > { %4711 = vmatprep.subr.msk.bf16.mxu0 %vm4710_vm15, %v5052_v24  ;;  %4457 = vmatpush1.bf16.msk.msra.mxu1 %vm4456_vm12, %v5052_v24  ;;  %vm4712_vm4 = vmpackc.low %vm1189_vm11, %vm1187_vm7  ;;  %v312_v62 = vadd.s32 856, %v5222_v5  ;;  %v568_v63 = vadd.s32 %v5219_v3, %v311_v59  ;;  %v439_v0 = vadd.s32 1872, %v5222_v5  ;;  %v440_v1 = vadd.s32 1880, %v5222_v5 }
 0x136   : > { %4713 = vmatpush1.bf16.msk.msra.mxu0 %vm4712_vm4, %v5052_v24  ;;  %vm4458_vm3 = vmpackc.low %vm938_vm1, %vm936_vm14  ;;  %vm1192_vm5 = vcmp.eq.s32.totalorder %v694_v60, %v5234_v16  ;;  %vm1194_vm6 = vcmp.eq.s32.totalorder %v695_v61, %v5234_v16  ;;  %vm1191_vm9 = vcmp.eq.s32.totalorder %v694_v60, %v5239_v20  ;;  %vm1193_vm8 = vcmp.eq.s32.totalorder %v695_v61, %v5239_v20 }
 0x137   : > { %4459 = vmatprep.subr.msk.bf16.mxu1 %vm4458_vm3, %v5052_v24  ;;  %vm4714_vm7 = vmpackc.low %vm1194_vm6, %vm1192_vm5  ;;  %v569_v4 = vadd.s32 %v5219_v3, %v312_v62  ;;  %vm940_vm10 = vcmp.eq.s32.totalorder %v568_v63, %v5234_v16  ;;  %v696_v6 = vadd.s32 %v5219_v3, %v439_v0  ;;  %v697_v7 = vadd.s32 %v5219_v3, %v440_v1 }
 0x138   : > { %4715 = vmatprep.subr.msk.bf16.mxu0 %vm4714_vm7, %v5052_v24  ;;  %vm4460_vm13 = vmpackc.low %vm937_vm2, %vm935_vm0  ;;  %vm939_vm12 = vcmp.eq.s32.totalorder %v568_v63, %v5239_v20  ;;  %v313_v8 = vadd.s32 864, %v5222_v5  ;;  %v314_v9 = vadd.s32 872, %v5222_v5  ;;  %v441_v10 = vadd.s32 1888, %v5222_v5  ;;  %2945 = vmatprep.mubr.f32.mxu0 %v2316_v2  ;;  %v2286_v63 = vld [vmem:[%s5210_s5 + $0x78] sm:$0xff] }
 0x139   : > { %4461 = vmatpush1.bf16.msk.msra.mxu1 %vm4460_vm13, %v5052_v24  ;;  %vm4716_vm11 = vmpackc.low %vm1193_vm8, %vm1191_vm9  ;;  %vm942_vm14 = vcmp.eq.s32.totalorder %v569_v4, %v5234_v16  ;;  %vm1196_vm0 = vcmp.eq.s32.totalorder %v696_v6, %v5234_v16  ;;  %vm1198_vm15 = vcmp.eq.s32.totalorder %v697_v7, %v5234_v16  ;;  %vm941_vm1 = vcmp.eq.s32.totalorder %v569_v4, %v5239_v20 }
 0x13a   : > { %4717 = vmatpush1.bf16.msk.msra.mxu0 %vm4716_vm11, %v5052_v24  ;;  %vm4462_vm2 = vmpackc.low %vm942_vm14, %vm940_vm10  ;;  %vm1195_vm4 = vcmp.eq.s32.totalorder %v696_v6, %v5239_v20  ;;  %vm1197_vm3 = vcmp.eq.s32.totalorder %v697_v7, %v5239_v20  ;;  %v570_v12 = vadd.s32 %v5219_v3, %v313_v8  ;;  %v571_v13 = vadd.s32 %v5219_v3, %v314_v9 }
 0x13b   : > { %4463 = vmatprep.subr.msk.bf16.mxu1 %vm4462_vm2, %v5052_v24  ;;  %vm4718_vm5 = vmpackc.low %vm1198_vm15, %vm1196_vm0  ;;  %v442_v14 = vadd.s32 1896, %v5222_v5  ;;  %v698_v15 = vadd.s32 %v5219_v3, %v441_v10  ;;  %v315_v17 = vadd.s32 880, %v5222_v5  ;;  %v316_v18 = vadd.s32 888, %v5222_v5  ;;  %2590 = vmatmul.mubr.f32.gmra.mrb[4].mxu1 %v2307_v11 }
 0x13c   : > { %4719 = vmatprep.subr.msk.bf16.mxu0 %vm4718_vm5, %v5052_v24  ;;  %vm4464_vm6 = vmpackc.low %vm941_vm1, %vm939_vm12  ;;  %vm944_vm9 = vcmp.eq.s32.totalorder %v570_v12, %v5234_v16  ;;  %vm946_vm8 = vcmp.eq.s32.totalorder %v571_v13, %v5234_v16  ;;  %vm943_vm7 = vcmp.eq.s32.totalorder %v570_v12, %v5239_v20  ;;  %vm945_vm10 = vcmp.eq.s32.totalorder %v571_v13, %v5239_v20 }
 0x13d   : > { %4465 = vmatpush1.bf16.msk.msra.mxu1 %vm4464_vm6, %v5052_v24  ;;  %vm4720_vm13 = vmpackc.low %vm1197_vm3, %vm1195_vm4  ;;  %v699_v21 = vadd.s32 %v5219_v3, %v442_v14  ;;  %vm1200_vm11 = vcmp.eq.s32.totalorder %v698_v15, %v5234_v16  ;;  %vm1199_vm12 = vcmp.eq.s32.totalorder %v698_v15, %v5239_v20  ;;  %v572_v22 = vadd.s32 %v5219_v3, %v315_v17 }
 0x13e   : > { %4721 = vmatpush1.bf16.msk.msra.mxu0 %vm4720_vm13, %v5052_v24  ;;  %vm4466_vm14 = vmpackc.low %vm946_vm8, %vm944_vm9  ;;  %v573_v25 = vadd.s32 %v5219_v3, %v316_v18  ;;  %v443_v26 = vadd.s32 1904, %v5222_v5  ;;  %v444_v27 = vadd.s32 1912, %v5222_v5  ;;  %v317_v28 = vadd.s32 896, %v5222_v5  ;;  %2595 = vmatprep.mubr.f32.mxu1 %v2324_v19 }
 0x13f   : > { %4467 = vmatprep.subr.msk.bf16.mxu1 %vm4466_vm14, %v5052_v24  ;;  %vm1202_vm0 = vcmp.eq.s32.totalorder %v699_v21, %v5234_v16  ;;  %vm4468_vm15 = vmpackc.low %vm945_vm10, %vm943_vm7  ;;  %vm1201_vm1 = vcmp.eq.s32.totalorder %v699_v21, %v5239_v20  ;;  %vm948_vm2 = vcmp.eq.s32.totalorder %v572_v22, %v5234_v16  ;;  %vm947_vm4 = vcmp.eq.s32.totalorder %v572_v22, %v5239_v20 }
 0x140   : > { %vm4722_vm3 = vmpackc.low %vm1202_vm0, %vm1200_vm11  ;;  %vm950_vm5 = vcmp.eq.s32.totalorder %v573_v25, %v5234_v16  ;;  %v700_v29 = vadd.s32 %v5219_v3, %v443_v26  ;;  %v701_v30 = vadd.s32 %v5219_v3, %v444_v27  ;;  %vm949_vm6 = vcmp.eq.s32.totalorder %v573_v25, %v5239_v20  ;;  %2946 = vmatmul.mubr.f32.gmra.mrb[4].mxu0 %v2315_v23 }
 0x141   : > { %4723 = vmatprep.subr.msk.bf16.mxu0 %vm4722_vm3, %v5052_v24  ;;  %4469 = vmatpush1.bf16.msk.msra.mxu1 %vm4468_vm15, %v5052_v24  ;;  %vm4724_vm9 = vmpackc.low %vm1201_vm1, %vm1199_vm12  ;;  %v318_v31 = vadd.s32 904, %v5222_v5  ;;  %v574_v32 = vadd.s32 %v5219_v3, %v317_v28  ;;  %v445_v33 = vadd.s32 1920, %v5222_v5  ;;  %v446_v34 = vadd.s32 1928, %v5222_v5 }
 0x142   : > { %4725 = vmatpush1.bf16.msk.msra.mxu0 %vm4724_vm9, %v5052_v24  ;;  %vm4470_vm8 = vmpackc.low %vm950_vm5, %vm948_vm2  ;;  %vm1204_vm7 = vcmp.eq.s32.totalorder %v700_v29, %v5234_v16  ;;  %vm1206_vm10 = vcmp.eq.s32.totalorder %v701_v30, %v5234_v16  ;;  %vm1203_vm13 = vcmp.eq.s32.totalorder %v700_v29, %v5239_v20  ;;  %vm1205_vm11 = vcmp.eq.s32.totalorder %v701_v30, %v5239_v20 }
 0x143   : > { %4471 = vmatprep.subr.msk.bf16.mxu1 %vm4470_vm8, %v5052_v24  ;;  %vm4726_vm12 = vmpackc.low %vm1206_vm10, %vm1204_vm7  ;;  %v575_v36 = vadd.s32 %v5219_v3, %v318_v31  ;;  %vm952_vm14 = vcmp.eq.s32.totalorder %v574_v32, %v5234_v16  ;;  %v702_v37 = vadd.s32 %v5219_v3, %v445_v33  ;;  %v703_v38 = vadd.s32 %v5219_v3, %v446_v34 }
 0x144   : > { %4727 = vmatprep.subr.msk.bf16.mxu0 %vm4726_vm12, %v5052_v24  ;;  %vm4472_vm0 = vmpackc.low %vm949_vm6, %vm947_vm4  ;;  %vm951_vm15 = vcmp.eq.s32.totalorder %v574_v32, %v5239_v20  ;;  %v319_v39 = vadd.s32 912, %v5222_v5  ;;  %v320_v40 = vadd.s32 920, %v5222_v5  ;;  %v447_v41 = vadd.s32 1936, %v5222_v5  ;;  %2951 = vmatprep.mubr.f32.mxu0 %v2332_v35 }
 0x145   : > { %4473 = vmatpush1.bf16.msk.msra.mxu1 %vm4472_vm0, %v5052_v24  ;;  %vm4728_vm1 = vmpackc.low %vm1205_vm11, %vm1203_vm13  ;;  %vm954_vm2 = vcmp.eq.s32.totalorder %v575_v36, %v5234_v16  ;;  %vm1208_vm4 = vcmp.eq.s32.totalorder %v702_v37, %v5234_v16  ;;  %vm1210_vm3 = vcmp.eq.s32.totalorder %v703_v38, %v5234_v16  ;;  %vm953_vm5 = vcmp.eq.s32.totalorder %v575_v36, %v5239_v20 }
 0x146   : > { %4729 = vmatpush1.bf16.msk.msra.mxu0 %vm4728_vm1, %v5052_v24  ;;  %vm4474_vm6 = vmpackc.low %vm954_vm2, %vm952_vm14  ;;  %vm1207_vm9 = vcmp.eq.s32.totalorder %v702_v37, %v5239_v20  ;;  %vm1209_vm8 = vcmp.eq.s32.totalorder %v703_v38, %v5239_v20  ;;  %v576_v43 = vadd.s32 %v5219_v3, %v319_v39  ;;  %v577_v44 = vadd.s32 %v5219_v3, %v320_v40  ;;  %v2285_v39 = vld [vmem:[%s5210_s5 + $0x70] sm:$0xff]  ;;  %v2294_v40 = vld [vmem:[%s5210_s5 + $0xb8] sm:$0xff] }
 0x147   : > { %4475 = vmatprep.subr.msk.bf16.mxu1 %vm4474_vm6, %v5052_v24  ;;  %vm4730_vm7 = vmpackc.low %vm1210_vm3, %vm1208_vm4  ;;  %v448_v45 = vadd.s32 1944, %v5222_v5  ;;  %v704_v46 = vadd.s32 %v5219_v3, %v447_v41  ;;  %v321_v47 = vadd.s32 928, %v5222_v5  ;;  %v322_v48 = vadd.s32 936, %v5222_v5  ;;  %2596 = vmatmul.mubr.f32.gmra.mrb[6].mxu1 %v2323_v42  ;;  %v2301_v41 = vld [vmem:[%s5210_s5 + $0xf0] sm:$0xff]  ;;  %v2310_v42 = vld [vmem:[%s5210_s5 + $0x138] sm:$0xff] }
 0x148   : > { %4731 = vmatprep.subr.msk.bf16.mxu0 %vm4730_vm7, %v5052_v24  ;;  %vm4476_vm10 = vmpackc.low %vm953_vm5, %vm951_vm15  ;;  %vm956_vm13 = vcmp.eq.s32.totalorder %v576_v43, %v5234_v16  ;;  %vm958_vm11 = vcmp.eq.s32.totalorder %v577_v44, %v5234_v16  ;;  %vm955_vm12 = vcmp.eq.s32.totalorder %v576_v43, %v5239_v20  ;;  %vm957_vm14 = vcmp.eq.s32.totalorder %v577_v44, %v5239_v20  ;;  %v2318_v43 = vld [vmem:[%s5210_s5 + $0x178] sm:$0xff]  ;;  %v2317_v44 = vld [vmem:[%s5210_s5 + $0x170] sm:$0xff] }
 0x149   : > { %4477 = vmatpush1.bf16.msk.msra.mxu1 %vm4476_vm10, %v5052_v24  ;;  %vm4732_vm0 = vmpackc.low %vm1209_vm8, %vm1207_vm9  ;;  %v705_v50 = vadd.s32 %v5219_v3, %v448_v45  ;;  %vm1212_vm1 = vcmp.eq.s32.totalorder %v704_v46, %v5234_v16  ;;  %vm1211_vm15 = vcmp.eq.s32.totalorder %v704_v46, %v5239_v20  ;;  %v578_v51 = vadd.s32 %v5219_v3, %v321_v47  ;;  %v2326_v45 = vld [vmem:[%s5210_s5 + $0x1b8] sm:$0xff]  ;;  %v2325_v47 = vld [vmem:[%s5210_s5 + $0x1b0] sm:$0xff] }
 0x14a   : > { %4733 = vmatpush1.bf16.msk.msra.mxu0 %vm4732_vm0, %v5052_v24  ;;  %vm4478_vm2 = vmpackc.low %vm958_vm11, %vm956_vm13  ;;  %v579_v53 = vadd.s32 %v5219_v3, %v322_v48  ;;  %v449_v54 = vadd.s32 1952, %v5222_v5  ;;  %v450_v55 = vadd.s32 1960, %v5222_v5  ;;  %v323_v56 = vadd.s32 944, %v5222_v5  ;;  %2666 = vmatprep.mubr.f32.mxu1 %v2278_v49  ;;  %v2334_v46 = vld [vmem:[%s5210_s5 + $0x1f8] sm:$0xff]  ;;  %v2333_v48 = vld [vmem:[%s5210_s5 + $0x1f0] sm:$0xff] }
 0x14b   : > { %4479 = vmatprep.subr.msk.bf16.mxu1 %vm4478_vm2, %v5052_v24  ;;  %vm1214_vm4 = vcmp.eq.s32.totalorder %v705_v50, %v5234_v16  ;;  %vm4480_vm3 = vmpackc.low %vm957_vm14, %vm955_vm12  ;;  %vm1213_vm5 = vcmp.eq.s32.totalorder %v705_v50, %v5239_v20  ;;  %vm960_vm6 = vcmp.eq.s32.totalorder %v578_v51, %v5234_v16  ;;  %vm959_vm9 = vcmp.eq.s32.totalorder %v578_v51, %v5239_v20  ;;  %v2263_v50 = vld [vmem:[#allocation7] sm:$0xff] }
 0x14c   : > { %vm4734_vm8 = vmpackc.low %vm1214_vm4, %vm1212_vm1  ;;  %vm962_vm7 = vcmp.eq.s32.totalorder %v579_v53, %v5234_v16  ;;  %v706_v57 = vadd.s32 %v5219_v3, %v449_v54  ;;  %v707_v58 = vadd.s32 %v5219_v3, %v450_v55  ;;  %vm961_vm10 = vcmp.eq.s32.totalorder %v579_v53, %v5239_v20  ;;  %2952 = vmatmul.mubr.f32.gmra.mrb[6].mxu0 %v2331_v52  ;;  %v2264_v54 = vld [vmem:[#allocation7 + $0x8] sm:$0xff] }
 0x14d   : > { %4735 = vmatprep.subr.msk.bf16.mxu0 %vm4734_vm8, %v5052_v24  ;;  %4481 = vmatpush1.bf16.msk.msra.mxu1 %vm4480_vm3, %v5052_v24  ;;  %vm4736_vm13 = vmpackc.low %vm1213_vm5, %vm1211_vm15  ;;  %v324_v59 = vadd.s32 952, %v5222_v5  ;;  %v580_v60 = vadd.s32 %v5219_v3, %v323_v56  ;;  %v451_v61 = vadd.s32 1968, %v5222_v5  ;;  %v452_v62 = vadd.s32 1976, %v5222_v5 }
 0x14e   : > { %4737 = vmatpush1.bf16.msk.msra.mxu0 %vm4736_vm13, %v5052_v24  ;;  %vm4482_vm11 = vmpackc.low %vm962_vm7, %vm960_vm6  ;;  %vm1216_vm12 = vcmp.eq.s32.totalorder %v706_v57, %v5234_v16  ;;  %vm1218_vm14 = vcmp.eq.s32.totalorder %v707_v58, %v5234_v16  ;;  %vm1215_vm0 = vcmp.eq.s32.totalorder %v706_v57, %v5239_v20  ;;  %vm1217_vm1 = vcmp.eq.s32.totalorder %v707_v58, %v5239_v20 }
 0x14f   : > { %4483 = vmatprep.subr.msk.bf16.mxu1 %vm4482_vm11, %v5052_v24  ;;  %vm4738_vm15 = vmpackc.low %vm1218_vm14, %vm1216_vm12  ;;  %v581_v0 = vadd.s32 %v5219_v3, %v324_v59  ;;  %vm964_vm2 = vcmp.eq.s32.totalorder %v580_v60, %v5234_v16  ;;  %v708_v1 = vadd.s32 %v5219_v3, %v451_v61  ;;  %v709_v2 = vadd.s32 %v5219_v3, %v452_v62 }
 0x150   : > { %4739 = vmatprep.subr.msk.bf16.mxu0 %vm4738_vm15, %v5052_v24  ;;  %vm4484_vm4 = vmpackc.low %vm961_vm10, %vm959_vm9  ;;  %vm963_vm3 = vcmp.eq.s32.totalorder %v580_v60, %v5239_v20  ;;  %v325_v4 = vadd.s32 960, %v5222_v5  ;;  %v326_v6 = vadd.s32 968, %v5222_v5  ;;  %v453_v7 = vadd.s32 1984, %v5222_v5  ;;  %3022 = vmatprep.mubr.f32.mxu0 %v2286_v63  ;;  %v2265_v60 = vld [vmem:[#allocation7 + $0x10] sm:$0xff] }
 0x151   : > { %4485 = vmatpush1.bf16.msk.msra.mxu1 %vm4484_vm4, %v5052_v24  ;;  %vm4740_vm5 = vmpackc.low %vm1217_vm1, %vm1215_vm0  ;;  %vm966_vm6 = vcmp.eq.s32.totalorder %v581_v0, %v5234_v16  ;;  %vm1220_vm9 = vcmp.eq.s32.totalorder %v708_v1, %v5234_v16  ;;  %vm1222_vm8 = vcmp.eq.s32.totalorder %v709_v2, %v5234_v16  ;;  %vm965_vm7 = vcmp.eq.s32.totalorder %v581_v0, %v5239_v20  ;;  %v2266_v0 = vld [vmem:[#allocation7 + $0x18] sm:$0xff] }
 0x152   : > { %4741 = vmatpush1.bf16.msk.msra.mxu0 %vm4740_vm5, %v5052_v24  ;;  %vm4486_vm10 = vmpackc.low %vm966_vm6, %vm964_vm2  ;;  %vm1219_vm13 = vcmp.eq.s32.totalorder %v708_v1, %v5239_v20  ;;  %vm1221_vm11 = vcmp.eq.s32.totalorder %v709_v2, %v5239_v20  ;;  %v582_v8 = vadd.s32 %v5219_v3, %v325_v4  ;;  %v583_v9 = vadd.s32 %v5219_v3, %v326_v6 }
 0x153   : > { %4487 = vmatprep.subr.msk.bf16.mxu1 %vm4486_vm10, %v5052_v24  ;;  %vm4742_vm12 = vmpackc.low %vm1222_vm8, %vm1220_vm9  ;;  %v454_v10 = vadd.s32 1992, %v5222_v5  ;;  %v710_v11 = vadd.s32 %v5219_v3, %v453_v7  ;;  %v327_v12 = vadd.s32 976, %v5222_v5  ;;  %v328_v13 = vadd.s32 984, %v5222_v5 }
 0x154   : > { %4743 = vmatprep.subr.msk.bf16.mxu0 %vm4742_vm12, %v5052_v24  ;;  %vm4488_vm14 = vmpackc.low %vm965_vm7, %vm963_vm3  ;;  %vm968_vm0 = vcmp.eq.s32.totalorder %v582_v8, %v5234_v16  ;;  %vm970_vm1 = vcmp.eq.s32.totalorder %v583_v9, %v5234_v16  ;;  %vm967_vm15 = vcmp.eq.s32.totalorder %v582_v8, %v5239_v20  ;;  %vm969_vm2 = vcmp.eq.s32.totalorder %v583_v9, %v5239_v20  ;;  %v2267_v8 = vld [vmem:[#allocation7 + $0x20] sm:$0xff] }
 0x155   : > { %4489 = vmatpush1.bf16.msk.msra.mxu1 %vm4488_vm14, %v5052_v24  ;;  %vm4744_vm4 = vmpackc.low %vm1221_vm11, %vm1219_vm13  ;;  %v711_v14 = vadd.s32 %v5219_v3, %v454_v10  ;;  %vm1224_vm5 = vcmp.eq.s32.totalorder %v710_v11, %v5234_v16  ;;  %vm1223_vm3 = vcmp.eq.s32.totalorder %v710_v11, %v5239_v20  ;;  %v584_v15 = vadd.s32 %v5219_v3, %v327_v12  ;;  %v2268_v12 = vld [vmem:[#allocation7 + $0x28] sm:$0xff] }
 0x156   : > { %4745 = vmatpush1.bf16.msk.msra.mxu0 %vm4744_vm4, %v5052_v24  ;;  %vm4490_vm6 = vmpackc.low %vm970_vm1, %vm968_vm0  ;;  %v585_v17 = vadd.s32 %v5219_v3, %v328_v13  ;;  %v455_v18 = vadd.s32 2000, %v5222_v5  ;;  %v456_v19 = vadd.s32 2008, %v5222_v5  ;;  %v329_v21 = vadd.s32 992, %v5222_v5 }
 0x157   : > { %4491 = vmatprep.subr.msk.bf16.mxu1 %vm4490_vm6, %v5052_v24  ;;  %vm1226_vm9 = vcmp.eq.s32.totalorder %v711_v14, %v5234_v16  ;;  %vm4492_vm8 = vmpackc.low %vm969_vm2, %vm967_vm15  ;;  %vm1225_vm7 = vcmp.eq.s32.totalorder %v711_v14, %v5239_v20  ;;  %vm972_vm10 = vcmp.eq.s32.totalorder %v584_v15, %v5234_v16  ;;  %vm971_vm13 = vcmp.eq.s32.totalorder %v584_v15, %v5239_v20 }
 0x158   : > { %vm4746_vm11 = vmpackc.low %vm1226_vm9, %vm1224_vm5  ;;  %vm974_vm12 = vcmp.eq.s32.totalorder %v585_v17, %v5234_v16  ;;  %v712_v22 = vadd.s32 %v5219_v3, %v455_v18  ;;  %v713_v23 = vadd.s32 %v5219_v3, %v456_v19  ;;  %vm973_vm14 = vcmp.eq.s32.totalorder %v585_v17, %v5239_v20  ;;  %v2269_v19 = vld [vmem:[#allocation7 + $0x30] sm:$0xff] }
 0x159   : > { %4747 = vmatprep.subr.msk.bf16.mxu0 %vm4746_vm11, %v5052_v24  ;;  %4493 = vmatpush1.bf16.msk.msra.mxu1 %vm4492_vm8, %v5052_v24  ;;  %vm4748_vm0 = vmpackc.low %vm1225_vm7, %vm1223_vm3  ;;  %v330_v25 = vadd.s32 1000, %v5222_v5  ;;  %v586_v26 = vadd.s32 %v5219_v3, %v329_v21  ;;  %v457_v27 = vadd.s32 2016, %v5222_v5  ;;  %v458_v28 = vadd.s32 2024, %v5222_v5 }
 0x15a   : > { %4749 = vmatpush1.bf16.msk.msra.mxu0 %vm4748_vm0, %v5052_v24  ;;  %vm4494_vm1 = vmpackc.low %vm974_vm12, %vm972_vm10  ;;  %vm1228_vm15 = vcmp.eq.s32.totalorder %v712_v22, %v5234_v16  ;;  %vm1230_vm2 = vcmp.eq.s32.totalorder %v713_v23, %v5234_v16  ;;  %vm1227_vm4 = vcmp.eq.s32.totalorder %v712_v22, %v5239_v20  ;;  %vm1229_vm5 = vcmp.eq.s32.totalorder %v713_v23, %v5239_v20 }
 0x15b   : > { %4495 = vmatprep.subr.msk.bf16.mxu1 %vm4494_vm1, %v5052_v24  ;;  %vm4750_vm3 = vmpackc.low %vm1230_vm2, %vm1228_vm15  ;;  %v587_v29 = vadd.s32 %v5219_v3, %v330_v25  ;;  %vm976_vm6 = vcmp.eq.s32.totalorder %v586_v26, %v5234_v16  ;;  %v714_v30 = vadd.s32 %v5219_v3, %v457_v27  ;;  %v715_v31 = vadd.s32 %v5219_v3, %v458_v28  ;;  %v2270_v25 = vld [vmem:[#allocation7 + $0x38] sm:$0xff] }
 0x15c   : > { %4751 = vmatprep.subr.msk.bf16.mxu0 %vm4750_vm3, %v5052_v24  ;;  %vm4496_vm9 = vmpackc.low %vm973_vm14, %vm971_vm13  ;;  %vm975_vm8 = vcmp.eq.s32.totalorder %v586_v26, %v5239_v20  ;;  %v331_v32 = vadd.s32 1008, %v5222_v5  ;;  %v332_v33 = vadd.s32 1016, %v5222_v5  ;;  %v459_v34 = vadd.s32 2032, %v5222_v5 }
 0x15d   : > { %4497 = vmatpush1.bf16.msk.msra.mxu1 %vm4496_vm9, %v5052_v24  ;;  %vm4752_vm7 = vmpackc.low %vm1229_vm5, %vm1227_vm4  ;;  %vm978_vm10 = vcmp.eq.s32.totalorder %v587_v29, %v5234_v16  ;;  %vm1232_vm11 = vcmp.eq.s32.totalorder %v714_v30, %v5234_v16  ;;  %vm1234_vm12 = vcmp.eq.s32.totalorder %v715_v31, %v5234_v16  ;;  %vm977_vm13 = vcmp.eq.s32.totalorder %v587_v29, %v5239_v20 }
 0x15e   : > { %4753 = vmatpush1.bf16.msk.msra.mxu0 %vm4752_vm7, %v5052_v24  ;;  %vm4498_vm14 = vmpackc.low %vm978_vm10, %vm976_vm6  ;;  %vm1231_vm0 = vcmp.eq.s32.totalorder %v714_v30, %v5239_v20  ;;  %vm1233_vm1 = vcmp.eq.s32.totalorder %v715_v31, %v5239_v20  ;;  %v588_v35 = vadd.s32 %v5219_v3, %v331_v32  ;;  %v589_v36 = vadd.s32 %v5219_v3, %v332_v33 }
 0x15f   : > { %4499 = vmatprep.subr.msk.bf16.mxu1 %vm4498_vm14, %v5052_v24  ;;  %vm4754_vm15 = vmpackc.low %vm1234_vm12, %vm1232_vm11  ;;  %v460_v37 = vadd.s32 2040, %v5222_v5  ;;  %v716_v38 = vadd.s32 %v5219_v3, %v459_v34 }
 0x160   : > { %4755 = vmatprep.subr.msk.bf16.mxu0 %vm4754_vm15, %v5052_v24  ;;  %vm4500_vm2 = vmpackc.low %vm977_vm13, %vm975_vm8  ;;  %vm980_vm4 = vcmp.eq.s32.totalorder %v588_v35, %v5234_v16  ;;  %vm982_vm5 = vcmp.eq.s32.totalorder %v589_v36, %v5234_v16  ;;  %vm979_vm3 = vcmp.eq.s32.totalorder %v588_v35, %v5239_v20  ;;  %vm981_vm6 = vcmp.eq.s32.totalorder %v589_v36, %v5239_v20 }
 0x161   : > { %4501 = vmatpush1.bf16.msk.msra.mxu1 %vm4500_vm2, %v5052_v24  ;;  %vm4756_vm9 = vmpackc.low %vm1233_vm1, %vm1231_vm0  ;;  %v717_v5 = vadd.s32 %v5219_v3, %v460_v37  ;;  %vm1236_vm8 = vcmp.eq.s32.totalorder %v716_v38, %v5234_v16  ;;  %vm1235_vm10 = vcmp.eq.s32.totalorder %v716_v38, %v5239_v20  ;;  %v2277_v3 = vld [vmem:[%s5210_s5 + $0x30] sm:$0xff] }
 0x162   : > { %4757 = vmatpush1.bf16.msk.msra.mxu0 %vm4756_vm9, %v5052_v24  ;;  %vm4502_vm7 = vmpackc.low %vm982_vm5, %vm980_vm4 }
 0x163   : > { %4503 = vmatprep.subr.msk.bf16.mxu1 %vm4502_vm7, %v5052_v24  ;;  %vm1238_vm11 = vcmp.eq.s32.totalorder %v717_v5, %v5234_v16  ;;  %vm4504_vm12 = vmpackc.low %vm981_vm6, %vm979_vm3  ;;  %vm1237_vm13 = vcmp.eq.s32.totalorder %v717_v5, %v5239_v20  ;;  %v2302_v16 = vld [vmem:[%s5210_s5 + $0xf8] sm:$0xff]  ;;  %v2293_v20 = vld [vmem:[%s5210_s5 + $0xb0] sm:$0xff] }
 0x164   : > { %vm4758_vm14 = vmpackc.low %vm1238_vm11, %vm1236_vm8 }
 0x165   : > { %4759 = vmatprep.subr.msk.bf16.mxu0 %vm4758_vm14, %v5052_v24  ;;  %4505 = vmatpush1.bf16.msk.msra.mxu1 %vm4504_vm12, %v5052_v24  ;;  %vm4760_vm0 = vmpackc.low %vm1237_vm13, %vm1235_vm10 }
 0x166   : > { %4761 = vmatpush1.bf16.msk.msra.mxu0 %vm4760_vm0, %v5052_v24  ;;  %v2309_v24 = vld [vmem:[%s5210_s5 + $0x130] sm:$0xff] }
 0x168   : > { %2667 = vmatmul.mubr.f32.vlgmr.msra.gmra.mrb[0].mxu1 %v2277_v3 }
 0x169   : > { %3023 = vmatmul.mubr.f32.vlgmr.msra.gmra.mrb[0].mxu0 %v2285_v39  ;;  %2672 = vmatprep.mubr.f32.mxu1 %v2294_v40 }
 0x16a   : > { %3028 = vmatprep.mubr.f32.mxu0 %v2302_v16 }
 0x16c   : > { %2673 = vmatmul.mubr.f32.gmra.mrb[2].mxu1 %v2293_v20 }
 0x16d   : > { %3029 = vmatmul.mubr.f32.gmra.mrb[2].mxu0 %v2301_v41  ;;  %2678 = vmatprep.mubr.f32.mxu1 %v2310_v42 }
 0x16e   : > { %3034 = vmatprep.mubr.f32.mxu0 %v2318_v43 }
 0x170   : > { %2679 = vmatmul.mubr.f32.gmra.mrb[4].mxu1 %v2309_v24 }
 0x171   : > { %3035 = vmatmul.mubr.f32.gmra.mrb[4].mxu0 %v2317_v44  ;;  %2684 = vmatprep.mubr.f32.mxu1 %v2326_v45 }
 0x172   : > { %3040 = vmatprep.mubr.f32.mxu0 %v2334_v46 }
 0x174   : > { %2685 = vmatmul.mubr.f32.gmra.mrb[6].mxu1 %v2325_v47 }
 0x175   : > { %3041 = vmatmul.mubr.f32.gmra.mrb[6].mxu0 %v2333_v48 }
 0x23b   : > { %v2668_v49 = vpop.f32.mrb[0].mxu1 }
 0x23c   : > { %v3024_v51 = vpop.f32.mrb[0].mxu0  ;;  %v2670_v52 = vpop.f32.mrb[1].mxu1 }
 0x23d   : > { %v4762_v53 = vadd.f32 %v3024_v51, %v2668_v49  ;;  %v3026_v55 = vpop.f32.mrb[1].mxu0 }
 0x23e   : > { %v4763_v56 = vadd.f32 %v3026_v55, %v2670_v52 }
 0x23f   : > { %v3047_v57 = vadd.f32 %v4762_v53, %v2263_v50  ;;  %v2674_v58 = vpop.f32.mrb[2].mxu1 }
 0x240   : > { %v3048_v59 = vadd.f32 %v4763_v56, %v2264_v54  ;;  %v3030_v61 = vpop.f32.mrb[2].mxu0  ;;  %v2676_v62 = vpop.f32.mrb[3].mxu1 }
 0x241   : > { %3055 = vst [vmem:[#allocation7] sm:$0xff] %v3047_v57  ;;  %v4764_v63 = vadd.f32 %v3030_v61, %v2674_v58  ;;  %v3032_v1 = vpop.f32.mrb[3].mxu0 }
 0x242   : > { %3056 = vst [vmem:[#allocation7 + $0x8] sm:$0xff] %v3048_v59  ;;  %v4765_v2 = vadd.f32 %v3032_v1, %v2676_v62 }
 0x243   : > { %v3049_v4 = vadd.f32 %v4764_v63, %v2265_v60  ;;  %v2680_v6 = vpop.f32.mrb[4].mxu1 }
 0x244   : > { %v3050_v7 = vadd.f32 %v4765_v2, %v2266_v0  ;;  %v3036_v9 = vpop.f32.mrb[4].mxu0  ;;  %v2682_v10 = vpop.f32.mrb[5].mxu1 }
 0x245   : > { %3057 = vst [vmem:[#allocation7 + $0x10] sm:$0xff] %v3049_v4  ;;  %v4766_v11 = vadd.f32 %v3036_v9, %v2680_v6  ;;  %v3038_v13 = vpop.f32.mrb[5].mxu0 }
 0x246   : > { %3058 = vst [vmem:[#allocation7 + $0x18] sm:$0xff] %v3050_v7  ;;  %v4767_v14 = vadd.f32 %v3038_v13, %v2682_v10 }
 0x247   : > { %v3051_v15 = vadd.f32 %v4766_v11, %v2267_v8  ;;  %v2686_v17 = vpop.f32.mrb[6].mxu1 }
 0x248   : > { %v3052_v18 = vadd.f32 %v4767_v14, %v2268_v12  ;;  %v3042_v21 = vpop.f32.mrb[6].mxu0  ;;  %v2688_v22 = vpop.f32.mrb[7].mxu1  ;;  %3066 = sbr.rel (%p4244_p4) target bundleno = 632 (0x278), region = 44  ;;  %v3067_v30 = vld [vmem:[#allocation7] sm:$0xff] (!%p4244_p4) }
 0x249   : > { %3059 = vst [vmem:[#allocation7 + $0x20] sm:$0xff] %v3051_v15  ;;  %v4768_v23 = vadd.f32 %v3042_v21, %v2686_v17  ;;  %v3044_v26 = vpop.f32.mrb[7].mxu0  ;;  %v3075_v34 = vmul.f32 (!%p4244_p4), %v3067_v30, %v3067_v30  ;;  %v3068_v37 = vld [vmem:[#allocation7 + $0x8] sm:$0xff] (!%p4244_p4) }
 0x24a   : > { %3060 = vst [vmem:[#allocation7 + $0x28] sm:$0xff] %v3052_v18  ;;  %v4769_v27 = vadd.f32 %v3044_v26, %v2688_v22  ;;  %v3076_v39 = vmul.f32 (!%p4244_p4), %v3068_v37, %v3068_v37 }
 0x24b   : > { %v3053_v28 = vadd.f32 %v4768_v23, %v2269_v19 }
 0x24c   : > { %v3054_v29 = vadd.f32 %v4769_v27, %v2270_v25  ;;  %v3069_v31 = vld [vmem:[#allocation7 + $0x10] sm:$0xff] (!%p4244_p4) }
 0x24d   : > { %3061 = vst [vmem:[#allocation7 + $0x30] sm:$0xff] %v3053_v28  ;;  %v3077_v35 = vmul.f32 (!%p4244_p4), %v3069_v31, %v3069_v31  ;;  %v3070_v38 = vld [vmem:[#allocation7 + $0x18] sm:$0xff] (!%p4244_p4) }
 0x24e   : > { %3062 = vst [vmem:[#allocation7 + $0x38] sm:$0xff] %v3054_v29  ;;  %v3078_v40 = vmul.f32 (!%p4244_p4), %v3070_v38, %v3070_v38 }
 0x24f   : > { %v3083_v20 = vadd.f32 %v3077_v35, %v3075_v34 }
 0x250   : > { %v3071_v32 = vld [vmem:[#allocation7 + $0x20] sm:$0xff]  ;;  %v3092_v43 = vadd.f32 %v3078_v40, %v3076_v39 }
 0x251   : > { %v3079_v36 = vmul.f32 %v3071_v32, %v3071_v32  ;;  %v3072_v5 = vld [vmem:[#allocation7 + $0x28] sm:$0xff] }
 0x252   : > { %v3080_v41 = vmul.f32 %v3072_v5, %v3072_v5 }
 0x253   : > { %v3084_v24 = vadd.f32 %v3083_v20, %v3079_v36 }
 0x254   : > { %v3073_v33 = vld [vmem:[#allocation7 + $0x30] sm:$0xff]  ;;  %v3093_v44 = vadd.f32 %v3092_v43, %v3080_v41 }
 0x255   : > { %v3074_v3 = vld [vmem:[#allocation7 + $0x38] sm:$0xff]  ;;  %v3081_v16 = vmul.f32 %v3073_v33, %v3073_v33 }
 0x256   : > { %v3082_v42 = vmul.f32 %v3074_v3, %v3074_v3 }
 0x257   : > { %v3085_v45 = vadd.f32 %v3084_v24, %v3081_v16 }
 0x258   : > { %v3094_v46 = vadd.f32 %v3093_v44, %v3082_v42 }
 0x259   : > { %v3086_v47 = vrot.slane %v3085_v45, 4 }
 0x25a   : > { %v3095_v48 = vrot.slane %v3094_v46, 4 }
 0x25b   : > { %v3087_v49 = vadd.f32 %v3086_v47, %v3085_v45 }
 0x25c   : > { %v3096_v50 = vadd.f32 %v3095_v48, %v3094_v46 }
 0x25d   : > { %v3088_v51 = vrot.slane %v3087_v49, 2 }
 0x25e   : > { %v3097_v52 = vrot.slane %v3096_v50, 2 }
 0x25f   : > { %v3089_v53 = vadd.f32 %v3088_v51, %v3087_v49 }
 0x260   : > { %v3098_v54 = vadd.f32 %v3097_v52, %v3096_v50 }
 0x261   : > { %v3090_v55 = vrot.slane %v3089_v53, 1 }
 0x262   : > { %v3099_v56 = vrot.slane %v3098_v54, 1 }
 0x263   : > { %v3091_v57 = vadd.f32 %v3090_v55, %v3089_v53 }
 0x264   : > { %v3100_v58 = vadd.f32 %v3099_v56, %v3098_v54 }
 0x265   : > { %v3101_v59 = vadd.f32 1e-12, %v3091_v57 }
 0x266   : > { %v3102_v60 = vadd.f32 1e-12, %v3100_v58 }
 0x267   : > { %4898 = vrsqrt.f32 %v3101_v59 }
 0x268   : > { %4900 = vrsqrt.f32 %v3102_v60 }
 0x271   : > { %v4899_v61 = vpop.eup %4898 }
 0x272   : > { %v4901_v62 = vpop.eup %4900  ;;  %v3105_v63 = vmul.f32 %v4899_v61, %v3067_v30  ;;  %v3107_v0 = vmul.f32 %v4899_v61, %v3069_v31  ;;  %v3109_v1 = vmul.f32 %v4899_v61, %v3071_v32  ;;  %v3111_v2 = vmul.f32 %v4899_v61, %v3073_v33 }
 0x273   : > { %v3106_v4 = vmul.f32 %v4901_v62, %v3068_v37  ;;  %v3108_v6 = vmul.f32 %v4901_v62, %v3070_v38  ;;  %v3110_v7 = vmul.f32 %v4901_v62, %v3072_v5  ;;  %v3112_v8 = vmul.f32 %v4901_v62, %v3074_v3 }
 0x274   : > { %3113 = vst [vmem:[#allocation7] sm:$0xff] %v3105_v63  ;;  %3115 = vst [vmem:[#allocation7 + $0x10] sm:$0xff] %v3107_v0 }
 0x275   : > { %3117 = vst [vmem:[#allocation7 + $0x20] sm:$0xff] %v3109_v1  ;;  %3119 = vst [vmem:[#allocation7 + $0x30] sm:$0xff] %v3111_v2 }
 0x276   : > { %3114 = vst [vmem:[#allocation7 + $0x8] sm:$0xff] %v3106_v4  ;;  %3116 = vst [vmem:[#allocation7 + $0x18] sm:$0xff] %v3108_v6 }
 0x277   : > { %3118 = vst [vmem:[#allocation7 + $0x28] sm:$0xff] %v3110_v7  ;;  %3120 = vst [vmem:[#allocation7 + $0x38] sm:$0xff] %v3112_v8 }
 0x278 PF: > { %p7111_p7 = scmp.eq.s32.totalorder %s3208_s15, 7  ;;  %s5053_s18 = smov [#allocation7]  }
 0x279   : > { %s3130_s19 = sshll.u32 %s5053_s18, 4  ;;  %s3131_s19 = int_to_ptr.vmem [resolvable:$true] %s3130_s19 }
 0x27a   : > { %s4960_s24 = scalar_lea.vmem %s3131_s19, 1024  ;;  %p4967_p6 = scmp.lt.s32.totalorder %s3131_s19, %s3131_s19 }
 0x27b   : > { %p4961_p9 = scmp.ne.s32.totalorder %s3131_s19, %s4960_s24  ;;  %p4968_p8 = scmp.lt.s32.totalorder %s4960_s24, %s4960_s24 }
 0x27d   : > { %p4962_p10 = pnand %p4961_p9, %p7111_p7  ;;  %p4969_p13 = por %p4968_p8, %p4967_p6 }
 0x27f   : > { %p4963_p3 = pneg %p4962_p10 }
 0x281   : > { %p4970_p1 = pnand %p4969_p13, %p4963_p3 }
 0x283   : > { %4973 = shalt.err (!%p4970_p1)
}
 0x284   : > { %s4974_s15 = scalar_lea.hbm %s7157_s2, 1024 }
 0x285   : > { %p4975_p2 = scmp.ne.s32.totalorder %s7157_s2, %s4974_s15  ;;  %p4980_p5 = scmp.lt.u32.totalorder %s4974_s15, %s7157_s2 }
 0x287   : > { %p4976_p12 = pnand %p4975_p2, %p7111_p7 }
 0x289   : > { %p4977_p0 = pneg %p4976_p12 }
 0x28b   : > { %p4982_p11 = pnand %p4980_p5, %p4977_p0 }
 0x28d   : > { %4985 = shalt.err (!%p4982_p11)
}
 0x28e   : > { %s5054_s22 = smov 256   ;;  %s5055_s9 = smov 16  }
 0x28f   : > { %4825 = dma.vmem_to_hbm [thread:$0]  (%p7111_p7), %s3131_s19, 1024, %s7157_s2, [#allocation4], %s5054_s22, %s5054_s22, %s5055_s9  }
 0x290   : > { %5019 = dma.done.wait (%p7111_p7), [#allocation4], 1024  }
 0x291   : > { %5021 = vsyncadd (%p7111_p7), [#allocation4], 4294966272 }
 0x292 PF: > { %s17_s14 = sadd.s32 1, %s5044_s14   ;;  %s7173_s9 = smov %s5028_s10 }
 0x293   : > { %p14_p4 = scmp.ge.s32.totalorder %s17_s14, 10   ;;  %s7174_s10 = smov %s5032_s11 }
 0x294   : > { %s7175_s11 = smov %s5171_s28  ;;  %s7176_s12 = smov %s5040_s13 }
 0x295   : > { %s7177_s13 = smov %s7179_s7  ;;  %16 = sbr.rel (!%p14_p4) target bundleno = 6 (0x6), region = 80 }
 0x29c   :  { %3146 = vsyncpa [#allocation3], 1 }
 0x29d   :  { %3148 = vsyncpa [#allocation3 + $0x1], 1 }
 0x29e   :  { %3149 = vsyncpa [#allocation6], 1 }
 0x29f   :  { %3151 = vsyncpa [#allocation6 + $0x1], 1 }
 0x2a0   :  { %3152 = vsyncpa [#allocation4], 1 }
 0x2a1   :  { %3154 = vsyncpa [#allocation4 + $0x1], 1 }

</bundles_post_ra>
